<compile_context>
chip_gen: v5e
topology: v5e:2x2
jax: 0.10.0
libtpu: 0.0.40
codegen_flags: <defaults>
</compile_context>

<pallas_src>
import functools

import jax
import jax.numpy as jnp
from jax import lax
from jax.experimental import pallas as pl
from jax.experimental.pallas import tpu as pltpu


def _fused_dwconv_bn_pw_kernel(x_ref, w_dw_ref, b_dw_ref, gamma_ref, beta_ref,
                               w_pw_ref, b_pw_ref, out_ref, y_vmem, xpad_vmem, *,
                               kernel_size, stride, dilation, padding,
                               h_out, w_out, n_batch, eps):
    """Fused depthwise conv -> BatchNorm (batch stats) -> pointwise 1x1 conv.

    x_ref:     (1, C, H, W)        current batch element
    w_dw_ref:  (C, K, K)           depthwise filters (VMEM)
    b_dw_ref:  (C, 1, 1)           depthwise bias (VMEM)
    gamma_ref: (1, C, 1, 1)        BN weight (VMEM)
    beta_ref:  (1, C, 1, 1)        BN bias (VMEM)
    w_pw_ref:  (O, C)              pointwise weight (SMEM, scalar reads)
    b_pw_ref:  (O,)                pointwise bias (SMEM, scalar reads)
    out_ref:   (N, O, h_out, w_out) whole output, resident across the grid
    y_vmem:    (N, C, h_out, w_out) resident depthwise activation (never hits HBM)
    xpad_vmem: (C, Hp, Wp)          zero-padded input halo buffer
    """
    n = pl.program_id(0)
    c_dim = w_dw_ref.shape[0]
    h_in = x_ref.shape[2]
    w_in = x_ref.shape[3]
    o_dim = w_pw_ref.shape[0]

    # ---------- Phase A (every step): depthwise conv of batch element n ----------
    # Zero the padded scratch ONCE; later steps only overwrite the interior, so the
    # halo border stays zero (no full-buffer refill per step).
    @pl.when(n == 0)
    def _():
        xpad_vmem[...] = jnp.zeros(xpad_vmem.shape, xpad_vmem.dtype)

    xpad_vmem[:, padding:padding + h_in, padding:padding + w_in] = (
        x_ref[0].astype(jnp.float32))
    xp = xpad_vmem[...]                                   # (C, Hp, Wp)
    wk = w_dw_ref[...].astype(jnp.float32)                # (C, K, K)

    acc = jnp.zeros((c_dim, h_out, w_out), jnp.float32)
    for i in range(kernel_size):
        for j in range(kernel_size):
            r0 = i * dilation
            c0 = j * dilation
            patch = xp[:, r0:r0 + (h_out - 1) * stride + 1:stride,
                          c0:c0 + (w_out - 1) * stride + 1:stride]   # (C, h_out, w_out)
            acc = acc + wk[:, i:i + 1, j:j + 1] * patch              # per-channel MAC
    # Depthwise output (incl. its bias) stays resident in VMEM — no HBM round trip.
    y_vmem[n] = acc + b_dw_ref[...].astype(jnp.float32)

    # ---------- Phase B (last step only): BN batch stats + pointwise 1x1 conv ----------
    @pl.when(n == n_batch - 1)
    def _():
        y_all = y_vmem[...]                               # (N, C, h_out, w_out) f32
        inv_cnt = 1.0 / float(n_batch * h_out * w_out)
        ssum = jnp.sum(jnp.sum(jnp.sum(y_all, axis=3, keepdims=True),
                               axis=2, keepdims=True), axis=0, keepdims=True)
        mean = ssum * inv_cnt                             # (1, C, 1, 1)
        centered = y_all - mean
        svar = jnp.sum(jnp.sum(jnp.sum(centered * centered, axis=3, keepdims=True),
                               axis=2, keepdims=True), axis=0, keepdims=True)
        # Two-pass (centered) variance; clamp to avoid rsqrt of a tiny negative.
        var = jnp.maximum(svar * inv_cnt, 0.0)            # (1, C, 1, 1)
        scale = gamma_ref[...].astype(jnp.float32) * lax.rsqrt(var + eps)
        y_n = centered * scale + beta_ref[...].astype(jnp.float32)   # (N, C, h_out, w_out)

        # Pointwise 1x1 conv.  O and C are tiny here (8 x 4): an MXU matmul would use
        # <1% of the systolic array, so run O*C scalar-broadcast FMAs on the VPU with
        # the weights read as scalars from SMEM (no per-step parameter DMAs, no fold
        # recompute).
        # TODO(synk): for large O*C, pass w_pw through VMEM and use an MXU einsum.
        for oc in range(o_dim):
            o_acc = jnp.zeros((n_batch, h_out, w_out), jnp.float32) + b_pw_ref[oc]
            for cc in range(c_dim):
                o_acc = o_acc + w_pw_ref[oc, cc] * y_n[:, cc, :, :]
            out_ref[:, oc:oc + 1, :, :] = o_acc[:, None, :, :].astype(out_ref.dtype)


def custom_conv2d(x, params, *, kernel_size, stride=1, padding=0, dilation=1, eps=1e-5):
    """x: (N, C, H, W) float32.  Returns (N, O, H_out, W_out), matching the PyTorch module."""
    w_dw, b_dw, gamma, beta, w_pw, b_pw = params
    n, c, h, w = x.shape
    o = w_pw.shape[0]
    h_out = (h + 2 * padding - dilation * (kernel_size - 1) - 1) // stride + 1
    w_out = (w + 2 * padding - dilation * (kernel_size - 1) - 1) // stride + 1
    hp, wp = h + 2 * padding, w + 2 * padding

    kernel = functools.partial(
        _fused_dwconv_bn_pw_kernel,
        kernel_size=kernel_size, stride=stride, dilation=dilation, padding=padding,
        h_out=h_out, w_out=w_out, n_batch=n, eps=eps)

    return pl.pallas_call(
        kernel,
        out_shape=jax.ShapeDtypeStruct((n, o, h_out, w_out), x.dtype),
        grid=(n,),
        in_specs=[
            # x: one batch element per grid step (pipelined DMA).
            pl.BlockSpec((1, c, h, w), lambda i: (i, 0, 0, 0)),
            # Parameters: constant block index -> fetched once, not re-DMA'd per step.
            pl.BlockSpec((c, kernel_size, kernel_size), lambda i: (0, 0, 0)),
            pl.BlockSpec((c, 1, 1), lambda i: (0, 0, 0)),
            pl.BlockSpec((1, c, 1, 1), lambda i: (0, 0, 0, 0)),
            pl.BlockSpec((1, c, 1, 1), lambda i: (0, 0, 0, 0)),
            # Pointwise weight/bias as SMEM scalars (review: drop the per-step tiny DMAs).
            pl.BlockSpec(memory_space=pltpu.MemorySpace.SMEM),
            pl.BlockSpec(memory_space=pltpu.MemorySpace.SMEM),
        ],
        # Whole output resident across the grid; written once in the last step.
        out_specs=pl.BlockSpec((n, o, h_out, w_out), lambda i: (0, 0, 0, 0)),
        scratch_shapes=[
            pltpu.VMEM((n, c, h_out, w_out), jnp.float32),   # resident depthwise activation
            pltpu.VMEM((c, hp, wp), jnp.float32),            # zero-padded input halo buffer
        ],
        # Sequential: BN stats are a global batch reduction over the resident scratch.
        compiler_params=pltpu.CompilerParams(dimension_semantics=("arbitrary",)),
    )(x, w_dw, b_dw.reshape(c, 1, 1), gamma.reshape(1, c, 1, 1),
      beta.reshape(1, c, 1, 1), w_pw, b_pw)


def _reference(x, params, *, kernel_size, stride, padding, dilation, eps):
    w_dw, b_dw, gamma, beta, w_pw, b_pw = params
    c = x.shape[1]
    dw = lax.conv_general_dilated(
        x, w_dw.reshape(c, 1, kernel_size, kernel_size),
        window_strides=(stride, stride),
        padding=[(padding, padding), (padding, padding)],
        rhs_dilation=(dilation, dilation),
        dimension_numbers=("NCHW", "OIHW", "NCHW"),
        feature_group_count=c,
    ) + b_dw[None, :, None, None]
    mean = dw.mean(axis=(0, 2, 3), keepdims=True)
    var = ((dw - mean) ** 2).mean(axis=(0, 2, 3), keepdims=True)
    yn = (dw - mean) * lax.rsqrt(var + eps) * gamma[None, :, None, None] + beta[None, :, None, None]
    return jnp.einsum("oc,nchw->nohw", w_pw, yn) + b_pw[None, :, None, None]


if __name__ == "__main__":
    # Small shapes consistent with the module: N=2, C_in=4, H=W=16, C_out=8, k=3, s=1, p=1.
    N, C_IN, H, W = 2, 4, 16, 16
    C_OUT, K, STRIDE, PAD, DIL = 8, 3, 1, 1, 1
    EPS = 1e-5

    key = jax.random.PRNGKey(0)
    kx, k1, k2, k3, k4, k5, k6 = jax.random.split(key, 7)

    x = jax.random.normal(kx, (N, C_IN, H, W), jnp.float32)

    # Deterministic parameter init (synthetic; PyTorch-like shapes).
    w_dw = jax.random.normal(k1, (C_IN, K, K), jnp.float32) * 0.2      # depthwise (C,1,K,K) squeezed
    b_dw = jax.random.normal(k2, (C_IN,), jnp.float32) * 0.1
    gamma = 1.0 + 0.1 * jax.random.normal(k3, (C_IN,), jnp.float32)    # BN weight
    beta = 0.1 * jax.random.normal(k4, (C_IN,), jnp.float32)           # BN bias
    w_pw = jax.random.normal(k5, (C_OUT, C_IN), jnp.float32) * 0.2     # pointwise (O,C,1,1) squeezed
    b_pw = jax.random.normal(k6, (C_OUT,), jnp.float32) * 0.1

    params = (w_dw, b_dw, gamma, beta, w_pw, b_pw)

    out = custom_conv2d(x, params, kernel_size=K, stride=STRIDE, padding=PAD,
                        dilation=DIL, eps=EPS)
    out = jax.block_until_ready(out)

    ref = _reference(x, params, kernel_size=K, stride=STRIDE, padding=PAD,
                     dilation=DIL, eps=EPS)
    assert out.shape == (N, C_OUT, H, W), out.shape
    assert jnp.allclose(out, ref, atol=1e-4, rtol=1e-4), float(jnp.max(jnp.abs(out - ref)))

    print("KERNEL_OK")
</pallas_src>

<mosaic_0001>
module attributes {stable_mosaic.version = 11 : i64} {
  func.func @_fused_dwconv_bn_pw_kernel(%arg0: i32, %arg1: memref<1x4x16x16xf32, #tpu.memory_space<vmem>>, %arg2: memref<4x3x3xf32, #tpu.memory_space<vmem>>, %arg3: memref<4x1x1xf32, #tpu.memory_space<vmem>>, %arg4: memref<1x4x1x1xf32, #tpu.memory_space<vmem>>, %arg5: memref<1x4x1x1xf32, #tpu.memory_space<vmem>>, %arg6: memref<8x4xf32, #tpu.memory_space<smem>>, %arg7: memref<8xf32, #tpu.memory_space<smem>>, %arg8: memref<2x8x16x16xf32, #tpu.memory_space<vmem>>, %arg9: memref<2x4x16x16xf32, #tpu.memory_space<vmem>>, %arg10: memref<4x18x18xf32, #tpu.memory_space<vmem>>) attributes {dimension_semantics = [#tpu.dimension_semantics<arbitrary>], iteration_bounds = array<i64: 2>, scalar_prefetch = 0 : i64, scratch_operands = 2 : i64, tpu.core_type = #tpu.core_type<tc>, window_params = [{transform_indices = @transform_0, window_bounds = array<i64: 1, 4, 16, 16>}, {pipeline_mode = #tpu.pipeline_mode<synchronous>, transform_indices = @transform_1, window_bounds = array<i64: 4, 3, 3>}, {pipeline_mode = #tpu.pipeline_mode<synchronous>, transform_indices = @transform_2, window_bounds = array<i64: 4, 1, 1>}, {pipeline_mode = #tpu.pipeline_mode<synchronous>, transform_indices = @transform_3, window_bounds = array<i64: 1, 4, 1, 1>}, {pipeline_mode = #tpu.pipeline_mode<synchronous>, transform_indices = @transform_4, window_bounds = array<i64: 1, 4, 1, 1>}, {transform_indices = @transform_5, window_bounds = array<i64: 8, 4>}, {transform_indices = @transform_6, window_bounds = array<i64: 8>}, {pipeline_mode = #tpu.pipeline_mode<synchronous>, transform_indices = @transform_7, window_bounds = array<i64: 2, 8, 16, 16>}]} {
    %c0_i32 = arith.constant 0 : i32
    %0 = arith.cmpi eq, %arg0, %c0_i32 : i32
    %1 = arith.extui %0 : i1 to i32
    %c0_i32_0 = arith.constant 0 : i32
    %2 = arith.cmpi ne, %1, %c0_i32_0 : i32
    scf.if %2 {
      %cst_19 = arith.constant 0.000000e+00 : f32
      %64 = vector.broadcast %cst_19 : f32 to vector<4x18x18xf32>
      %c0_20 = arith.constant 0 : index
      %c0_21 = arith.constant 0 : index
      %c0_22 = arith.constant 0 : index
      %65 = vector.load %arg10[%c0_20, %c0_21, %c0_22] : memref<4x18x18xf32, #tpu.memory_space<vmem>>, vector<4x18x18xf32>
      tpu.vector_store %arg10[%c0_20, %c0_21, %c0_22], %64 {strides = array<i32>} : memref<4x18x18xf32, #tpu.memory_space<vmem>>, vector<4x18x18xf32>,
    } else {
    }
    %c0 = arith.constant 0 : index
    %c0_1 = arith.constant 0 : index
    %c0_2 = arith.constant 0 : index
    %c0_3 = arith.constant 0 : index
    %3 = vector.load %arg1[%c0, %c0_1, %c0_2, %c0_3] : memref<1x4x16x16xf32, #tpu.memory_space<vmem>>, vector<1x4x16x16xf32>
    %4 = vector.shape_cast %3 : vector<1x4x16x16xf32> to vector<4x16x16xf32>
    %c0_4 = arith.constant 0 : index
    %c1 = arith.constant 1 : index
    %c1_5 = arith.constant 1 : index
    %5 = vector.load %arg10[%c0_4, %c1, %c1_5] : memref<4x18x18xf32, #tpu.memory_space<vmem>>, vector<4x16x16xf32>
    tpu.vector_store %arg10[%c0_4, %c1, %c1_5], %4 {strides = array<i32>} : memref<4x18x18xf32, #tpu.memory_space<vmem>>, vector<4x16x16xf32>,
    %c0_6 = arith.constant 0 : index
    %c0_7 = arith.constant 0 : index
    %c0_8 = arith.constant 0 : index
    %6 = vector.load %arg10[%c0_6, %c0_7, %c0_8] : memref<4x18x18xf32, #tpu.memory_space<vmem>>, vector<4x18x18xf32>
    %c0_9 = arith.constant 0 : index
    %c0_10 = arith.constant 0 : index
    %c0_11 = arith.constant 0 : index
    %7 = vector.load %arg2[%c0_9, %c0_10, %c0_11] : memref<4x3x3xf32, #tpu.memory_space<vmem>>, vector<4x3x3xf32>
    %cst = arith.constant 0.000000e+00 : f32
    %8 = vector.broadcast %cst : f32 to vector<4x16x16xf32>
    %9 = vector.extract_strided_slice %6 {offsets = [0, 0, 0], sizes = [4, 16, 16], strides = [1, 1, 1]} : vector<4x18x18xf32> to vector<4x16x16xf32>
    %10 = vector.extract_strided_slice %7 {offsets = [0, 0, 0], sizes = [4, 1, 1], strides = [1, 1, 1]} : vector<4x3x3xf32> to vector<4x1x1xf32>
    %11 = vector.broadcast %10 : vector<4x1x1xf32> to vector<4x16x16xf32>
    %12 = arith.mulf %11, %9 : vector<4x16x16xf32>
    %13 = arith.addf %8, %12 : vector<4x16x16xf32>
    %14 = vector.extract_strided_slice %6 {offsets = [0, 0, 1], sizes = [4, 16, 16], strides = [1, 1, 1]} : vector<4x18x18xf32> to vector<4x16x16xf32>
    %15 = vector.extract_strided_slice %7 {offsets = [0, 0, 1], sizes = [4, 1, 1], strides = [1, 1, 1]} : vector<4x3x3xf32> to vector<4x1x1xf32>
    %16 = vector.broadcast %15 : vector<4x1x1xf32> to vector<4x16x16xf32>
    %17 = arith.mulf %16, %14 : vector<4x16x16xf32>
    %18 = arith.addf %13, %17 : vector<4x16x16xf32>
    %19 = vector.extract_strided_slice %6 {offsets = [0, 0, 2], sizes = [4, 16, 16], strides = [1, 1, 1]} : vector<4x18x18xf32> to vector<4x16x16xf32>
    %20 = vector.extract_strided_slice %7 {offsets = [0, 0, 2], sizes = [4, 1, 1], strides = [1, 1, 1]} : vector<4x3x3xf32> to vector<4x1x1xf32>
    %21 = vector.broadcast %20 : vector<4x1x1xf32> to vector<4x16x16xf32>
    %22 = arith.mulf %21, %19 : vector<4x16x16xf32>
    %23 = arith.addf %18, %22 : vector<4x16x16xf32>
    %24 = vector.extract_strided_slice %6 {offsets = [0, 1, 0], sizes = [4, 16, 16], strides = [1, 1, 1]} : vector<4x18x18xf32> to vector<4x16x16xf32>
    %25 = vector.extract_strided_slice %7 {offsets = [0, 1, 0], sizes = [4, 1, 1], strides = [1, 1, 1]} : vector<4x3x3xf32> to vector<4x1x1xf32>
    %26 = vector.broadcast %25 : vector<4x1x1xf32> to vector<4x16x16xf32>
    %27 = arith.mulf %26, %24 : vector<4x16x16xf32>
    %28 = arith.addf %23, %27 : vector<4x16x16xf32>
    %29 = vector.extract_strided_slice %6 {offsets = [0, 1, 1], sizes = [4, 16, 16], strides = [1, 1, 1]} : vector<4x18x18xf32> to vector<4x16x16xf32>
    %30 = vector.extract_strided_slice %7 {offsets = [0, 1, 1], sizes = [4, 1, 1], strides = [1, 1, 1]} : vector<4x3x3xf32> to vector<4x1x1xf32>
    %31 = vector.broadcast %30 : vector<4x1x1xf32> to vector<4x16x16xf32>
    %32 = arith.mulf %31, %29 : vector<4x16x16xf32>
    %33 = arith.addf %28, %32 : vector<4x16x16xf32>
    %34 = vector.extract_strided_slice %6 {offsets = [0, 1, 2], sizes = [4, 16, 16], strides = [1, 1, 1]} : vector<4x18x18xf32> to vector<4x16x16xf32>
    %35 = vector.extract_strided_slice %7 {offsets = [0, 1, 2], sizes = [4, 1, 1], strides = [1, 1, 1]} : vector<4x3x3xf32> to vector<4x1x1xf32>
    %36 = vector.broadcast %35 : vector<4x1x1xf32> to vector<4x16x16xf32>
    %37 = arith.mulf %36, %34 : vector<4x16x16xf32>
    %38 = arith.addf %33, %37 : vector<4x16x16xf32>
    %39 = vector.extract_strided_slice %6 {offsets = [0, 2, 0], sizes = [4, 16, 16], strides = [1, 1, 1]} : vector<4x18x18xf32> to vector<4x16x16xf32>
    %40 = vector.extract_strided_slice %7 {offsets = [0, 2, 0], sizes = [4, 1, 1], strides = [1, 1, 1]} : vector<4x3x3xf32> to vector<4x1x1xf32>
    %41 = vector.broadcast %40 : vector<4x1x1xf32> to vector<4x16x16xf32>
    %42 = arith.mulf %41, %39 : vector<4x16x16xf32>
    %43 = arith.addf %38, %42 : vector<4x16x16xf32>
    %44 = vector.extract_strided_slice %6 {offsets = [0, 2, 1], sizes = [4, 16, 16], strides = [1, 1, 1]} : vector<4x18x18xf32> to vector<4x16x16xf32>
    %45 = vector.extract_strided_slice %7 {offsets = [0, 2, 1], sizes = [4, 1, 1], strides = [1, 1, 1]} : vector<4x3x3xf32> to vector<4x1x1xf32>
    %46 = vector.broadcast %45 : vector<4x1x1xf32> to vector<4x16x16xf32>
    %47 = arith.mulf %46, %44 : vector<4x16x16xf32>
    %48 = arith.addf %43, %47 : vector<4x16x16xf32>
    %49 = vector.extract_strided_slice %6 {offsets = [0, 2, 2], sizes = [4, 16, 16], strides = [1, 1, 1]} : vector<4x18x18xf32> to vector<4x16x16xf32>
    %50 = vector.extract_strided_slice %7 {offsets = [0, 2, 2], sizes = [4, 1, 1], strides = [1, 1, 1]} : vector<4x3x3xf32> to vector<4x1x1xf32>
    %51 = vector.broadcast %50 : vector<4x1x1xf32> to vector<4x16x16xf32>
    %52 = arith.mulf %51, %49 : vector<4x16x16xf32>
    %53 = arith.addf %48, %52 : vector<4x16x16xf32>
    %c0_12 = arith.constant 0 : index
    %c0_13 = arith.constant 0 : index
    %c0_14 = arith.constant 0 : index
    %54 = vector.load %arg3[%c0_12, %c0_13, %c0_14] : memref<4x1x1xf32, #tpu.memory_space<vmem>>, vector<4x1x1xf32>
    %55 = vector.broadcast %54 : vector<4x1x1xf32> to vector<4x16x16xf32>
    %56 = arith.addf %53, %55 : vector<4x16x16xf32>
    %57 = arith.index_cast %arg0 : i32 to index
    %c0_15 = arith.constant 0 : index
    %c0_16 = arith.constant 0 : index
    %c0_17 = arith.constant 0 : index
    %58 = vector.load %arg9[%57, %c0_15, %c0_16, %c0_17] : memref<2x4x16x16xf32, #tpu.memory_space<vmem>>, vector<1x4x16x16xf32>
    %59 = vector.shape_cast %58 : vector<1x4x16x16xf32> to vector<4x16x16xf32>
    %60 = vector.shape_cast %56 : vector<4x16x16xf32> to vector<1x4x16x16xf32>
    tpu.vector_store %arg9[%57, %c0_15, %c0_16, %c0_17], %60 {strides = array<i32>} : memref<2x4x16x16xf32, #tpu.memory_space<vmem>>, vector<1x4x16x16xf32>,
    %c1_i32 = arith.constant 1 : i32
    %61 = arith.cmpi eq, %arg0, %c1_i32 : i32
    %62 = arith.extui %61 : i1 to i32
    %c0_i32_18 = arith.constant 0 : i32
    %63 = arith.cmpi ne, %62, %c0_i32_18 : i32
    scf.if %63 {
      %c0_19 = arith.constant 0 : index
      %c0_20 = arith.constant 0 : index
      %c0_21 = arith.constant 0 : index
      %c0_22 = arith.constant 0 : index
      %64 = vector.load %arg9[%c0_19, %c0_20, %c0_21, %c0_22] : memref<2x4x16x16xf32, #tpu.memory_space<vmem>>, vector<2x4x16x16xf32>
      %cst_23 = arith.constant dense<0.000000e+00> : vector<2x4x16xf32>
      %65 = vector.multi_reduction <add>, %64, %cst_23 [3] : vector<2x4x16x16xf32> to vector<2x4x16xf32>
      %66 = vector.shape_cast %65 : vector<2x4x16xf32> to vector<2x4x16x1xf32>
      %cst_24 = arith.constant dense<0.000000e+00> : vector<2x4x1xf32>
      %67 = vector.multi_reduction <add>, %66, %cst_24 [2] : vector<2x4x16x1xf32> to vector<2x4x1xf32>
      %68 = vector.shape_cast %67 : vector<2x4x1xf32> to vector<2x4x1x1xf32>
      %cst_25 = arith.constant dense<0.000000e+00> : vector<4x1x1xf32>
      %69 = vector.multi_reduction <add>, %68, %cst_25 [0] : vector<2x4x1x1xf32> to vector<4x1x1xf32>
      %70 = vector.shape_cast %69 : vector<4x1x1xf32> to vector<1x4x1x1xf32>
      %cst_26 = arith.constant 0.001953125 : f32
      %71 = vector.broadcast %cst_26 : f32 to vector<1x4x1x1xf32>
      %72 = arith.mulf %70, %71 : vector<1x4x1x1xf32>
      %73 = vector.broadcast %72 : vector<1x4x1x1xf32> to vector<2x4x16x16xf32>
      %74 = arith.subf %64, %73 : vector<2x4x16x16xf32>
      %75 = arith.mulf %74, %74 : vector<2x4x16x16xf32>
      %cst_27 = arith.constant dense<0.000000e+00> : vector<2x4x16xf32>
      %76 = vector.multi_reduction <add>, %75, %cst_27 [3] : vector<2x4x16x16xf32> to vector<2x4x16xf32>
      %77 = vector.shape_cast %76 : vector<2x4x16xf32> to vector<2x4x16x1xf32>
      %cst_28 = arith.constant dense<0.000000e+00> : vector<2x4x1xf32>
      %78 = vector.multi_reduction <add>, %77, %cst_28 [2] : vector<2x4x16x1xf32> to vector<2x4x1xf32>
      %79 = vector.shape_cast %78 : vector<2x4x1xf32> to vector<2x4x1x1xf32>
      %cst_29 = arith.constant dense<0.000000e+00> : vector<4x1x1xf32>
      %80 = vector.multi_reduction <add>, %79, %cst_29 [0] : vector<2x4x1x1xf32> to vector<4x1x1xf32>
      %81 = vector.shape_cast %80 : vector<4x1x1xf32> to vector<1x4x1x1xf32>
      %cst_30 = arith.constant 0.001953125 : f32
      %82 = vector.broadcast %cst_30 : f32 to vector<1x4x1x1xf32>
      %83 = arith.mulf %81, %82 : vector<1x4x1x1xf32>
      %cst_31 = arith.constant 0.000000e+00 : f32
      %84 = vector.broadcast %cst_31 : f32 to vector<1x4x1x1xf32>
      %85 = arith.maximumf %83, %84 : vector<1x4x1x1xf32>
      %c0_32 = arith.constant 0 : index
      %c0_33 = arith.constant 0 : index
      %c0_34 = arith.constant 0 : index
      %c0_35 = arith.constant 0 : index
      %86 = vector.load %arg4[%c0_32, %c0_33, %c0_34, %c0_35] : memref<1x4x1x1xf32, #tpu.memory_space<vmem>>, vector<1x4x1x1xf32>
      %cst_36 = arith.constant 9.99999974E-6 : f32
      %87 = vector.broadcast %cst_36 : f32 to vector<1x4x1x1xf32>
      %88 = arith.addf %85, %87 : vector<1x4x1x1xf32>
      %89 = math.rsqrt %88 : vector<1x4x1x1xf32>
      %90 = arith.mulf %86, %89 : vector<1x4x1x1xf32>
      %91 = vector.broadcast %90 : vector<1x4x1x1xf32> to vector<2x4x16x16xf32>
      %92 = arith.mulf %74, %91 : vector<2x4x16x16xf32>
      %c0_37 = arith.constant 0 : index
      %c0_38 = arith.constant 0 : index
      %c0_39 = arith.constant 0 : index
      %c0_40 = arith.constant 0 : index
      %93 = vector.load %arg5[%c0_37, %c0_38, %c0_39, %c0_40] : memref<1x4x1x1xf32, #tpu.memory_space<vmem>>, vector<1x4x1x1xf32>
      %94 = vector.broadcast %93 : vector<1x4x1x1xf32> to vector<2x4x16x16xf32>
      %95 = arith.addf %92, %94 : vector<2x4x16x16xf32>
      %cst_41 = arith.constant 0.000000e+00 : f32
      %96 = vector.broadcast %cst_41 : f32 to vector<2x16x16xf32>
      %c0_42 = arith.constant 0 : index
      %97 = memref.load %arg7[%c0_42] : memref<8xf32, #tpu.memory_space<smem>>
      %98 = vector.broadcast %97 : f32 to vector<2x16x16xf32>
      %99 = arith.addf %96, %98 : vector<2x16x16xf32>
      %c0_43 = arith.constant 0 : index
      %c0_44 = arith.constant 0 : index
      %100 = memref.load %arg6[%c0_43, %c0_44] : memref<8x4xf32, #tpu.memory_space<smem>>
      %101 = vector.extract_strided_slice %95 {offsets = [0, 0, 0, 0], sizes = [2, 1, 16, 16], strides = [1, 1, 1, 1]} : vector<2x4x16x16xf32> to vector<2x1x16x16xf32>
      %102 = vector.shape_cast %101 : vector<2x1x16x16xf32> to vector<2x16x16xf32>
      %103 = vector.broadcast %100 : f32 to vector<2x16x16xf32>
      %104 = arith.mulf %103, %102 : vector<2x16x16xf32>
      %105 = arith.addf %99, %104 : vector<2x16x16xf32>
      %c0_45 = arith.constant 0 : index
      %c1_46 = arith.constant 1 : index
      %106 = memref.load %arg6[%c0_45, %c1_46] : memref<8x4xf32, #tpu.memory_space<smem>>
      %107 = vector.extract_strided_slice %95 {offsets = [0, 1, 0, 0], sizes = [2, 1, 16, 16], strides = [1, 1, 1, 1]} : vector<2x4x16x16xf32> to vector<2x1x16x16xf32>
      %108 = vector.shape_cast %107 : vector<2x1x16x16xf32> to vector<2x16x16xf32>
      %109 = vector.broadcast %106 : f32 to vector<2x16x16xf32>
      %110 = arith.mulf %109, %108 : vector<2x16x16xf32>
      %111 = arith.addf %105, %110 : vector<2x16x16xf32>
      %c0_47 = arith.constant 0 : index
      %c2 = arith.constant 2 : index
      %112 = memref.load %arg6[%c0_47, %c2] : memref<8x4xf32, #tpu.memory_space<smem>>
      %113 = vector.extract_strided_slice %95 {offsets = [0, 2, 0, 0], sizes = [2, 1, 16, 16], strides = [1, 1, 1, 1]} : vector<2x4x16x16xf32> to vector<2x1x16x16xf32>
      %114 = vector.shape_cast %113 : vector<2x1x16x16xf32> to vector<2x16x16xf32>
      %115 = vector.broadcast %112 : f32 to vector<2x16x16xf32>
      %116 = arith.mulf %115, %114 : vector<2x16x16xf32>
      %117 = arith.addf %111, %116 : vector<2x16x16xf32>
      %c0_48 = arith.constant 0 : index
      %c3 = arith.constant 3 : index
      %118 = memref.load %arg6[%c0_48, %c3] : memref<8x4xf32, #tpu.memory_space<smem>>
      %119 = vector.extract_strided_slice %95 {offsets = [0, 3, 0, 0], sizes = [2, 1, 16, 16], strides = [1, 1, 1, 1]} : vector<2x4x16x16xf32> to vector<2x1x16x16xf32>
      %120 = vector.shape_cast %119 : vector<2x1x16x16xf32> to vector<2x16x16xf32>
      %121 = vector.broadcast %118 : f32 to vector<2x16x16xf32>
      %122 = arith.mulf %121, %120 : vector<2x16x16xf32>
      %123 = arith.addf %117, %122 : vector<2x16x16xf32>
      %124 = vector.shape_cast %123 : vector<2x16x16xf32> to vector<2x1x16x16xf32>
      %c0_49 = arith.constant 0 : index
      %c0_50 = arith.constant 0 : index
      %c0_51 = arith.constant 0 : index
      %c0_52 = arith.constant 0 : index
      %125 = vector.load %arg8[%c0_49, %c0_50, %c0_51, %c0_52] : memref<2x8x16x16xf32, #tpu.memory_space<vmem>>, vector<2x1x16x16xf32>
      tpu.vector_store %arg8[%c0_49, %c0_50, %c0_51, %c0_52], %124 {strides = array<i32>} : memref<2x8x16x16xf32, #tpu.memory_space<vmem>>, vector<2x1x16x16xf32>,
      %cst_53 = arith.constant 0.000000e+00 : f32
      %126 = vector.broadcast %cst_53 : f32 to vector<2x16x16xf32>
      %c1_54 = arith.constant 1 : index
      %127 = memref.load %arg7[%c1_54] : memref<8xf32, #tpu.memory_space<smem>>
      %128 = vector.broadcast %127 : f32 to vector<2x16x16xf32>
      %129 = arith.addf %126, %128 : vector<2x16x16xf32>
      %c1_55 = arith.constant 1 : index
      %c0_56 = arith.constant 0 : index
      %130 = memref.load %arg6[%c1_55, %c0_56] : memref<8x4xf32, #tpu.memory_space<smem>>
      %131 = vector.extract_strided_slice %95 {offsets = [0, 0, 0, 0], sizes = [2, 1, 16, 16], strides = [1, 1, 1, 1]} : vector<2x4x16x16xf32> to vector<2x1x16x16xf32>
      %132 = vector.shape_cast %131 : vector<2x1x16x16xf32> to vector<2x16x16xf32>
      %133 = vector.broadcast %130 : f32 to vector<2x16x16xf32>
      %134 = arith.mulf %133, %132 : vector<2x16x16xf32>
      %135 = arith.addf %129, %134 : vector<2x16x16xf32>
      %c1_57 = arith.constant 1 : index
      %c1_58 = arith.constant 1 : index
      %136 = memref.load %arg6[%c1_57, %c1_58] : memref<8x4xf32, #tpu.memory_space<smem>>
      %137 = vector.extract_strided_slice %95 {offsets = [0, 1, 0, 0], sizes = [2, 1, 16, 16], strides = [1, 1, 1, 1]} : vector<2x4x16x16xf32> to vector<2x1x16x16xf32>
      %138 = vector.shape_cast %137 : vector<2x1x16x16xf32> to vector<2x16x16xf32>
      %139 = vector.broadcast %136 : f32 to vector<2x16x16xf32>
      %140 = arith.mulf %139, %138 : vector<2x16x16xf32>
      %141 = arith.addf %135, %140 : vector<2x16x16xf32>
      %c1_59 = arith.constant 1 : index
      %c2_60 = arith.constant 2 : index
      %142 = memref.load %arg6[%c1_59, %c2_60] : memref<8x4xf32, #tpu.memory_space<smem>>
      %143 = vector.extract_strided_slice %95 {offsets = [0, 2, 0, 0], sizes = [2, 1, 16, 16], strides = [1, 1, 1, 1]} : vector<2x4x16x16xf32> to vector<2x1x16x16xf32>
      %144 = vector.shape_cast %143 : vector<2x1x16x16xf32> to vector<2x16x16xf32>
      %145 = vector.broadcast %142 : f32 to vector<2x16x16xf32>
      %146 = arith.mulf %145, %144 : vector<2x16x16xf32>
      %147 = arith.addf %141, %146 : vector<2x16x16xf32>
      %c1_61 = arith.constant 1 : index
      %c3_62 = arith.constant 3 : index
      %148 = memref.load %arg6[%c1_61, %c3_62] : memref<8x4xf32, #tpu.memory_space<smem>>
      %149 = vector.extract_strided_slice %95 {offsets = [0, 3, 0, 0], sizes = [2, 1, 16, 16], strides = [1, 1, 1, 1]} : vector<2x4x16x16xf32> to vector<2x1x16x16xf32>
      %150 = vector.shape_cast %149 : vector<2x1x16x16xf32> to vector<2x16x16xf32>
      %151 = vector.broadcast %148 : f32 to vector<2x16x16xf32>
      %152 = arith.mulf %151, %150 : vector<2x16x16xf32>
      %153 = arith.addf %147, %152 : vector<2x16x16xf32>
      %154 = vector.shape_cast %153 : vector<2x16x16xf32> to vector<2x1x16x16xf32>
      %c0_63 = arith.constant 0 : index
      %c1_64 = arith.constant 1 : index
      %c0_65 = arith.constant 0 : index
      %c0_66 = arith.constant 0 : index
      %155 = vector.load %arg8[%c0_63, %c1_64, %c0_65, %c0_66] : memref<2x8x16x16xf32, #tpu.memory_space<vmem>>, vector<2x1x16x16xf32>
      tpu.vector_store %arg8[%c0_63, %c1_64, %c0_65, %c0_66], %154 {strides = array<i32>} : memref<2x8x16x16xf32, #tpu.memory_space<vmem>>, vector<2x1x16x16xf32>,
      %cst_67 = arith.constant 0.000000e+00 : f32
      %156 = vector.broadcast %cst_67 : f32 to vector<2x16x16xf32>
      %c2_68 = arith.constant 2 : index
      %157 = memref.load %arg7[%c2_68] : memref<8xf32, #tpu.memory_space<smem>>
      %158 = vector.broadcast %157 : f32 to vector<2x16x16xf32>
      %159 = arith.addf %156, %158 : vector<2x16x16xf32>
      %c2_69 = arith.constant 2 : index
      %c0_70 = arith.constant 0 : index
      %160 = memref.load %arg6[%c2_69, %c0_70] : memref<8x4xf32, #tpu.memory_space<smem>>
      %161 = vector.extract_strided_slice %95 {offsets = [0, 0, 0, 0], sizes = [2, 1, 16, 16], strides = [1, 1, 1, 1]} : vector<2x4x16x16xf32> to vector<2x1x16x16xf32>
      %162 = vector.shape_cast %161 : vector<2x1x16x16xf32> to vector<2x16x16xf32>
      %163 = vector.broadcast %160 : f32 to vector<2x16x16xf32>
      %164 = arith.mulf %163, %162 : vector<2x16x16xf32>
      %165 = arith.addf %159, %164 : vector<2x16x16xf32>
      %c2_71 = arith.constant 2 : index
      %c1_72 = arith.constant 1 : index
      %166 = memref.load %arg6[%c2_71, %c1_72] : memref<8x4xf32, #tpu.memory_space<smem>>
      %167 = vector.extract_strided_slice %95 {offsets = [0, 1, 0, 0], sizes = [2, 1, 16, 16], strides = [1, 1, 1, 1]} : vector<2x4x16x16xf32> to vector<2x1x16x16xf32>
      %168 = vector.shape_cast %167 : vector<2x1x16x16xf32> to vector<2x16x16xf32>
      %169 = vector.broadcast %166 : f32 to vector<2x16x16xf32>
      %170 = arith.mulf %169, %168 : vector<2x16x16xf32>
      %171 = arith.addf %165, %170 : vector<2x16x16xf32>
      %c2_73 = arith.constant 2 : index
      %c2_74 = arith.constant 2 : index
      %172 = memref.load %arg6[%c2_73, %c2_74] : memref<8x4xf32, #tpu.memory_space<smem>>
      %173 = vector.extract_strided_slice %95 {offsets = [0, 2, 0, 0], sizes = [2, 1, 16, 16], strides = [1, 1, 1, 1]} : vector<2x4x16x16xf32> to vector<2x1x16x16xf32>
      %174 = vector.shape_cast %173 : vector<2x1x16x16xf32> to vector<2x16x16xf32>
      %175 = vector.broadcast %172 : f32 to vector<2x16x16xf32>
      %176 = arith.mulf %175, %174 : vector<2x16x16xf32>
      %177 = arith.addf %171, %176 : vector<2x16x16xf32>
      %c2_75 = arith.constant 2 : index
      %c3_76 = arith.constant 3 : index
      %178 = memref.load %arg6[%c2_75, %c3_76] : memref<8x4xf32, #tpu.memory_space<smem>>
      %179 = vector.extract_strided_slice %95 {offsets = [0, 3, 0, 0], sizes = [2, 1, 16, 16], strides = [1, 1, 1, 1]} : vector<2x4x16x16xf32> to vector<2x1x16x16xf32>
      %180 = vector.shape_cast %179 : vector<2x1x16x16xf32> to vector<2x16x16xf32>
      %181 = vector.broadcast %178 : f32 to vector<2x16x16xf32>
      %182 = arith.mulf %181, %180 : vector<2x16x16xf32>
      %183 = arith.addf %177, %182 : vector<2x16x16xf32>
      %184 = vector.shape_cast %183 : vector<2x16x16xf32> to vector<2x1x16x16xf32>
      %c0_77 = arith.constant 0 : index
      %c2_78 = arith.constant 2 : index
      %c0_79 = arith.constant 0 : index
      %c0_80 = arith.constant 0 : index
      %185 = vector.load %arg8[%c0_77, %c2_78, %c0_79, %c0_80] : memref<2x8x16x16xf32, #tpu.memory_space<vmem>>, vector<2x1x16x16xf32>
      tpu.vector_store %arg8[%c0_77, %c2_78, %c0_79, %c0_80], %184 {strides = array<i32>} : memref<2x8x16x16xf32, #tpu.memory_space<vmem>>, vector<2x1x16x16xf32>,
      %cst_81 = arith.constant 0.000000e+00 : f32
      %186 = vector.broadcast %cst_81 : f32 to vector<2x16x16xf32>
      %c3_82 = arith.constant 3 : index
      %187 = memref.load %arg7[%c3_82] : memref<8xf32, #tpu.memory_space<smem>>
      %188 = vector.broadcast %187 : f32 to vector<2x16x16xf32>
      %189 = arith.addf %186, %188 : vector<2x16x16xf32>
      %c3_83 = arith.constant 3 : index
      %c0_84 = arith.constant 0 : index
      %190 = memref.load %arg6[%c3_83, %c0_84] : memref<8x4xf32, #tpu.memory_space<smem>>
      %191 = vector.extract_strided_slice %95 {offsets = [0, 0, 0, 0], sizes = [2, 1, 16, 16], strides = [1, 1, 1, 1]} : vector<2x4x16x16xf32> to vector<2x1x16x16xf32>
      %192 = vector.shape_cast %191 : vector<2x1x16x16xf32> to vector<2x16x16xf32>
      %193 = vector.broadcast %190 : f32 to vector<2x16x16xf32>
      %194 = arith.mulf %193, %192 : vector<2x16x16xf32>
      %195 = arith.addf %189, %194 : vector<2x16x16xf32>
      %c3_85 = arith.constant 3 : index
      %c1_86 = arith.constant 1 : index
      %196 = memref.load %arg6[%c3_85, %c1_86] : memref<8x4xf32, #tpu.memory_space<smem>>
      %197 = vector.extract_strided_slice %95 {offsets = [0, 1, 0, 0], sizes = [2, 1, 16, 16], strides = [1, 1, 1, 1]} : vector<2x4x16x16xf32> to vector<2x1x16x16xf32>
      %198 = vector.shape_cast %197 : vector<2x1x16x16xf32> to vector<2x16x16xf32>
      %199 = vector.broadcast %196 : f32 to vector<2x16x16xf32>
      %200 = arith.mulf %199, %198 : vector<2x16x16xf32>
      %201 = arith.addf %195, %200 : vector<2x16x16xf32>
      %c3_87 = arith.constant 3 : index
      %c2_88 = arith.constant 2 : index
      %202 = memref.load %arg6[%c3_87, %c2_88] : memref<8x4xf32, #tpu.memory_space<smem>>
      %203 = vector.extract_strided_slice %95 {offsets = [0, 2, 0, 0], sizes = [2, 1, 16, 16], strides = [1, 1, 1, 1]} : vector<2x4x16x16xf32> to vector<2x1x16x16xf32>
      %204 = vector.shape_cast %203 : vector<2x1x16x16xf32> to vector<2x16x16xf32>
      %205 = vector.broadcast %202 : f32 to vector<2x16x16xf32>
      %206 = arith.mulf %205, %204 : vector<2x16x16xf32>
      %207 = arith.addf %201, %206 : vector<2x16x16xf32>
      %c3_89 = arith.constant 3 : index
      %c3_90 = arith.constant 3 : index
      %208 = memref.load %arg6[%c3_89, %c3_90] : memref<8x4xf32, #tpu.memory_space<smem>>
      %209 = vector.extract_strided_slice %95 {offsets = [0, 3, 0, 0], sizes = [2, 1, 16, 16], strides = [1, 1, 1, 1]} : vector<2x4x16x16xf32> to vector<2x1x16x16xf32>
      %210 = vector.shape_cast %209 : vector<2x1x16x16xf32> to vector<2x16x16xf32>
      %211 = vector.broadcast %208 : f32 to vector<2x16x16xf32>
      %212 = arith.mulf %211, %210 : vector<2x16x16xf32>
      %213 = arith.addf %207, %212 : vector<2x16x16xf32>
      %214 = vector.shape_cast %213 : vector<2x16x16xf32> to vector<2x1x16x16xf32>
      %c0_91 = arith.constant 0 : index
      %c3_92 = arith.constant 3 : index
      %c0_93 = arith.constant 0 : index
      %c0_94 = arith.constant 0 : index
      %215 = vector.load %arg8[%c0_91, %c3_92, %c0_93, %c0_94] : memref<2x8x16x16xf32, #tpu.memory_space<vmem>>, vector<2x1x16x16xf32>
      tpu.vector_store %arg8[%c0_91, %c3_92, %c0_93, %c0_94], %214 {strides = array<i32>} : memref<2x8x16x16xf32, #tpu.memory_space<vmem>>, vector<2x1x16x16xf32>,
      %cst_95 = arith.constant 0.000000e+00 : f32
      %216 = vector.broadcast %cst_95 : f32 to vector<2x16x16xf32>
      %c4 = arith.constant 4 : index
      %217 = memref.load %arg7[%c4] : memref<8xf32, #tpu.memory_space<smem>>
      %218 = vector.broadcast %217 : f32 to vector<2x16x16xf32>
      %219 = arith.addf %216, %218 : vector<2x16x16xf32>
      %c4_96 = arith.constant 4 : index
      %c0_97 = arith.constant 0 : index
      %220 = memref.load %arg6[%c4_96, %c0_97] : memref<8x4xf32, #tpu.memory_space<smem>>
      %221 = vector.extract_strided_slice %95 {offsets = [0, 0, 0, 0], sizes = [2, 1, 16, 16], strides = [1, 1, 1, 1]} : vector<2x4x16x16xf32> to vector<2x1x16x16xf32>
      %222 = vector.shape_cast %221 : vector<2x1x16x16xf32> to vector<2x16x16xf32>
      %223 = vector.broadcast %220 : f32 to vector<2x16x16xf32>
      %224 = arith.mulf %223, %222 : vector<2x16x16xf32>
      %225 = arith.addf %219, %224 : vector<2x16x16xf32>
      %c4_98 = arith.constant 4 : index
      %c1_99 = arith.constant 1 : index
      %226 = memref.load %arg6[%c4_98, %c1_99] : memref<8x4xf32, #tpu.memory_space<smem>>
      %227 = vector.extract_strided_slice %95 {offsets = [0, 1, 0, 0], sizes = [2, 1, 16, 16], strides = [1, 1, 1, 1]} : vector<2x4x16x16xf32> to vector<2x1x16x16xf32>
      %228 = vector.shape_cast %227 : vector<2x1x16x16xf32> to vector<2x16x16xf32>
      %229 = vector.broadcast %226 : f32 to vector<2x16x16xf32>
      %230 = arith.mulf %229, %228 : vector<2x16x16xf32>
      %231 = arith.addf %225, %230 : vector<2x16x16xf32>
      %c4_100 = arith.constant 4 : index
      %c2_101 = arith.constant 2 : index
      %232 = memref.load %arg6[%c4_100, %c2_101] : memref<8x4xf32, #tpu.memory_space<smem>>
      %233 = vector.extract_strided_slice %95 {offsets = [0, 2, 0, 0], sizes = [2, 1, 16, 16], strides = [1, 1, 1, 1]} : vector<2x4x16x16xf32> to vector<2x1x16x16xf32>
      %234 = vector.shape_cast %233 : vector<2x1x16x16xf32> to vector<2x16x16xf32>
      %235 = vector.broadcast %232 : f32 to vector<2x16x16xf32>
      %236 = arith.mulf %235, %234 : vector<2x16x16xf32>
      %237 = arith.addf %231, %236 : vector<2x16x16xf32>
      %c4_102 = arith.constant 4 : index
      %c3_103 = arith.constant 3 : index
      %238 = memref.load %arg6[%c4_102, %c3_103] : memref<8x4xf32, #tpu.memory_space<smem>>
      %239 = vector.extract_strided_slice %95 {offsets = [0, 3, 0, 0], sizes = [2, 1, 16, 16], strides = [1, 1, 1, 1]} : vector<2x4x16x16xf32> to vector<2x1x16x16xf32>
      %240 = vector.shape_cast %239 : vector<2x1x16x16xf32> to vector<2x16x16xf32>
      %241 = vector.broadcast %238 : f32 to vector<2x16x16xf32>
      %242 = arith.mulf %241, %240 : vector<2x16x16xf32>
      %243 = arith.addf %237, %242 : vector<2x16x16xf32>
      %244 = vector.shape_cast %243 : vector<2x16x16xf32> to vector<2x1x16x16xf32>
      %c0_104 = arith.constant 0 : index
      %c4_105 = arith.constant 4 : index
      %c0_106 = arith.constant 0 : index
      %c0_107 = arith.constant 0 : index
      %245 = vector.load %arg8[%c0_104, %c4_105, %c0_106, %c0_107] : memref<2x8x16x16xf32, #tpu.memory_space<vmem>>, vector<2x1x16x16xf32>
      tpu.vector_store %arg8[%c0_104, %c4_105, %c0_106, %c0_107], %244 {strides = array<i32>} : memref<2x8x16x16xf32, #tpu.memory_space<vmem>>, vector<2x1x16x16xf32>,
      %cst_108 = arith.constant 0.000000e+00 : f32
      %246 = vector.broadcast %cst_108 : f32 to vector<2x16x16xf32>
      %c5 = arith.constant 5 : index
      %247 = memref.load %arg7[%c5] : memref<8xf32, #tpu.memory_space<smem>>
      %248 = vector.broadcast %247 : f32 to vector<2x16x16xf32>
      %249 = arith.addf %246, %248 : vector<2x16x16xf32>
      %c5_109 = arith.constant 5 : index
      %c0_110 = arith.constant 0 : index
      %250 = memref.load %arg6[%c5_109, %c0_110] : memref<8x4xf32, #tpu.memory_space<smem>>
      %251 = vector.extract_strided_slice %95 {offsets = [0, 0, 0, 0], sizes = [2, 1, 16, 16], strides = [1, 1, 1, 1]} : vector<2x4x16x16xf32> to vector<2x1x16x16xf32>
      %252 = vector.shape_cast %251 : vector<2x1x16x16xf32> to vector<2x16x16xf32>
      %253 = vector.broadcast %250 : f32 to vector<2x16x16xf32>
      %254 = arith.mulf %253, %252 : vector<2x16x16xf32>
      %255 = arith.addf %249, %254 : vector<2x16x16xf32>
      %c5_111 = arith.constant 5 : index
      %c1_112 = arith.constant 1 : index
      %256 = memref.load %arg6[%c5_111, %c1_112] : memref<8x4xf32, #tpu.memory_space<smem>>
      %257 = vector.extract_strided_slice %95 {offsets = [0, 1, 0, 0], sizes = [2, 1, 16, 16], strides = [1, 1, 1, 1]} : vector<2x4x16x16xf32> to vector<2x1x16x16xf32>
      %258 = vector.shape_cast %257 : vector<2x1x16x16xf32> to vector<2x16x16xf32>
      %259 = vector.broadcast %256 : f32 to vector<2x16x16xf32>
      %260 = arith.mulf %259, %258 : vector<2x16x16xf32>
      %261 = arith.addf %255, %260 : vector<2x16x16xf32>
      %c5_113 = arith.constant 5 : index
      %c2_114 = arith.constant 2 : index
      %262 = memref.load %arg6[%c5_113, %c2_114] : memref<8x4xf32, #tpu.memory_space<smem>>
      %263 = vector.extract_strided_slice %95 {offsets = [0, 2, 0, 0], sizes = [2, 1, 16, 16], strides = [1, 1, 1, 1]} : vector<2x4x16x16xf32> to vector<2x1x16x16xf32>
      %264 = vector.shape_cast %263 : vector<2x1x16x16xf32> to vector<2x16x16xf32>
      %265 = vector.broadcast %262 : f32 to vector<2x16x16xf32>
      %266 = arith.mulf %265, %264 : vector<2x16x16xf32>
      %267 = arith.addf %261, %266 : vector<2x16x16xf32>
      %c5_115 = arith.constant 5 : index
      %c3_116 = arith.constant 3 : index
      %268 = memref.load %arg6[%c5_115, %c3_116] : memref<8x4xf32, #tpu.memory_space<smem>>
      %269 = vector.extract_strided_slice %95 {offsets = [0, 3, 0, 0], sizes = [2, 1, 16, 16], strides = [1, 1, 1, 1]} : vector<2x4x16x16xf32> to vector<2x1x16x16xf32>
      %270 = vector.shape_cast %269 : vector<2x1x16x16xf32> to vector<2x16x16xf32>
      %271 = vector.broadcast %268 : f32 to vector<2x16x16xf32>
      %272 = arith.mulf %271, %270 : vector<2x16x16xf32>
      %273 = arith.addf %267, %272 : vector<2x16x16xf32>
      %274 = vector.shape_cast %273 : vector<2x16x16xf32> to vector<2x1x16x16xf32>
      %c0_117 = arith.constant 0 : index
      %c5_118 = arith.constant 5 : index
      %c0_119 = arith.constant 0 : index
      %c0_120 = arith.constant 0 : index
      %275 = vector.load %arg8[%c0_117, %c5_118, %c0_119, %c0_120] : memref<2x8x16x16xf32, #tpu.memory_space<vmem>>, vector<2x1x16x16xf32>
      tpu.vector_store %arg8[%c0_117, %c5_118, %c0_119, %c0_120], %274 {strides = array<i32>} : memref<2x8x16x16xf32, #tpu.memory_space<vmem>>, vector<2x1x16x16xf32>,
      %cst_121 = arith.constant 0.000000e+00 : f32
      %276 = vector.broadcast %cst_121 : f32 to vector<2x16x16xf32>
      %c6 = arith.constant 6 : index
      %277 = memref.load %arg7[%c6] : memref<8xf32, #tpu.memory_space<smem>>
      %278 = vector.broadcast %277 : f32 to vector<2x16x16xf32>
      %279 = arith.addf %276, %278 : vector<2x16x16xf32>
      %c6_122 = arith.constant 6 : index
      %c0_123 = arith.constant 0 : index
      %280 = memref.load %arg6[%c6_122, %c0_123] : memref<8x4xf32, #tpu.memory_space<smem>>
      %281 = vector.extract_strided_slice %95 {offsets = [0, 0, 0, 0], sizes = [2, 1, 16, 16], strides = [1, 1, 1, 1]} : vector<2x4x16x16xf32> to vector<2x1x16x16xf32>
      %282 = vector.shape_cast %281 : vector<2x1x16x16xf32> to vector<2x16x16xf32>
      %283 = vector.broadcast %280 : f32 to vector<2x16x16xf32>
      %284 = arith.mulf %283, %282 : vector<2x16x16xf32>
      %285 = arith.addf %279, %284 : vector<2x16x16xf32>
      %c6_124 = arith.constant 6 : index
      %c1_125 = arith.constant 1 : index
      %286 = memref.load %arg6[%c6_124, %c1_125] : memref<8x4xf32, #tpu.memory_space<smem>>
      %287 = vector.extract_strided_slice %95 {offsets = [0, 1, 0, 0], sizes = [2, 1, 16, 16], strides = [1, 1, 1, 1]} : vector<2x4x16x16xf32> to vector<2x1x16x16xf32>
      %288 = vector.shape_cast %287 : vector<2x1x16x16xf32> to vector<2x16x16xf32>
      %289 = vector.broadcast %286 : f32 to vector<2x16x16xf32>
      %290 = arith.mulf %289, %288 : vector<2x16x16xf32>
      %291 = arith.addf %285, %290 : vector<2x16x16xf32>
      %c6_126 = arith.constant 6 : index
      %c2_127 = arith.constant 2 : index
      %292 = memref.load %arg6[%c6_126, %c2_127] : memref<8x4xf32, #tpu.memory_space<smem>>
      %293 = vector.extract_strided_slice %95 {offsets = [0, 2, 0, 0], sizes = [2, 1, 16, 16], strides = [1, 1, 1, 1]} : vector<2x4x16x16xf32> to vector<2x1x16x16xf32>
      %294 = vector.shape_cast %293 : vector<2x1x16x16xf32> to vector<2x16x16xf32>
      %295 = vector.broadcast %292 : f32 to vector<2x16x16xf32>
      %296 = arith.mulf %295, %294 : vector<2x16x16xf32>
      %297 = arith.addf %291, %296 : vector<2x16x16xf32>
      %c6_128 = arith.constant 6 : index
      %c3_129 = arith.constant 3 : index
      %298 = memref.load %arg6[%c6_128, %c3_129] : memref<8x4xf32, #tpu.memory_space<smem>>
      %299 = vector.extract_strided_slice %95 {offsets = [0, 3, 0, 0], sizes = [2, 1, 16, 16], strides = [1, 1, 1, 1]} : vector<2x4x16x16xf32> to vector<2x1x16x16xf32>
      %300 = vector.shape_cast %299 : vector<2x1x16x16xf32> to vector<2x16x16xf32>
      %301 = vector.broadcast %298 : f32 to vector<2x16x16xf32>
      %302 = arith.mulf %301, %300 : vector<2x16x16xf32>
      %303 = arith.addf %297, %302 : vector<2x16x16xf32>
      %304 = vector.shape_cast %303 : vector<2x16x16xf32> to vector<2x1x16x16xf32>
      %c0_130 = arith.constant 0 : index
      %c6_131 = arith.constant 6 : index
      %c0_132 = arith.constant 0 : index
      %c0_133 = arith.constant 0 : index
      %305 = vector.load %arg8[%c0_130, %c6_131, %c0_132, %c0_133] : memref<2x8x16x16xf32, #tpu.memory_space<vmem>>, vector<2x1x16x16xf32>
      tpu.vector_store %arg8[%c0_130, %c6_131, %c0_132, %c0_133], %304 {strides = array<i32>} : memref<2x8x16x16xf32, #tpu.memory_space<vmem>>, vector<2x1x16x16xf32>,
      %cst_134 = arith.constant 0.000000e+00 : f32
      %306 = vector.broadcast %cst_134 : f32 to vector<2x16x16xf32>
      %c7 = arith.constant 7 : index
      %307 = memref.load %arg7[%c7] : memref<8xf32, #tpu.memory_space<smem>>
      %308 = vector.broadcast %307 : f32 to vector<2x16x16xf32>
      %309 = arith.addf %306, %308 : vector<2x16x16xf32>
      %c7_135 = arith.constant 7 : index
      %c0_136 = arith.constant 0 : index
      %310 = memref.load %arg6[%c7_135, %c0_136] : memref<8x4xf32, #tpu.memory_space<smem>>
      %311 = vector.extract_strided_slice %95 {offsets = [0, 0, 0, 0], sizes = [2, 1, 16, 16], strides = [1, 1, 1, 1]} : vector<2x4x16x16xf32> to vector<2x1x16x16xf32>
      %312 = vector.shape_cast %311 : vector<2x1x16x16xf32> to vector<2x16x16xf32>
      %313 = vector.broadcast %310 : f32 to vector<2x16x16xf32>
      %314 = arith.mulf %313, %312 : vector<2x16x16xf32>
      %315 = arith.addf %309, %314 : vector<2x16x16xf32>
      %c7_137 = arith.constant 7 : index
      %c1_138 = arith.constant 1 : index
      %316 = memref.load %arg6[%c7_137, %c1_138] : memref<8x4xf32, #tpu.memory_space<smem>>
      %317 = vector.extract_strided_slice %95 {offsets = [0, 1, 0, 0], sizes = [2, 1, 16, 16], strides = [1, 1, 1, 1]} : vector<2x4x16x16xf32> to vector<2x1x16x16xf32>
      %318 = vector.shape_cast %317 : vector<2x1x16x16xf32> to vector<2x16x16xf32>
      %319 = vector.broadcast %316 : f32 to vector<2x16x16xf32>
      %320 = arith.mulf %319, %318 : vector<2x16x16xf32>
      %321 = arith.addf %315, %320 : vector<2x16x16xf32>
      %c7_139 = arith.constant 7 : index
      %c2_140 = arith.constant 2 : index
      %322 = memref.load %arg6[%c7_139, %c2_140] : memref<8x4xf32, #tpu.memory_space<smem>>
      %323 = vector.extract_strided_slice %95 {offsets = [0, 2, 0, 0], sizes = [2, 1, 16, 16], strides = [1, 1, 1, 1]} : vector<2x4x16x16xf32> to vector<2x1x16x16xf32>
      %324 = vector.shape_cast %323 : vector<2x1x16x16xf32> to vector<2x16x16xf32>
      %325 = vector.broadcast %322 : f32 to vector<2x16x16xf32>
      %326 = arith.mulf %325, %324 : vector<2x16x16xf32>
      %327 = arith.addf %321, %326 : vector<2x16x16xf32>
      %c7_141 = arith.constant 7 : index
      %c3_142 = arith.constant 3 : index
      %328 = memref.load %arg6[%c7_141, %c3_142] : memref<8x4xf32, #tpu.memory_space<smem>>
      %329 = vector.extract_strided_slice %95 {offsets = [0, 3, 0, 0], sizes = [2, 1, 16, 16], strides = [1, 1, 1, 1]} : vector<2x4x16x16xf32> to vector<2x1x16x16xf32>
      %330 = vector.shape_cast %329 : vector<2x1x16x16xf32> to vector<2x16x16xf32>
      %331 = vector.broadcast %328 : f32 to vector<2x16x16xf32>
      %332 = arith.mulf %331, %330 : vector<2x16x16xf32>
      %333 = arith.addf %327, %332 : vector<2x16x16xf32>
      %334 = vector.shape_cast %333 : vector<2x16x16xf32> to vector<2x1x16x16xf32>
      %c0_143 = arith.constant 0 : index
      %c7_144 = arith.constant 7 : index
      %c0_145 = arith.constant 0 : index
      %c0_146 = arith.constant 0 : index
      %335 = vector.load %arg8[%c0_143, %c7_144, %c0_145, %c0_146] : memref<2x8x16x16xf32, #tpu.memory_space<vmem>>, vector<2x1x16x16xf32>
      tpu.vector_store %arg8[%c0_143, %c7_144, %c0_145, %c0_146], %334 {strides = array<i32>} : memref<2x8x16x16xf32, #tpu.memory_space<vmem>>, vector<2x1x16x16xf32>,
    } else {
    }
    return
  }
  func.func @transform_0(%arg0: i32) -> (i32, i32, i32, i32) {
    %c0_i32 = arith.constant 0 : i32
    %c0_i32_0 = arith.constant 0 : i32
    %c0_i32_1 = arith.constant 0 : i32
    %c0_i32_2 = arith.constant 0 : i32
    return %arg0, %c0_i32, %c0_i32_0, %c0_i32_1 : i32, i32, i32, i32
  }
  func.func @transform_1(%arg0: i32) -> (i32, i32, i32) {
    %c0_i32 = arith.constant 0 : i32
    %c0_i32_0 = arith.constant 0 : i32
    %c0_i32_1 = arith.constant 0 : i32
    %c0_i32_2 = arith.constant 0 : i32
    return %c0_i32, %c0_i32_0, %c0_i32_1 : i32, i32, i32
  }
  func.func @transform_2(%arg0: i32) -> (i32, i32, i32) {
    %c0_i32 = arith.constant 0 : i32
    %c0_i32_0 = arith.constant 0 : i32
    %c0_i32_1 = arith.constant 0 : i32
    %c0_i32_2 = arith.constant 0 : i32
    return %c0_i32, %c0_i32_0, %c0_i32_1 : i32, i32, i32
  }
  func.func @transform_3(%arg0: i32) -> (i32, i32, i32, i32) {
    %c0_i32 = arith.constant 0 : i32
    %c0_i32_0 = arith.constant 0 : i32
    %c0_i32_1 = arith.constant 0 : i32
    %c0_i32_2 = arith.constant 0 : i32
    %c0_i32_3 = arith.constant 0 : i32
    return %c0_i32, %c0_i32_0, %c0_i32_1, %c0_i32_2 : i32, i32, i32, i32
  }
  func.func @transform_4(%arg0: i32) -> (i32, i32, i32, i32) {
    %c0_i32 = arith.constant 0 : i32
    %c0_i32_0 = arith.constant 0 : i32
    %c0_i32_1 = arith.constant 0 : i32
    %c0_i32_2 = arith.constant 0 : i32
    %c0_i32_3 = arith.constant 0 : i32
    return %c0_i32, %c0_i32_0, %c0_i32_1, %c0_i32_2 : i32, i32, i32, i32
  }
  func.func @transform_5(%arg0: i32) -> (i32, i32) {
    %c0_i32 = arith.constant 0 : i32
    %c0_i32_0 = arith.constant 0 : i32
    %c0_i32_1 = arith.constant 0 : i32
    return %c0_i32, %c0_i32_0 : i32, i32
  }
  func.func @transform_6(%arg0: i32) -> i32 {
    %c0_i32 = arith.constant 0 : i32
    %c0_i32_0 = arith.constant 0 : i32
    return %c0_i32 : i32
  }
  func.func @transform_7(%arg0: i32) -> (i32, i32, i32, i32) {
    %c0_i32 = arith.constant 0 : i32
    %c0_i32_0 = arith.constant 0 : i32
    %c0_i32_1 = arith.constant 0 : i32
    %c0_i32_2 = arith.constant 0 : i32
    %c0_i32_3 = arith.constant 0 : i32
    return %c0_i32, %c0_i32_0, %c0_i32_1, %c0_i32_2 : i32, i32, i32, i32
  }
}

</mosaic_0001>

<bundles_post_ra>
// kernel: tpu_custom_call.1
= control target key start
LH: loop header
LB: loop body
LE: loop exit
PB: predicated region body
PF: predicated region fallthrough
CT: control target
= control target key end

     0   :  { %s4056_s0 = inlined_call_operand.hbm [shape: f32[2,4,16,16], index: 0, kind: input, shape index: {}]   ;;  %s4057_s1 = inlined_call_operand.vmem [shape: f32[4,3,3], index: 1, kind: input, shape index: {}]   ;;  %s4058_s2 = inlined_call_operand.vmem [shape: f32[4,1,1], index: 2, kind: input, shape index: {}]   ;;  %s4059_s3 = inlined_call_operand.vmem [shape: f32[1,4,1,1], index: 3, kind: input, shape index: {}]   ;;  %s4060_s4 = inlined_call_operand.vmem [shape: f32[1,4,1,1], index: 4, kind: input, shape index: {}]   ;;  %s4061_s5 = inlined_call_operand.vmem [shape: f32[8,4], index: 5, kind: input, shape index: {}]   ;;  %s4062_s6 = inlined_call_operand.vmem [shape: f32[8], index: 6, kind: input, shape index: {}]   ;;  %s4063_s7 = inlined_call_operand.hbm [shape: f32[2,8,16,16], index: 7, kind: output, shape index: {}]  }
   0x1   :  { %4086 = sst [smem:[#allocation69_spill]] %s4056_s0 }
   0x2   :  { %4087 = sst [smem:[#allocation70_spill]] %s4057_s1 }
   0x3   :  { %4088 = sst [smem:[#allocation71_spill]] %s4058_s2 }
   0x4   :  { %4089 = sst [smem:[#allocation72_spill]] %s4059_s3 }
   0x5   :  { %4090 = sst [smem:[#allocation73_spill]] %s4060_s4 }
   0x6   :  { %4091 = sst [smem:[#allocation74_spill]] %s4061_s5 }
   0x7   :  { %4092 = sst [smem:[#allocation75_spill]] %s4062_s6 }
   0x8   :  { %4093 = sst [smem:[#allocation76_spill]] %s4063_s7 }
   0x9   :  { %12 = vsyncpa [#allocation5], 0 }
   0xa   :  { %14 = vsyncpa [#allocation5 + $0x1], 0 }
   0xb   :  { %15 = vsyncpa [#allocation7], 0 }
   0xc   :  { %16 = vsyncpa [#allocation10], 0 }
   0xd   :  { %17 = vsyncpa [#allocation6], 0  ;;  %s2452_s24 = smov 0   ;;  %s2454_s25 = smov 0  }
   0xe   :  { %s2456_s26 = smov 0   ;;  %s2458_s27 = smov 0  }
   0xf LB: > { %4094 = sst [smem:[#allocation16_spill]] %s2389_s25  ;;  %s2471_s28 = sadd.s32 4294967295, %s2397_s27   ;;  %s2397_s27 = sphi %s2458_s27, %s4218_s27   ;;  %s2393_s26 = sphi %s2456_s26, %s4221_s26   ;;  %s2389_s25 = sphi %s2454_s25, %s4220_s25   ;;  %s2385_s24 = sphi %s2452_s24, %s4219_s24  }
  0x10   : > { %4095 = sst [smem:[#allocation17_spill]] %s2393_s26  ;;  %s2474_s29 = sadd.s32 1, %s2397_s27  }
  0x11   : > { %4096 = sst [smem:[#allocation18_spill]] %s2471_s28  ;;  %s27_s30 = ssub.s32 %s2397_s27, %s2474_s29 }
  0x12   : > { %4097 = sst [smem:[#allocation19_spill]] %s2474_s29  ;;  %s30_s8 = sadd.s32 1, %s2393_s26 }
  0x13   : > { %p28_p0 = scmp.eq.s32.totalorder %s27_s30, 0  ;;  %p37_p1 = scmp.ne.s32.totalorder %s2393_s26, %s2389_s25 }
  0x14   : > { %p38_p2 = scmp.eq.s32.totalorder %s2397_s27, 0  ;;  %p43_p3 = scmp.ne.s32.totalorder %s2389_s25, %s2385_s24 }
  0x15   : > { %s2484_s9 = scalar_select %p28_p0, %s2393_s26, %s30_s8  }
  0x16   : > { %p2486_p4 = por %p38_p2, %p37_p1  ;;  %p44_p5 = scmp.eq.s32.totalorder %s2471_s28, 0 }
  0x17   : > { %4098 = sst [smem:[#allocation20_spill]] %s2484_s9  ;;  %p2035_p6 = scmp.ge.s32.totalorder %s2397_s27, 1 }
  0x18   : > { %p201_p7 = scmp.lt.s32.totalorder %s2397_s27, 3  ;;  %p2495_p8 = por %p44_p5, %p43_p3 }
  0x19   : > { %p2036_p9 = scmp.ne.s32.totalorder %s2471_s28, 0  ;;  %s4102_s5 = sld [smem:[#allocation74_spill]] }
  0x1a   : > { %p2500_p10 = pnand %p2035_p6, %p201_p7  ;;  %p2191_p12 = scmp.lt.s32.totalorder %s2397_s27, 2 }
  0x1b   : > { %s4103_s6 = sld [smem:[#allocation75_spill]]  ;;  %s246_s20 = sand.u32 1, %s2393_s26  }
  0x1c   : > { %p2178_p11 = pneg %p2500_p10  ;;  %p2517_p0 = pnand %p2191_p12, %p2486_p4 }
  0x1d   : > { %s2399_s21 = smov [#allocation8]   ;;  %s2400_s22 = smov [#allocation9]  }
  0x1e   : > { %p2179_p13 = pnand %p2178_p11, %p44_p5  ;;  %s2039_s23 = sshll.u32 %s246_s20, 6 }
  0x1f   : > { %s225_s15 = sshll.u32 %s4102_s5, 4  ;;  %s2091_s24 = sshll.u32 %s2397_s27, 6  ;;  %s226_s15 = int_to_ptr.vmem [resolvable:$true] %s225_s15 }
  0x20   : > { %2181 = dma.vmem_to_smem (!%p2179_p13), %s226_s15, 128, %s2399_s21, [#allocation7]  }
  0x21   : > { %s235_s18 = sshll.u32 %s4103_s6, 4  ;;  %s4105_s0 = sld [smem:[#allocation69_spill]]  ;;  %s236_s18 = int_to_ptr.vmem [resolvable:$true] %s235_s18 }
  0x22   : > { %2184 = dma.vmem_to_smem (!%p2179_p13), %s236_s18, 16, %s2400_s22, [#allocation10]  }
  0x23   : > { %s250_s16 = scalar_lea.vmem [#allocation4], %s2039_s23  ;;  %s247_s10 = scalar_lea.sflag [#allocation5], %s246_s20 }
  0x24   : > { %s258_s17 = sshll.u32 %s250_s16, 4  ;;  %p2297_p2 = pneg %p2517_p0  ;;  %s259_s17 = int_to_ptr.vmem [resolvable:$true] %s258_s17 }
  0x27   : > { %s255_s13 = scalar_lea.hbm %s4105_s0, %s2091_s24  ;;  %s2300_s18 = scalar_lea.hbm %s4105_s0, 128 }
  0x28   : > { %s256_s14 = sshll.u32 %s255_s13, 4  ;;  %s257_s14 = int_to_ptr.hbm [resolvable:$true] %s256_s14 }
  0x29   : > { %s2293_s5 = sshra.s32 %s257_s14, 4  ;;  %s2294_s5 = int_to_ptr.hbm [resolvable:$true] %s2293_s5 }
  0x2a   : > { %s2295_s6 = scalar_lea.hbm %s2294_s5, 64  ;;  %p2301_p6 = scmp.lt.s32.totalorder %s2294_s5, %s4105_s0 }
  0x2b   : > { %p2296_p1 = scmp.ne.s32.totalorder %s2294_s5, %s2295_s6  ;;  %p2302_p7 = scmp.lt.s32.totalorder %s2300_s18, %s2295_s6 }
  0x2d   : > { %p2298_p3 = pnand %p2297_p2, %p2296_p1  ;;  %p2303_p11 = por %p2302_p7, %p2301_p6 }
  0x2f   : > { %p2299_p4 = pneg %p2298_p3 }
  0x31   : > { %p2304_p12 = pnand %p2303_p11, %p2299_p4 }
  0x33   : > { %2307 = shalt.err (!%p2304_p12)
}
  0x34   : > { %s2401_s20 = smov 128   ;;  %s2402_s23 = smov 8  }
  0x35   : > { %2188 = dma.hbm_to_vmem [thread:$0]  (!%p2517_p0), %s257_s14, 1024, %s259_s17, %s247_s10, %s2401_s20, %s2401_s20, %s2402_s23  }
  0x36   : > { %270 = sbr.rel (%p2500_p10) target bundleno = 1056 (0x420), region = 48  ;;  %s272_s24 = sand.u32 (!%p2500_p10), 1, %s2389_s25  }
  0x37   : > { %s2043_s30 = sshll.u32 (!%p2500_p10), %s272_s24, 6  ;;  %s273_s8 = scalar_lea.sflag (!%p2500_p10), [#allocation5], %s272_s24 }
  0x38   : > { %s2539_s13 = scalar_lea.vmem (!%p2500_p10), [#allocation4], %s2043_s30 }
  0x3b   : > { %2368 = dma.done.wait (%p2495_p8), %s273_s8, 1024  }
  0x3c   : > { %2370 = vsyncadd (%p2495_p8), %s273_s8, 4294966272 }
  0x3d   : > { %2372 = dma.done.wait (%p44_p5), [#allocation7], 128  }
  0x3e   : > { %2374 = vsyncadd (%p44_p5), [#allocation7], 4294967168 }
  0x3f   : > { %2376 = dma.done.wait (%p44_p5), [#allocation10], 16  }
  0x40   : > { %2378 = vsyncadd (%p44_p5), [#allocation10], 4294967280 }
  0x41   : > { %292 = sfence }
  0x42   : > { %317 = sbr.rel (%p2036_p9) target bundleno = 84 (0x54), region = 64 }
  0x47   : > { %vm318_vm0 = vcmask 146432   ;;  %v2403_v0 = vmov 0.0   ;;  %vm321_vm1 = vcmask 140288  }
  0x48   : > { %319 = vst.msk [vmem:[#allocation3] sm:$0xff] %vm318_vm0, %v2403_v0 }
  0x49   : > { %320 = vst.msk [vmem:[#allocation3 + $0x8] sm:$0xff] %vm318_vm0, %v2403_v0 }
  0x4a   : > { %323 = vst.msk [vmem:[#allocation3 + $0x18] sm:$0xff] %vm318_vm0, %v2403_v0 }
  0x4b   : > { %324 = vst.msk [vmem:[#allocation3 + $0x20] sm:$0xff] %vm318_vm0, %v2403_v0 }
  0x4c   : > { %326 = vst.msk [vmem:[#allocation3 + $0x30] sm:$0xff] %vm318_vm0, %v2403_v0 }
  0x4d   : > { %327 = vst.msk [vmem:[#allocation3 + $0x38] sm:$0xff] %vm318_vm0, %v2403_v0 }
  0x4e   : > { %329 = vst.msk [vmem:[#allocation3 + $0x48] sm:$0xff] %vm318_vm0, %v2403_v0 }
  0x4f   : > { %330 = vst.msk [vmem:[#allocation3 + $0x50] sm:$0xff] %vm318_vm0, %v2403_v0 }
  0x50   : > { %322 = vst.msk [vmem:[#allocation3 + $0x10] sm:$0x3] %vm321_vm1, %v2403_v0 }
  0x51   : > { %325 = vst.msk [vmem:[#allocation3 + $0x28] sm:$0x3] %vm321_vm1, %v2403_v0 }
  0x52   : > { %328 = vst.msk [vmem:[#allocation3 + $0x40] sm:$0x3] %vm321_vm1, %v2403_v0 }
  0x53   : > { %331 = vst.msk [vmem:[#allocation3 + $0x58] sm:$0x3] %vm321_vm1, %v2403_v0 }
  0x54 PF: > { %v336_v1 = vld [vmem:[%s2539_s13 + $0x20] sm:$0xff]  ;;  %v334_v2 = vld [vmem:[%s2539_s13 + $0x10] sm:$0xff]  ;;  %s2404_s5 = smov 1   ;;  %s4106_s1 = sld [smem:[#allocation70_spill]]  ;;  %v337_v8 = vld [vmem:[%s2539_s13 + $0x28] sm:$0xff]  ;;  %vm372_vm2 = vcmask 138248  }
  0x55   : > { %v332_v3 = vld [vmem:[%s2539_s13] sm:$0xff]  ;;  %356 = vrot.lane.b32.xlu2 %v336_v1, %s2404_s5  ;;  %352 = vrot.lane.b32.xlu1 %v334_v2, %s2404_s5  ;;  %v335_v9 = vld [vmem:[%s2539_s13 + $0x18] sm:$0xff]  ;;  %s2405_s15 = smov 127   ;;  %s2406_s27 = smov 126   ;;  %vm605_vm3 = vcmask 1046528   ;;  %vm874_vm4 = vcmask 1045504  }
  0x56   : > { %348 = vrot.lane.b32.xlu0 %v332_v3, %s2404_s5  ;;  %v333_v10 = vld [vmem:[%s2539_s13 + $0x8] sm:$0xff]  ;;  %v339_v11 = vld [vmem:[%s2539_s13 + $0x38] sm:$0xff]  ;;  %v338_v12 = vld [vmem:[%s2539_s13 + $0x30] sm:$0xff]  ;;  %s4117_s2 = sld [smem:[#allocation71_spill]]  ;;  %vm1141_vm5 = vcmask 130048   ;;  %p2048_p5 = scmp.ne.s32.totalorder %s2471_s28, 1 }
  0x5a   : > { %v393_v4 = vld [vmem:[%s4106_s1] sm:$0x7]  ;;  %v394_v5 = vld [vmem:[%s4106_s1 + $0x4] sm:$0x7]  ;;  %v395_v6 = vld [vmem:[%s4106_s1 + $0x8] sm:$0x7] }
  0x5b   : > { %2092 = vpush %v393_v4  ;;  %v396_v7 = vld [vmem:[%s4106_s1 + $0xc] sm:$0x7]  ;;  %v2582_v13 = vrot.slane %v395_v6, 1  ;;  %v566_v14 = vrot.slane %v394_v5, 1  ;;  %v565_v15 = vrot.slane %v393_v4, 1  ;;  %v2592_v17 = vrot.slane %v394_v5, 2 }
  0x5c   : > { %2094 = vpush %v394_v5  ;;  %v568_v16 = vrot.slane %v396_v7, 1  ;;  %v2598_v18 = vrot.slane %v395_v6, 2  ;;  %v2600_v19 = vrot.slane %v393_v4, 2  ;;  %v2607_v20 = vrot.slane %v396_v7, 2 }
  0x5d   : > { %2096 = vpush %v395_v6  ;;  %358 = vrot.lane.b32.xlu2 %v337_v8, %s2404_s5  ;;  %354 = vrot.lane.b32.xlu1 %v335_v9, %s2404_s5 }
  0x5e   : > { %2098 = vpush %v396_v7  ;;  %350 = vrot.lane.b32.xlu0 %v333_v10, %s2404_s5 }
  0x65   : > { %429 = vrot.lane.b32.xlu2 %v393_v4, %s2405_s15  ;;  %362 = vrot.lane.b32.xlu1 %v339_v11, %s2404_s5 }
  0x66   : > { %360 = vrot.lane.b32.xlu0 %v338_v12, %s2404_s5 }
  0x6d   : > { %433 = vrot.lane.b32.xlu1 %v395_v6, %s2405_s15  ;;  %435 = vrot.lane.b32.xlu2 %v396_v7, %s2405_s15 }
  0x6e   : > { %431 = vrot.lane.b32.xlu0 %v394_v5, %s2405_s15 }
  0x75   : > { %501 = vrot.lane.b32.xlu1 %v395_v6, %s2406_s27  ;;  %497 = vrot.lane.b32.xlu2 %v393_v4, %s2406_s27 }
  0x76   : > { %499 = vrot.lane.b32.xlu0 %v394_v5, %s2406_s27 }
  0x7d   : > { %646 = vrot.lane.b32.xlu1 %v2582_v13, %s2405_s15  ;;  %503 = vrot.lane.b32.xlu2 %v396_v7, %s2406_s27 }
  0x7e   : > { %644 = vrot.lane.b32.xlu0 %v566_v14, %s2405_s15 }
  0x85   : > { %738 = vrot.lane.b32.xlu1 %v565_v15, %s2406_s27  ;;  %642 = vrot.lane.b32.xlu2 %v565_v15, %s2405_s15 }
  0x86   : > { %742 = vrot.lane.b32.xlu0 %v2582_v13, %s2406_s27 }
  0x8c   : > { %s2627_s18 = spop %2092 }
  0x8d   : > { %744 = vrot.lane.b32.xlu1 %v568_v16, %s2406_s27  ;;  %648 = vrot.lane.b32.xlu2 %v568_v16, %s2405_s15  ;;  %s2629_s21 = spop %2094 }
  0x8e   : > { %913 = vrot.lane.b32.xlu0 %v2592_v17, %s2405_s15  ;;  %s2632_s22 = spop %2096 }
  0x8f   : > { %s2634_s20 = spop %2098 }
  0x95   : > { %915 = vrot.lane.b32.xlu1 %v2598_v18, %s2405_s15  ;;  %740 = vrot.lane.b32.xlu2 %v566_v14, %s2406_s27 }
  0x96   : > { %1007 = vrot.lane.b32.xlu0 %v2600_v19, %s2406_s27 }
  0x9d   : > { %1009 = vrot.lane.b32.xlu1 %v2592_v17, %s2406_s27  ;;  %911 = vrot.lane.b32.xlu2 %v2600_v19, %s2405_s15 }
  0x9e   : > { %1013 = vrot.lane.b32.xlu0 %v2607_v20, %s2406_s27 }
  0xa5   : > { %917 = vrot.lane.b32.xlu2 %v2607_v20, %s2405_s15 }
  0xad   : > { %1011 = vrot.lane.b32.xlu2 %v2598_v18, %s2406_s27 }
  0xaf   : > { %v357_v21 = vpop.permute.xlu2 %356 }
  0xb0   : > { %377 = vst.msk [vmem:[#allocation3 + $0x31] sm:$0xff] %vm372_vm2, %v357_v21 }
  0xb7   : > { %v359_v22 = vpop.permute.xlu2 %358  ;;  %v2652_v61 = vld [vmem:[#allocation3 + $0x30] sm:$0xff] }
  0xb8   : > { %378 = vst.msk [vmem:[#allocation3 + $0x39] sm:$0xff] %vm372_vm2, %v359_v22 }
  0xbf   : > { %v430_v23 = vpop.permute.xlu2 %429  ;;  %v2664_v3 = vld [vmem:[#allocation3 + $0x38] sm:$0xff] }
  0xc0   : > { %2100 = vpush %v430_v23 }
  0xc7   : > { %v353_v24 = vpop.permute.xlu1 %352  ;;  %v436_v25 = vpop.permute.xlu2 %435 }
  0xc8   : > { %375 = vst.msk [vmem:[#allocation3 + $0x19] sm:$0xff] %vm372_vm2, %v353_v24  ;;  %v349_v26 = vpop.permute.xlu0 %348 }
  0xc9   : > { %373 = vst.msk [vmem:[#allocation3 + $0x1] sm:$0xff] %vm372_vm2, %v349_v26 }
  0xcf   : > { %v355_v27 = vpop.permute.xlu1 %354  ;;  %v498_v28 = vpop.permute.xlu2 %497  ;;  %v2648_v58 = vld [vmem:[#allocation3 + $0x18] sm:$0xff] }
  0xd0   : > { %376 = vst.msk [vmem:[#allocation3 + $0x21] sm:$0xff] %vm372_vm2, %v355_v27  ;;  %v351_v29 = vpop.permute.xlu0 %350  ;;  %v2636_v42 = vld [vmem:[#allocation3] sm:$0xff] }
  0xd1   : > { %374 = vst.msk [vmem:[#allocation3 + $0x9] sm:$0xff] %vm372_vm2, %v351_v29 }
  0xd7   : > { %v363_v30 = vpop.permute.xlu1 %362  ;;  %v504_v31 = vpop.permute.xlu2 %503  ;;  %v2650_v59 = vld [vmem:[#allocation3 + $0x20] sm:$0xff]  ;;  %v2687_v12 = vld [vmem:[#allocation3 + $0x28] sm:$0x3] }
  0xd8   : > { %380 = vst.msk [vmem:[#allocation3 + $0x51] sm:$0xff] %vm372_vm2, %v363_v30  ;;  %v361_v32 = vpop.permute.xlu0 %360  ;;  %v2638_v43 = vld [vmem:[#allocation3 + $0x8] sm:$0xff]  ;;  %v2677_v9 = vld [vmem:[#allocation3 + $0x10] sm:$0x3] }
  0xd9   : > { %379 = vst.msk [vmem:[#allocation3 + $0x49] sm:$0xff] %vm372_vm2, %v361_v32 }
  0xdf   : > { %v434_v33 = vpop.permute.xlu1 %433  ;;  %v643_v34 = vpop.permute.xlu2 %642 }
  0xe0   : > { %v432_v35 = vpop.permute.xlu0 %431  ;;  %v2666_v4 = vld [vmem:[#allocation3 + $0x48] sm:$0xff]  ;;  %v2670_v5 = vld [vmem:[#allocation3 + $0x50] sm:$0xff] }
  0xe1   : > { %2102 = vpush %v432_v35 }
  0xe2   : > { %2104 = vpush %v434_v33 }
  0xe3   : > { %2106 = vpush %v436_v25 }
  0xe4   : > { %2108 = vpush %v498_v28 }
  0xe7   : > { %v502_v36 = vpop.permute.xlu1 %501  ;;  %v649_v37 = vpop.permute.xlu2 %648 }
  0xe8   : > { %v500_v38 = vpop.permute.xlu0 %499 }
  0xe9   : > { %2110 = vpush %v500_v38 }
  0xea   : > { %2112 = vpush %v502_v36 }
  0xeb   : > { %2114 = vpush %v504_v31 }
  0xec   : > { %2116 = vpush %v565_v15 }
  0xed   : > { %2118 = vpush %v566_v14 }
  0xee   : > { %2120 = vpush %v2582_v13 }
  0xef   : > { %2122 = vpush %v568_v16  ;;  %v647_v39 = vpop.permute.xlu1 %646  ;;  %v741_v41 = vpop.permute.xlu2 %740 }
  0xf0   : > { %2124 = vpush %v643_v34  ;;  %v645_v40 = vpop.permute.xlu0 %644 }
  0xf1   : > { %2126 = vpush %v645_v40  ;;  %s2101_s23 = spop %2100 }
  0xf2   : > { %2128 = vpush %v647_v39  ;;  %v438_v44 = vstv %s2101_s23 }
  0xf3   : > { %2130 = vpush %v649_v37  ;;  %v449_v45 = vmul.f32 %v438_v44, %v2636_v42  ;;  %v450_v46 = vmul.f32 %v438_v44, %v2638_v43 }
  0xf5   : > { %465 = vrot.lane.b32.xlu0 %v449_v45, %s2405_s15  ;;  %467 = vrot.lane.b32.xlu1 %v450_v46, %s2405_s15 }
  0xf7   : > { %v739_v47 = vpop.permute.xlu1 %738  ;;  %v912_v49 = vpop.permute.xlu2 %911 }
  0xf8   : > { %v743_v48 = vpop.permute.xlu0 %742  ;;  %2132 = vpush %v739_v47 }
  0xf9   : > { %2134 = vpush %v741_v41 }
  0xfa   : > { %2136 = vpush %v743_v48 }
  0xff   : > { %v745_v50 = vpop.permute.xlu1 %744  ;;  %v918_v52 = vpop.permute.xlu2 %917 }
 0x100   : > { %v914_v51 = vpop.permute.xlu0 %913  ;;  %2138 = vpush %v745_v50 }
 0x101   : > { %2140 = vpush %v2600_v19 }
 0x102   : > { %2142 = vpush %v2592_v17 }
 0x103   : > { %2144 = vpush %v2598_v18  ;;  %v2700_v18 = vld [vmem:[#allocation3 + $0x40] sm:$0x3] }
 0x104   : > { %2146 = vpush %v2607_v20  ;;  %v2706_v20 = vld [vmem:[#allocation3 + $0x58] sm:$0x3] }
 0x105   : > { %2148 = vpush %v912_v49 }
 0x106   : > { %2150 = vpush %v914_v51 }
 0x107   : > { %v916_v53 = vpop.permute.xlu1 %915  ;;  %v1012_v55 = vpop.permute.xlu2 %1011 }
 0x108   : > { %v1008_v54 = vpop.permute.xlu0 %1007  ;;  %2152 = vpush %v916_v53 }
 0x109   : > { %2154 = vpush %v918_v52 }
 0x10a   : > { %2156 = vpush %v1008_v54 }
 0x10f   : > { %v1010_v56 = vpop.permute.xlu1 %1009 }
 0x110   : > { %v1014_v57 = vpop.permute.xlu0 %1013  ;;  %2158 = vpush %v1010_v56 }
 0x111   : > { %2160 = vpush %v1012_v55 }
 0x112   : > { %2162 = vpush %v1014_v57  ;;  %s2103_s24 = spop %2102 }
 0x113   : > { %v441_v60 = vstv %s2103_s24  ;;  %s2105_s30 = spop %2104 }
 0x114   : > { %v451_v62 = vmul.f32 %v441_v60, %v2648_v58  ;;  %v452_v63 = vmul.f32 %v441_v60, %v2650_v59  ;;  %v444_v0 = vstv %s2105_s30  ;;  %s2107_s8 = spop %2106 }
 0x115   : > { %v453_v1 = vmul.f32 %v444_v0, %v2652_v61  ;;  %v447_v2 = vstv %s2107_s8  ;;  %s2660_s13 = spop %2108  ;;  %v454_v6 = vmul.f32 %v444_v0, %v2664_v3 }
 0x116   : > { %471 = vrot.lane.b32.xlu0 %v452_v63, %s2405_s15  ;;  %469 = vrot.lane.b32.xlu2 %v451_v62, %s2405_s15  ;;  %v455_v7 = vmul.f32 %v447_v2, %v2666_v4  ;;  %v456_v8 = vmul.f32 %v447_v2, %v2670_v5  ;;  %v506_v16 = vstv %s2660_s13 }
 0x117   : > { %473 = vrot.lane.b32.xlu1 %v453_v1, %s2405_s15  ;;  %v517_v22 = vmul.f32 %v506_v16, %v2636_v42  ;;  %v518_v25 = vmul.f32 %v506_v16, %v2638_v43 }
 0x11a   : > { %s2662_s5 = spop %2110 }
 0x11b   : > { %s2668_s6 = spop %2112  ;;  %v509_v17 = vstv %s2662_s5 }
 0x11c   : > { %s2674_s11 = spop %2114  ;;  %v519_v23 = vmul.f32 %v509_v17, %v2648_v58  ;;  %v512_v26 = vstv %s2668_s6  ;;  %v520_v28 = vmul.f32 %v509_v17, %v2650_v59 }
 0x11d   : > { %s2117_s12 = spop %2116  ;;  %v522_v29 = vmul.f32 %v512_v26, %v2664_v3  ;;  %v521_v30 = vmul.f32 %v512_v26, %v2652_v61  ;;  %v515_v33 = vstv %s2674_s11 }
 0x11e   : > { %v2679_v10 = vstv %s2117_s12  ;;  %s2119_s19 = spop %2118  ;;  %477 = vrot.lane.b32.xlu0 %v455_v7, %s2405_s15  ;;  %475 = vrot.lane.b32.xlu2 %v454_v6, %s2405_s15  ;;  %v523_v38 = vmul.f32 %v515_v33, %v2666_v4  ;;  %v524_v41 = vmul.f32 %v515_v33, %v2670_v5 }
 0x11f   : > { %v2685_v11 = vmul.f32 %v2679_v10, %v2677_v9  ;;  %v2689_v13 = vstv %s2119_s19  ;;  %s2121_s14 = spop %2120  ;;  %479 = vrot.lane.b32.xlu1 %v456_v8, %s2405_s15  ;;  %v2782_v0 = vmul.f32 %v2679_v10, %v2636_v42  ;;  %v2786_v1 = vmul.f32 %v2679_v10, %v2638_v43 }
 0x120   : > { %v2694_v14 = vmul.f32 %v2689_v13, %v2687_v12  ;;  %v2696_v15 = vstv %s2121_s14  ;;  %s2123_s16 = spop %2122  ;;  %v2790_v2 = vmul.f32 %v2689_v13, %v2648_v58  ;;  %v2797_v16 = vmul.f32 %v2689_v13, %v2650_v59 }
 0x121   : > { %v2704_v19 = vmul.f32 %v2696_v15, %v2700_v18  ;;  %v2708_v21 = vstv %s2123_s16  ;;  %s2125_s17 = spop %2124  ;;  %v2807_v26 = vmul.f32 %v2696_v15, %v2652_v61  ;;  %v2813_v13 = vmul.f32 %v2696_v15, %v2664_v3 }
 0x122   : > { %v2714_v24 = vmul.f32 %v2708_v21, %v2706_v20  ;;  %s2127_s10 = spop %2126  ;;  %v651_v34 = vstv %s2125_s17  ;;  %v2824_v33 = vmul.f32 %v2708_v21, %v2666_v4 }
 0x123   : > { %s2129_s23 = spop %2128  ;;  %v654_v27 = vstv %s2127_s10  ;;  %v662_v44 = vmul.f32 %v651_v34, %v2636_v42  ;;  %v663_v45 = vmul.f32 %v651_v34, %v2638_v43  ;;  %v664_v46 = vmul.f32 %v651_v34, %v2677_v9 }
 0x124   : > { %s2721_s24 = spop %2130  ;;  %v665_v31 = vmul.f32 %v654_v27, %v2648_v58  ;;  %v2730_v32 = vmul.f32 %v654_v27, %v2650_v59  ;;  %v657_v37 = vstv %s2129_s23  ;;  %v667_v6 = vmul.f32 %v654_v27, %v2687_v12 }
 0x125   : > { %v669_v47 = vmul.f32 %v657_v37, %v2664_v3  ;;  %v670_v48 = vmul.f32 %v657_v37, %v2700_v18  ;;  %v686_v54 = vrot.slane %v662_v44, 1  ;;  %v687_v55 = vrot.slane %v663_v45, 1 }
 0x126   : > { %533 = vrot.lane.b32.xlu0 %v517_v22, %s2406_s27  ;;  %537 = vrot.lane.b32.xlu2 %v519_v23, %s2406_s27  ;;  %v691_v35 = vrot.slane %v665_v31, 1  ;;  %v692_v36 = vrot.slane %v2730_v32, 1  ;;  %v689_v57 = vrot.slane %v664_v46, 1  ;;  %v668_v17 = vmul.f32 %v657_v37, %v2652_v61 }
 0x127   : > { %535 = vrot.lane.b32.xlu1 %v518_v25, %s2406_s27  ;;  %v697_v60 = vrot.slane %v669_v47, 1  ;;  %v699_v62 = vrot.slane %v670_v48, 1  ;;  %v688_v8 = vsel %vm605_vm3, %v686_v54, %v687_v55  ;;  %v660_v27 = vstv %s2721_s24 }
 0x128   : > { %v693_v50 = vsel %vm605_vm3, %v691_v35, %v692_v36  ;;  %v690_v22 = vsel %vm605_vm3, %v687_v55, %v689_v57  ;;  %v611_v31 = vrot.slane %v2790_v2, 1  ;;  %v694_v34 = vrot.slane %v667_v6, 1 }
 0x129   : > { %s2725_s30 = spop %2132  ;;  %v700_v10 = vsel %vm605_vm3, %v697_v60, %v699_v62  ;;  %v612_v35 = vrot.slane %v2797_v16, 1  ;;  %v2830_v37 = vmul.f32 %v2708_v21, %v2670_v5  ;;  %v671_v44 = vmul.f32 %v660_v27, %v2666_v4 }
 0x12a   : > { %s2732_s8 = spop %2134  ;;  %v747_v7 = vstv %s2725_s30  ;;  %v672_v45 = vmul.f32 %v660_v27, %v2670_v5  ;;  %v617_v47 = vrot.slane %v2813_v13, 1  ;;  %v619_v48 = vrot.slane %v2704_v19, 1 }
 0x12b   : > { %s2737_s13 = spop %2136  ;;  %v750_v46 = vstv %s2732_s8  ;;  %v673_v21 = vmul.f32 %v660_v27, %v2706_v20  ;;  %v695_v62 = vsel %vm605_vm3, %v692_v36, %v694_v34  ;;  %v622_v6 = vrot.slane %v2830_v37, 1 }
 0x12c   : > { %v2852_v19 = vmul.f32 %v750_v46, %v2648_v58  ;;  %v702_v27 = vrot.slane %v672_v45, 1  ;;  %v2858_v32 = vmul.f32 %v750_v46, %v2650_v59  ;;  %v763_v36 = vmul.f32 %v750_v46, %v2687_v12 }
 0x12d   : > { %v753_v34 = vstv %s2737_s13 }
 0x12e   : > { %539 = vrot.lane.b32.xlu0 %v520_v28, %s2406_s27  ;;  %543 = vrot.lane.b32.xlu2 %v522_v29, %s2406_s27  ;;  %v758_v28 = vmul.f32 %v747_v7, %v2636_v42  ;;  %v2818_v29 = vmul.f32 %v747_v7, %v2638_v43  ;;  %v787_v45 = vrot.slane %v2852_v19, 1 }
 0x12f   : > { %541 = vrot.lane.b32.xlu1 %v521_v30, %s2406_s27 }
 0x130   : > { %v4064_v54 = vrot.slane %v2818_v29, 1 }
 0x131   : > { %s2740_s5 = spop %2138 }
 0x132   : > { %s2141_s6 = spop %2140  ;;  %v2842_v57 = vstv %s2740_s5 }
 0x133   : > { %s2143_s12 = spop %2142  ;;  %v2744_v39 = vstv %s2141_s6 }
 0x134   : > { %v2746_v40 = vstv %s2143_s12  ;;  %s2145_s19 = spop %2144  ;;  %v2756_v49 = vmul.f32 %v2744_v39, %v2677_v9  ;;  %v850_v37 = vmul.f32 %v2744_v39, %v2636_v42 }
 0x135   : > { %s2147_s11 = spop %2146  ;;  %v2764_v51 = vmul.f32 %v2746_v40, %v2687_v12  ;;  %v2766_v52 = vstv %s2145_s19  ;;  %v853_v46 = vmul.f32 %v2746_v40, %v2648_v58 }
 0x136   : > { %545 = vrot.lane.b32.xlu0 %v523_v38, %s2406_s27  ;;  %v2768_v53 = vstv %s2147_s11  ;;  %710 = vrot.lane.b32.xlu2 %v693_v50, %s2405_s15  ;;  %v2774_v56 = vmul.f32 %v2766_v52, %v2700_v18  ;;  %v696_v38 = vrot.slane %v668_v17, 1  ;;  %v782_v50 = vrot.slane %v758_v28, 1  ;;  %s2149_s14 = spop %2148 }
 0x137   : > { %547 = vrot.lane.b32.xlu1 %v524_v41, %s2406_s27  ;;  %v2778_v63 = vmul.f32 %v2768_v53, %v2706_v20  ;;  %v704_v28 = vrot.slane %v673_v21, 1  ;;  %v788_v21 = vrot.slane %v2858_v32, 1  ;;  %v878_v32 = vrot.slane %v2756_v49, 2  ;;  %s2151_s16 = spop %2150 }
 0x138   : > { %v698_v17 = vsel %vm605_vm3, %v696_v38, %v697_v60  ;;  %v2868_v60 = vmul.f32 %v2842_v57, %v2670_v5  ;;  %v851_v38 = vmul.f32 %v2744_v39, %v2638_v43  ;;  %v857_v39 = vmul.f32 %v2766_v52, %v2664_v3 }
 0x139   : > { %v880_v41 = vrot.slane %v853_v46, 2  ;;  %v705_v25 = vsel %vm605_vm3, %v702_v27, %v704_v28  ;;  %v893_v30 = vrot.slane %v2778_v63, 2  ;;  %v2916_v63 = vsel %vm605_vm3, %v617_v47, %v619_v48  ;;  %s2153_s17 = spop %2152 }
 0x13a   : > { %v876_v55 = vrot.slane %v851_v38, 2  ;;  %v920_v38 = vstv %s2149_s14  ;;  %s2155_s10 = spop %2154 }
 0x13e   : > { %706 = vrot.lane.b32.xlu0 %v688_v8, %s2405_s15  ;;  %716 = vrot.lane.b32.xlu2 %v700_v10, %s2405_s15  ;;  %v2849_v8 = vmul.f32 %v747_v7, %v2677_v9  ;;  %v701_v10 = vrot.slane %v671_v44, 1  ;;  %v2864_v7 = vmul.f32 %v2842_v57, %v2666_v4 }
 0x13f   : > { %708 = vrot.lane.b32.xlu1 %v690_v22, %s2405_s15  ;;  %v624_v22 = vrot.slane %v2714_v24, 1  ;;  %v784_v24 = vsel %vm605_vm3, %v782_v50, %v4064_v54  ;;  %v854_v50 = vmul.f32 %v2746_v40, %v2650_v59  ;;  %v859_v54 = vmul.f32 %v2768_v53, %v2666_v4 }
 0x140   : > { %v785_v44 = vrot.slane %v2849_v8, 1  ;;  %v790_v8 = vrot.slane %v763_v36, 1  ;;  %v797_v19 = vrot.slane %v2864_v7, 1  ;;  %v875_v40 = vrot.slane %v850_v37, 2 }
 0x141   : > { %v703_v15 = vsel %vm605_vm3, %v701_v10, %v702_v27  ;;  %v881_v23 = vrot.slane %v854_v50, 2  ;;  %v886_v7 = vrot.slane %v857_v39, 2  ;;  %v890_v49 = vrot.slane %v859_v54, 2 }
 0x142   : > { %v791_v10 = vsel %vm605_vm3, %v788_v21, %v790_v8  ;;  %v4110_v27 = vrot.slane %v2782_v0, 1  ;;  %v2947_v0 = vsel %vm605_vm3, %v622_v6, %v624_v22  ;;  %v764_v22 = vmul.f32 %v753_v34, %v2652_v61 }
 0x143   : > { %v766_v50 = vmul.f32 %v753_v34, %v2700_v18  ;;  %v4115_v39 = vrot.slane %v2868_v60, 1 }
 0x144   : > { %v792_v8 = vrot.slane %v764_v22, 1 }
 0x146   : > { %712 = vrot.lane.b32.xlu0 %v695_v62, %s2405_s15  ;;  %802 = vrot.lane.b32.xlu2 %v784_v24, %s2406_s27  ;;  %v856_v62 = vmul.f32 %v2766_v52, %v2652_v61  ;;  %v883_v52 = vrot.slane %v2764_v51, 2  ;;  %v2911_v51 = vsel %vm605_vm3, %v611_v31, %v612_v35  ;;  %v4111_v31 = vrot.slane %v2807_v26, 1 }
 0x147   : > { %714 = vrot.lane.b32.xlu1 %v698_v17, %s2405_s15  ;;  %v860_v17 = vmul.f32 %v2768_v53, %v2670_v5  ;;  %v888_v53 = vrot.slane %v2774_v56, 2  ;;  %v4107_v56 = vrot.slane %v2685_v11, 1  ;;  %v4112_v11 = vrot.slane %v2694_v14, 1 }
 0x148   : > { %v885_v36 = vrot.slane %v856_v62, 2  ;;  %v2937_v48 = vsel %vm605_vm3, %v4111_v31, %v617_v47  ;;  %v2955_v26 = vsel %vm874_vm4, %v876_v55, %v878_v32  ;;  %v2961_v14 = vsel %vm874_vm4, %v875_v40, %v876_v55 }
 0x149   : > { %v891_v24 = vrot.slane %v860_v17, 2  ;;  %v2944_v28 = vsel %vm605_vm3, %v612_v35, %v4112_v11  ;;  %v2967_v35 = vsel %vm874_vm4, %v881_v23, %v883_v52  ;;  %v765_v55 = vmul.f32 %v753_v34, %v2664_v3 }
 0x14a   : > { %v2958_v13 = vsel %vm874_vm4, %v885_v36, %v886_v7  ;;  %v933_v62 = vmul.f32 %v920_v38, %v2677_v9  ;;  %v799_v17 = vsel %vm605_vm3, %v797_v19, %v4115_v39  ;;  %v795_v34 = vrot.slane %v766_v50, 1 }
 0x14b   : > { %v2964_v16 = vsel %vm874_vm4, %v891_v24, %v893_v30  ;;  %v2973_v47 = vsel %vm874_vm4, %v890_v49, %v891_v24  ;;  %v4114_v30 = vrot.slane %v2818_v29, 1  ;;  %v793_v29 = vrot.slane %v765_v55, 1 }
 0x14c   : > { %v926_v24 = vstv %s2153_s17  ;;  %v931_v32 = vmul.f32 %v920_v38, %v2636_v42  ;;  %v923_v49 = vstv %s2151_s16  ;;  %v4116_v11 = vmov %v4115_v39 }
 0x14d   : > { %v786_v46 = vsel %vm605_vm3, %v4114_v30, %v785_v44  ;;  %v794_v40 = vsel %vm605_vm3, %v792_v8, %v793_v29  ;;  %v796_v19 = vsel %vm605_vm3, %v793_v29, %v795_v34  ;;  %v937_v52 = vmul.f32 %v926_v24, %v2652_v61 }
 0x14e   : > { %718 = vrot.lane.b32.xlu0 %v703_v15, %s2405_s15  ;;  %808 = vrot.lane.b32.xlu2 %v791_v10, %s2406_s27  ;;  %v3002_v36 = vmul.f32 %v926_v24, %v2664_v3  ;;  %v399_v10 = vstv %s2627_s18  ;;  %v935_v31 = vmul.f32 %v923_v49, %v2650_v59  ;;  %v936_v55 = vmul.f32 %v923_v49, %v2687_v12  ;;  %s2157_s18 = spop %2156 }
 0x14f   : > { %720 = vrot.lane.b32.xlu1 %v705_v25, %s2405_s15  ;;  %v4108_v25 = vrot.slane %v2786_v1, 1  ;;  %v4113_v1 = vrot.slane %v2824_v33, 1  ;;  %v2970_v33 = vsel %vm874_vm4, %v880_v41, %v881_v23  ;;  %v789_v23 = vsel %vm605_vm3, %v787_v45, %v788_v21  ;;  %s2159_s23 = spop %2158 }
 0x150   : > { %v932_v41 = vmul.f32 %v920_v38, %v2638_v43  ;;  %v958_v45 = vrot.slane %v933_v62, 2  ;;  %v769_v21 = vmul.f32 %v2842_v57, %v2706_v20  ;;  %v955_v57 = vrot.slane %v931_v32, 2  ;;  %s2161_s24 = spop %2160 }
 0x151   : > { %v2923_v15 = vsel %vm605_vm3, %v4108_v25, %v4107_v56  ;;  %v4109_v54 = vmov %v4108_v25  ;;  %v2952_v37 = vsel %vm605_vm3, %v4113_v1, %v622_v6  ;;  %v2976_v6 = vsel %vm874_vm4, %v886_v7, %v888_v53 }
 0x152   : > { %v2930_v2 = vsel %vm605_vm3, %v4110_v27, %v4109_v54  ;;  %v956_v44 = vrot.slane %v932_v41, 2  ;;  %v800_v53 = vrot.slane %v769_v21, 1  ;;  %v965_v56 = vrot.slane %v937_v52, 2 }
 0x153   : > { %v966_v25 = vrot.slane %v3002_v36, 2  ;;  %v929_v54 = vstv %s2155_s10  ;;  %v934_v27 = vmul.f32 %v923_v49, %v2648_v58  ;;  %v413_v22 = vmul.f32 %v399_v10, %v2636_v42 }
 0x154   : > { %v959_v7 = vsel %vm874_vm4, %v956_v44, %v958_v45  ;;  %v801_v1 = vsel %vm605_vm3, %v4116_v11, %v800_v53  ;;  %v957_v38 = vsel %vm874_vm4, %v955_v57, %v956_v44  ;;  %v414_v30 = vmul.f32 %v399_v10, %v2638_v43 }
 0x155   : > { %v942_v60 = vmul.f32 %v929_v54, %v2706_v20  ;;  %v967_v41 = vsel %vm874_vm4, %v965_v56, %v966_v25  ;;  %v961_v8 = vrot.slane %v935_v31, 2  ;;  %v963_v29 = vrot.slane %v936_v55, 2 }
 0x156   : > { %804 = vrot.lane.b32.xlu0 %v786_v46, %s2406_s27  ;;  %814 = vrot.lane.b32.xlu2 %v799_v17, %s2406_s27  ;;  %v941_v46 = vmul.f32 %v929_v54, %v2670_v5  ;;  %v960_v17 = vrot.slane %v934_v27, 2  ;;  %v403_v34 = vstv %s2629_s21  ;;  %v939_v21 = vmul.f32 %v926_v24, %v2700_v18 }
 0x157   : > { %806 = vrot.lane.b32.xlu1 %v789_v23, %s2406_s27  ;;  %v973_v45 = vrot.slane %v942_v60, 2  ;;  %v964_v52 = vsel %vm874_vm4, %v961_v8, %v963_v29  ;;  %v415_v36 = vmul.f32 %v403_v34, %v2648_v58  ;;  %v2407_v27 = vmov 0  }
 0x158   : > { %v971_v44 = vrot.slane %v941_v46, 2  ;;  %v962_v32 = vsel %vm874_vm4, %v960_v17, %v961_v8  ;;  %v968_v49 = vrot.slane %v939_v21, 2  ;;  %2243 = vset.pattern.permute.xlu1 %v2407_v27  ;;  %2242 = vset.pattern.permute.xlu0 %v2407_v27  ;;  %v407_v31 = vstv %s2632_s22 }
 0x159   : > { %2241 = vset.pattern.permute.xlu2 %v2407_v27  ;;  %v1022_v55 = vstv %s2161_s24 }
 0x15a   : > { %v974_v24 = vsel %vm874_vm4, %v971_v44, %v973_v45  ;;  %v1035_v60 = vmul.f32 %v1022_v55, %v2700_v18  ;;  %v1033_v21 = vmul.f32 %v1022_v55, %v2652_v61 }
 0x15c   : > { %v1064_v29 = vrot.slane %v1035_v60, 2 }
 0x15e   : > { %810 = vrot.lane.b32.xlu0 %v794_v40, %s2406_s27  ;;  %977 = vrot.lane.b32.xlu2 %v959_v7, %s2405_s15  ;;  %v1019_v40 = vstv %s2159_s23 }
 0x15f   : > { %812 = vrot.lane.b32.xlu1 %v796_v19, %s2406_s27  ;;  %v940_v19 = vmul.f32 %v929_v54, %v2666_v4  ;;  %v1030_v7 = vmul.f32 %v1019_v40, %v2648_v58  ;;  %v1031_v53 = vmul.f32 %v1019_v40, %v2650_v59  ;;  %v1016_v54 = vstv %s2157_s18 }
 0x160   : > { %v1027_v58 = vmul.f32 %v1016_v54, %v2636_v42 }
 0x161   : > { %v970_v56 = vrot.slane %v940_v19, 2  ;;  %v1056_v11 = vrot.slane %v1030_v7, 2 }
 0x163   : > { %v972_v46 = vsel %vm874_vm4, %v970_v56, %v971_v44  ;;  %v1032_v44 = vmul.f32 %v1019_v40, %v2687_v12  ;;  %v1061_v12 = vrot.slane %v1033_v21, 2 }
 0x165   : > { %v1059_v19 = vrot.slane %v1032_v44, 2 }
 0x166   : > { %816 = vrot.lane.b32.xlu0 %v801_v1, %s2406_s27  ;;  %983 = vrot.lane.b32.xlu2 %v967_v41, %s2405_s15  ;;  %v1057_v1 = vrot.slane %v1031_v53, 2  ;;  %v1051_v41 = vrot.slane %v1027_v58, 2 }
 0x167   : > { %975 = vrot.lane.b32.xlu1 %v957_v38, %s2405_s15  ;;  %v468_v50 = vpop.permute.xlu1 %467  ;;  %v466_v23 = vpop.permute.xlu0 %465  ;;  %v969_v38 = vsel %vm874_vm4, %v966_v25, %v968_v49 }
 0x168   : > { %v3022_v62 = vadd.f32 %v468_v50, %v414_v30  ;;  %v3024_v39 = vadd.f32 %v466_v23, %v413_v22  ;;  %v1028_v22 = vmul.f32 %v1016_v54, %v2638_v43  ;;  %v1029_v30 = vmul.f32 %v1016_v54, %v2677_v9 }
 0x169   : > { %v418_v50 = vmul.f32 %v407_v31, %v2664_v3  ;;  %v1034_v23 = vmul.f32 %v1022_v55, %v2664_v3  ;;  %v1058_v42 = vsel %vm874_vm4, %v1056_v11, %v1057_v1 }
 0x16a   : > { %v1052_v17 = vrot.slane %v1028_v22, 2  ;;  %v1054_v25 = vrot.slane %v1029_v30, 2 }
 0x16b   : > { %v1062_v8 = vrot.slane %v1034_v23, 2 }
 0x16c   : > { %v1053_v45 = vsel %vm874_vm4, %v1051_v41, %v1052_v17  ;;  %v1055_v3 = vsel %vm874_vm4, %v1052_v17, %v1054_v25  ;;  %v2245_v17 = vld [vmem:[%s4117_s2 + $0x1] ss:$0 sm:$0xff] }
 0x16d   : > { %v1065_v18 = vsel %vm874_vm4, %v1062_v8, %v1064_v29  ;;  %v1063_v56 = vsel %vm874_vm4, %v1061_v12, %v1062_v8 }
 0x16e   : > { %979 = vrot.lane.b32.xlu0 %v962_v32, %s2405_s15  ;;  %989 = vrot.lane.b32.xlu2 %v974_v24, %s2405_s15  ;;  %v1060_v24 = vsel %vm874_vm4, %v1057_v1, %v1059_v19 }
 0x16f   : > { %981 = vrot.lane.b32.xlu1 %v964_v52, %s2405_s15 }
 0x170   : > { %v470_v57 = vpop.permute.xlu2 %469 }
 0x171   : > { %v491_v10 = vadd.f32 %v470_v57, %v415_v36  ;;  %v2246_v57 = vld [vmem:[%s4117_s2] ss:$0 sm:$0xff] }
 0x176   : > { %985 = vrot.lane.b32.xlu0 %v969_v38, %s2405_s15  ;;  %1075 = vrot.lane.b32.xlu2 %v1058_v42, %s2406_s27 }
 0x177   : > { %987 = vrot.lane.b32.xlu1 %v972_v46, %s2405_s15  ;;  %s2163_s15 = spop %2162  ;;  %v411_v46 = vstv %s2634_s20 }
 0x178   : > { %v476_v43 = vpop.permute.xlu2 %475  ;;  %v1025_v40 = vstv %s2163_s15 }
 0x179   : > { %v494_v9 = vadd.f32 %v476_v43, %v418_v50  ;;  %v1036_v7 = vmul.f32 %v1025_v40, %v2666_v4  ;;  %v1037_v53 = vmul.f32 %v1025_v40, %v2670_v5  ;;  %v1038_v49 = vmul.f32 %v1025_v40, %v2706_v20 }
 0x17b   : > { %v1066_v11 = vrot.slane %v1036_v7, 2  ;;  %v1067_v1 = vrot.slane %v1037_v53, 2  ;;  %v1069_v20 = vrot.slane %v1038_v49, 2 }
 0x17d   : > { %v1068_v50 = vsel %vm874_vm4, %v1066_v11, %v1067_v1 }
 0x17e   : > { %1071 = vrot.lane.b32.xlu0 %v1053_v45, %s2406_s27  ;;  %1081 = vrot.lane.b32.xlu2 %v1065_v18, %s2406_s27 }
 0x17f   : > { %1073 = vrot.lane.b32.xlu1 %v1055_v3, %s2406_s27 }
 0x180   : > { %v538_v32 = vpop.permute.xlu2 %537 }
 0x181   : > { %v559_v52 = vadd.f32 %v538_v32, %v491_v10  ;;  %v417_v10 = vmul.f32 %v407_v31, %v2652_v61  ;;  %v1070_v61 = vsel %vm874_vm4, %v1067_v1, %v1069_v20  ;;  %v420_v31 = vmul.f32 %v411_v46, %v2670_v5 }
 0x183   : > { %v636_v36 = vadd.f32 %v2911_v51, %v559_v52  ;;  %v416_v51 = vmul.f32 %v403_v34, %v2650_v59  ;;  %v2247_v59 = vld [vmem:[%s4117_s2 + $0x3] ss:$0 sm:$0xff]  ;;  %v419_v34 = vmul.f32 %v411_v46, %v2666_v4 }
 0x186   : > { %1077 = vrot.lane.b32.xlu0 %v1060_v24, %s2406_s27  ;;  %1116 = vperm.xlu2 %2241, %v2246_v57  }
 0x187   : > { %1079 = vrot.lane.b32.xlu1 %v1063_v56, %s2406_s27 }
 0x188   : > { %v544_v54 = vpop.permute.xlu2 %543  ;;  %v472_v27 = vpop.permute.xlu0 %471 }
 0x189   : > { %v474_v58 = vpop.permute.xlu1 %473  ;;  %v562_v22 = vadd.f32 %v544_v54, %v494_v9  ;;  %v492_v55 = vadd.f32 %v472_v27, %v416_v51  ;;  %v2244_v9 = vld [vmem:[%s4117_s2 + $0x2] ss:$0 sm:$0xff] }
 0x18a   : > { %v493_v38 = vadd.f32 %v474_v58, %v417_v10 }
 0x18b   : > { %v639_v30 = vadd.f32 %v2916_v63, %v562_v22 }
 0x18e   : > { %1083 = vrot.lane.b32.xlu0 %v1068_v50, %s2406_s27  ;;  %1128 = vperm.xlu2 %2241, %v2247_v59  }
 0x18f   : > { %1085 = vrot.lane.b32.xlu1 %v1070_v61, %s2406_s27  ;;  %s2047_s27 = sshll.u32 %s2471_s28, 6 }
 0x190   : > { %v478_v23 = vpop.permute.xlu0 %477  ;;  %v711_v63 = vpop.permute.xlu2 %710  ;;  %s3111_s12 = scalar_lea.vmem [#allocation2], %s2047_s27 }
 0x191   : > { %v480_v60 = vpop.permute.xlu1 %479  ;;  %v495_v42 = vadd.f32 %v478_v23, %v419_v34  ;;  %v732_v41 = vadd.f32 %v711_v63, %v636_v36 }
 0x192   : > { %v496_v43 = vadd.f32 %v480_v60, %v420_v31 }
 0x196   : > { %1120 = vperm.xlu0 %2242, %v2245_v17  }
 0x197   : > { %1124 = vperm.xlu1 %2243, %v2244_v9  }
 0x198   : > { %v534_v4 = vpop.permute.xlu0 %533  ;;  %v717_v5 = vpop.permute.xlu2 %716 }
 0x199   : > { %v536_v25 = vpop.permute.xlu1 %535  ;;  %v557_v8 = vadd.f32 %v534_v4, %v3024_v39  ;;  %v735_v44 = vadd.f32 %v717_v5, %v639_v30 }
 0x19a   : > { %v558_v29 = vadd.f32 %v536_v25, %v3022_v62 }
 0x19b   : > { %v634_v45 = vadd.f32 %v2930_v2, %v557_v8 }
 0x19c   : > { %v635_v21 = vadd.f32 %v2923_v15, %v558_v29 }
 0x1a0   : > { %v540_v3 = vpop.permute.xlu0 %539  ;;  %v803_v52 = vpop.permute.xlu2 %802 }
 0x1a1   : > { %v542_v18 = vpop.permute.xlu1 %541  ;;  %v560_v32 = vadd.f32 %v540_v3, %v492_v55 }
 0x1a2   : > { %v561_v19 = vadd.f32 %v542_v18, %v493_v38 }
 0x1a3   : > { %v637_v12 = vadd.f32 %v2944_v28, %v560_v32 }
 0x1a4   : > { %v638_v40 = vadd.f32 %v2937_v48, %v561_v19 }
 0x1a8   : > { %v546_v36 = vpop.permute.xlu0 %545  ;;  %v809_v24 = vpop.permute.xlu2 %808 }
 0x1a9   : > { %v548_v7 = vpop.permute.xlu1 %547  ;;  %v563_v53 = vadd.f32 %v546_v36, %v495_v42 }
 0x1aa   : > { %v564_v39 = vadd.f32 %v548_v7, %v496_v43 }
 0x1ab   : > { %v640_v62 = vadd.f32 %v2952_v37, %v563_v53 }
 0x1ac   : > { %v641_v2 = vadd.f32 %v2947_v0, %v564_v39 }
 0x1b0   : > { %v707_v57 = vpop.permute.xlu0 %706  ;;  %v815_v51 = vpop.permute.xlu2 %814 }
 0x1b1   : > { %v709_v15 = vpop.permute.xlu1 %708  ;;  %v730_v49 = vadd.f32 %v707_v57, %v634_v45 }
 0x1b2   : > { %v731_v0 = vadd.f32 %v709_v15, %v635_v21 }
 0x1b3   : > { %v826_v56 = vadd.f32 %v803_v52, %v730_v49 }
 0x1b5   : > { %v903_v28 = vadd.f32 %v2961_v14, %v826_v56 }
 0x1b8   : > { %v713_v10 = vpop.permute.xlu0 %712  ;;  %v978_v1 = vpop.permute.xlu2 %977 }
 0x1b9   : > { %v715_v54 = vpop.permute.xlu1 %714  ;;  %v733_v27 = vadd.f32 %v713_v10, %v637_v12 }
 0x1ba   : > { %v734_v48 = vadd.f32 %v715_v54, %v638_v40 }
 0x1bb   : > { %v829_v11 = vadd.f32 %v809_v24, %v733_v27 }
 0x1bd   : > { %v906_v37 = vadd.f32 %v2967_v35, %v829_v11 }
 0x1c0   : > { %v719_v58 = vpop.permute.xlu0 %718  ;;  %v984_v59 = vpop.permute.xlu2 %983 }
 0x1c1   : > { %v721_v22 = vpop.permute.xlu1 %720  ;;  %v736_v55 = vadd.f32 %v719_v58, %v640_v62 }
 0x1c2   : > { %v737_v17 = vadd.f32 %v721_v22, %v641_v2 }
 0x1c3   : > { %v832_v20 = vadd.f32 %v815_v51, %v736_v55 }
 0x1c5   : > { %v909_v50 = vadd.f32 %v2973_v47, %v832_v20 }
 0x1c8   : > { %v805_v38 = vpop.permute.xlu0 %804  ;;  %v990_v42 = vpop.permute.xlu2 %989 }
 0x1c9   : > { %v807_v30 = vpop.permute.xlu1 %806  ;;  %v827_v46 = vadd.f32 %v805_v38, %v731_v0 }
 0x1ca   : > { %v828_v61 = vadd.f32 %v807_v30, %v732_v41 }
 0x1cb   : > { %v904_v34 = vadd.f32 %v2955_v26, %v827_v46 }
 0x1cc   : > { %v905_v14 = vadd.f32 %v2970_v33, %v828_v61 }
 0x1d0   : > { %v811_v31 = vpop.permute.xlu0 %810  ;;  %v1076_v25 = vpop.permute.xlu2 %1075 }
 0x1d1   : > { %v813_v23 = vpop.permute.xlu1 %812  ;;  %v830_v60 = vadd.f32 %v811_v31, %v734_v48 }
 0x1d2   : > { %v831_v63 = vadd.f32 %v813_v23, %v735_v44  ;;  %v1000_v44 = vadd.f32 %v978_v1, %v904_v34 }
 0x1d3   : > { %v907_v35 = vadd.f32 %v2958_v13, %v830_v60 }
 0x1d4   : > { %v908_v43 = vadd.f32 %v2976_v6, %v831_v63 }
 0x1d5   : > { %v1003_v56 = vadd.f32 %v984_v59, %v907_v35 }
 0x1d8   : > { %v817_v9 = vpop.permute.xlu0 %816  ;;  %v1082_v33 = vpop.permute.xlu2 %1081 }
 0x1d9   : > { %v976_v4 = vpop.permute.xlu1 %975  ;;  %v833_v47 = vadd.f32 %v817_v9, %v737_v17 }
 0x1da   : > { %v999_v45 = vadd.f32 %v976_v4, %v903_v28 }
 0x1db   : > { %v910_v41 = vadd.f32 %v2964_v16, %v833_v47 }
 0x1dd   : > { %v1006_v40 = vadd.f32 %v990_v42, %v910_v41 }
 0x1e0   : > { %v980_v26 = vpop.permute.xlu0 %979  ;;  %v1117_v13 = vpop.permute.xlu2 %1116 }
 0x1e1   : > { %v982_v5 = vpop.permute.xlu1 %981  ;;  %v1001_v24 = vadd.f32 %v980_v26, %v905_v14 }
 0x1e2   : > { %v1002_v49 = vadd.f32 %v982_v5, %v906_v37 }
 0x1e3   : > { %v1097_v51 = vadd.f32 %v1076_v25, %v1001_v24 }
 0x1e8   : > { %v986_v8 = vpop.permute.xlu0 %985  ;;  %v1129_v39 = vpop.permute.xlu2 %1128 }
 0x1e9   : > { %v988_v29 = vpop.permute.xlu1 %987  ;;  %v1004_v57 = vadd.f32 %v986_v8, %v908_v43 }
 0x1ea   : > { %v1005_v12 = vadd.f32 %v988_v29, %v909_v50 }
 0x1eb   : > { %v1100_v27 = vadd.f32 %v1082_v33, %v1004_v57 }
 0x1f0   : > { %v1072_v21 = vpop.permute.xlu0 %1071 }
 0x1f1   : > { %v1074_v3 = vpop.permute.xlu1 %1073  ;;  %v1095_v18 = vadd.f32 %v1072_v21, %v999_v45 }
 0x1f2   : > { %v1096_v6 = vadd.f32 %v1074_v3, %v1000_v44 }
 0x1f3   : > { %v1131_v32 = vadd.f32 %v1117_v13, %v1095_v18 }
 0x1f4   : > { %v1132_v19 = vadd.f32 %v1117_v13, %v1096_v6 }
 0x1f5   : > { %1142 = vst.msk [vmem:[%s3111_s12] sm:$0xff] %vm1141_vm5, %v1131_v32 }
 0x1f6   : > { %1143 = vst.msk [vmem:[%s3111_s12 + $0x8] sm:$0xff] %vm1141_vm5, %v1132_v19 }
 0x1f8   : > { %v1078_v16 = vpop.permute.xlu0 %1077 }
 0x1f9   : > { %v1080_v52 = vpop.permute.xlu1 %1079  ;;  %v1098_v54 = vadd.f32 %v1078_v16, %v1002_v49 }
 0x1fa   : > { %v1099_v10 = vadd.f32 %v1080_v52, %v1003_v56 }
 0x200   : > { %v1084_v36 = vpop.permute.xlu0 %1083 }
 0x201   : > { %v1086_v7 = vpop.permute.xlu1 %1085  ;;  %v1101_v53 = vadd.f32 %v1084_v36, %v1005_v12 }
 0x202   : > { %v1102_v62 = vadd.f32 %v1086_v7, %v1006_v40 }
 0x203   : > { %v1137_v2 = vadd.f32 %v1129_v39, %v1101_v53 }
 0x204   : > { %v1138_v15 = vadd.f32 %v1129_v39, %v1102_v62 }
 0x205   : > { %1148 = vst.msk [vmem:[%s3111_s12 + $0x30] sm:$0xff] %vm1141_vm5, %v1137_v2 }
 0x206   : > { %1149 = vst.msk [vmem:[%s3111_s12 + $0x38] sm:$0xff] %vm1141_vm5, %v1138_v15 }
 0x208   : > { %v1121_v28 = vpop.permute.xlu0 %1120 }
 0x209   : > { %v1125_v48 = vpop.permute.xlu1 %1124  ;;  %v1133_v11 = vadd.f32 %v1121_v28, %v1097_v51  ;;  %v1134_v22 = vadd.f32 %v1121_v28, %v1098_v54 }
 0x20a   : > { %v1135_v1 = vadd.f32 %v1125_v48, %v1099_v10  ;;  %v1136_v58 = vadd.f32 %v1125_v48, %v1100_v27  ;;  %1153 = sbr.rel (%p2048_p5) target bundleno = 1045 (0x415), region = 68 }
 0x20b   : > { %1144 = vst.msk [vmem:[%s3111_s12 + $0x10] sm:$0xff] %vm1141_vm5, %v1133_v11 }
 0x20c   : > { %1146 = vst.msk [vmem:[%s3111_s12 + $0x20] sm:$0xff] %vm1141_vm5, %v1135_v1 }
 0x20d   : > { %1147 = vst.msk [vmem:[%s3111_s12 + $0x28] sm:$0xff] %vm1141_vm5, %v1136_v58 }
 0x20e   : > { %1145 = vst.msk [vmem:[%s3111_s12 + $0x18] sm:$0xff] %vm1141_vm5, %v1134_v22 }
 0x20f   : > { %s4122_s4 = sld [smem:[#allocation73_spill]] }
 0x210   : > { %s4123_s3 = sld [smem:[#allocation72_spill]] }
 0x211   : > { %s3314_s5 = sld [smem:[#allocation8]] }
 0x212   : > { %s3316_s6 = sld [smem:[#allocation8 + $0x80]] }
 0x213   : > { %s3318_s27 = sld [smem:[#allocation9]] }
 0x214   : > { %s3320_s12 = sld [smem:[#allocation9 + $0x1]] }
 0x215   : > { %v3130_v55 = vld [vmem:[#allocation2 + $0x40] sm:$0xff]  ;;  %v3132_v37 = vld [vmem:[#allocation2 + $0x10] sm:$0xff]  ;;  %v3142_v46 = vld [vmem:[#allocation2 + $0x48] sm:$0xff]  ;;  %s3322_s19 = sld [smem:[#allocation9 + $0x2]] }
 0x216   : > { %v3134_v20 = vld [vmem:[#allocation2] sm:$0xff]  ;;  %v1194_v0 = vsel %vm1141_vm5, %v3130_v55, 0.0  ;;  %v1176_v38 = vsel %vm1141_vm5, %v3132_v37, 0.0  ;;  %v3144_v50 = vld [vmem:[#allocation2 + $0x18] sm:$0xff]  ;;  %v3146_v59 = vld [vmem:[#allocation2 + $0x8] sm:$0xff]  ;;  %v1197_v61 = vsel %vm1141_vm5, %v3142_v46, 0.0 }
 0x217   : > { %v1170_v30 = vsel %vm1141_vm5, %v3134_v20, 0.0  ;;  %1195 = vadd.xlane.f32.xlu1 %v1194_v0  ;;  %1177 = vadd.xlane.f32.xlu2 %v1176_v38  ;;  %v1179_v34 = vsel %vm1141_vm5, %v3144_v50, 0.0  ;;  %v1173_v14 = vsel %vm1141_vm5, %v3146_v59, 0.0  ;;  %v3154_v31 = vld [vmem:[#allocation2 + $0x58] sm:$0xff]  ;;  %v3156_v23 = vld [vmem:[#allocation2 + $0x20] sm:$0xff]  ;;  %v3158_v60 = vld [vmem:[#allocation2 + $0x50] sm:$0xff] }
 0x218   : > { %1171 = vadd.xlane.f32.xlu0 %v1170_v30  ;;  %v1203_v63 = vsel %vm1141_vm5, %v3154_v31, 0.0  ;;  %v1182_v35 = vsel %vm1141_vm5, %v3156_v23, 0.0  ;;  %v1200_v42 = vsel %vm1141_vm5, %v3158_v60, 0.0  ;;  %v3166_v43 = vld [vmem:[#allocation2 + $0x60] sm:$0xff]  ;;  %v3168_v17 = vld [vmem:[#allocation2 + $0x68] sm:$0xff]  ;;  %v3178_v25 = vld [vmem:[#allocation2 + $0x38] sm:$0xff] }
 0x219   : > { %v3170_v9 = vld [vmem:[#allocation2 + $0x28] sm:$0xff]  ;;  %v1206_v4 = vsel %vm1141_vm5, %v3166_v43, 0.0  ;;  %v1209_v47 = vsel %vm1141_vm5, %v3168_v17, 0.0  ;;  %v3180_v26 = vld [vmem:[#allocation2 + $0x70] sm:$0xff]  ;;  %v1191_v33 = vsel %vm1141_vm5, %v3178_v25, 0.0  ;;  %v3190_v45 = vld [vmem:[#allocation2 + $0x78] sm:$0xff] }
 0x21a   : > { %v1185_v41 = vsel %vm1141_vm5, %v3170_v9, 0.0  ;;  %v3182_v5 = vld [vmem:[#allocation2 + $0x30] sm:$0xff]  ;;  %v1212_v8 = vsel %vm1141_vm5, %v3180_v26, 0.0  ;;  %v1215_v44 = vsel %vm1141_vm5, %v3190_v45, 0.0  ;;  %s3324_s11 = sld [smem:[#allocation8 + $0x100]] }
 0x21b   : > { %v1188_v29 = vsel %vm1141_vm5, %v3182_v5, 0.0  ;;  %s3326_s14 = sld [smem:[#allocation9 + $0x3]] }
 0x21c   : > { %s3328_s16 = sld [smem:[#allocation8 + $0x180]] }
 0x21d   : > { %s3330_s17 = sld [smem:[#allocation9 + $0x4]] }
 0x21e   : > { %s3332_s10 = sld [smem:[#allocation8 + $0x200]] }
 0x21f   : > { %1198 = vadd.xlane.f32.xlu1 %v1197_v61  ;;  %1180 = vadd.xlane.f32.xlu2 %v1179_v34  ;;  %s3334_s18 = sld [smem:[#allocation9 + $0x5]] }
 0x220   : > { %1174 = vadd.xlane.f32.xlu0 %v1173_v14  ;;  %s3336_s23 = sld [smem:[#allocation8 + $0x280]] }
 0x221   : > { %s3338_s24 = sld [smem:[#allocation9 + $0x6]] }
 0x222   : > { %s3340_s15 = sld [smem:[#allocation8 + $0x300]] }
 0x223   : > { %s3342_s22 = sld [smem:[#allocation9 + $0x7]] }
 0x224   : > { %s3344_s30 = sld [smem:[#allocation8 + $0x380]] }
 0x225   : > { %s3346_s8 = sld [smem:[#allocation8 + $0x2]] }
 0x226   : > { %s3348_s21 = sld [smem:[#allocation8 + $0x82]] }
 0x227   : > { %1204 = vadd.xlane.f32.xlu1 %v1203_v63  ;;  %1183 = vadd.xlane.f32.xlu2 %v1182_v35  ;;  %s3350_s20 = sld [smem:[#allocation8 + $0x102]] }
 0x228   : > { %1201 = vadd.xlane.f32.xlu0 %v1200_v42  ;;  %s3352_s13 = sld [smem:[#allocation8 + $0x182]] }
 0x229   : > { %s3354_s0 = sld [smem:[#allocation8 + $0x202]] }
 0x22a   : > { %s3356_s1 = sld [smem:[#allocation8 + $0x282]] }
 0x22b   : > { %s3358_s2 = sld [smem:[#allocation8 + $0x302]] }
 0x22c   : > { %s3364_s9 = sld [smem:[#allocation8 + $0x81]] }
 0x22d   : > { %s3366_s26 = sld [smem:[#allocation8 + $0x101]] }
 0x22e   : > { %s3368_s25 = sld [smem:[#allocation8 + $0x181]] }
 0x22f   : > { %1207 = vadd.xlane.f32.xlu1 %v1206_v4  ;;  %1210 = vadd.xlane.f32.xlu2 %v1209_v47  ;;  %s3372_s29 = sld [smem:[#allocation8 + $0x201]] }
 0x230   : > { %1186 = vadd.xlane.f32.xlu0 %v1185_v41  ;;  %s3378_s7 = sld [smem:[#allocation8 + $0x281]] }
 0x231   : > { %s3388_s28 = sld [smem:[#allocation8 + $0x301]] }
 0x237   : > { %1192 = vadd.xlane.f32.xlu1 %v1191_v33  ;;  %1213 = vadd.xlane.f32.xlu2 %v1212_v8 }
 0x238   : > { %1189 = vadd.xlane.f32.xlu0 %v1188_v29 }
 0x240   : > { %1216 = vadd.xlane.f32.xlu0 %v1215_v44 }
 0x28a   : > { %v1196_v21 = vpop.xlane.xlu1 %1195  ;;  %v1178_v13 = vpop.xlane.xlu2 %1177 }
 0x28b   : > { %v1172_v3 = vpop.xlane.xlu0 %1171 }
 0x292   : > { %v1199_v18 = vpop.xlane.xlu1 %1198  ;;  %v1181_v6 = vpop.xlane.xlu2 %1180 }
 0x293   : > { %v1246_v32 = vadd.f32 %v1199_v18, %v1196_v21  ;;  %v1225_v19 = vadd.f32 %v1181_v6, %v1178_v13  ;;  %v1175_v16 = vpop.xlane.xlu0 %1174 }
 0x294   : > { %v1218_v52 = vadd.f32 %v1175_v16, %v1172_v3 }
 0x295   : > { %v1247_v12 = vrot.slane %v1246_v32, 4  ;;  %v1226_v40 = vrot.slane %v1225_v19, 4 }
 0x296   : > { %v1219_v36 = vrot.slane %v1218_v52, 4 }
 0x297   : > { %v1248_v7 = vadd.f32 %v1247_v12, %v1246_v32  ;;  %v1227_v53 = vadd.f32 %v1226_v40, %v1225_v19 }
 0x298   : > { %v1220_v39 = vadd.f32 %v1219_v36, %v1218_v52 }
 0x299   : > { %v1249_v62 = vrot.slane %v1248_v7, 2  ;;  %v1228_v49 = vrot.slane %v1227_v53, 2 }
 0x29a   : > { %v1221_v24 = vrot.slane %v1220_v39, 2  ;;  %v1205_v2 = vpop.xlane.xlu1 %1204  ;;  %v1184_v57 = vpop.xlane.xlu2 %1183 }
 0x29b   : > { %v1250_v15 = vadd.f32 %v1249_v62, %v1248_v7  ;;  %v1202_v56 = vpop.xlane.xlu0 %1201  ;;  %v1229_v11 = vadd.f32 %v1228_v49, %v1227_v53 }
 0x29c   : > { %v1222_v51 = vadd.f32 %v1221_v24, %v1220_v39  ;;  %v1253_v10 = vadd.f32 %v1205_v2, %v1202_v56 }
 0x29d   : > { %v1251_v54 = vrot.slane %v1250_v15, 1  ;;  %v1230_v61 = vrot.slane %v1229_v11, 1 }
 0x29e   : > { %v1223_v27 = vrot.slane %v1222_v51, 1  ;;  %v1254_v28 = vrot.slane %v1253_v10, 4 }
 0x29f   : > { %v1252_v48 = vadd.f32 %v1251_v54, %v1250_v15  ;;  %v1231_v29 = vadd.f32 %v1230_v61, %v1229_v11 }
 0x2a0   : > { %v1224_v1 = vadd.f32 %v1223_v27, %v1222_v51  ;;  %v1255_v58 = vadd.f32 %v1254_v28, %v1253_v10 }
 0x2a2   : > { %v1274_v22 = vadd.f32 %v1252_v48, %v1224_v1  ;;  %v1256_v0 = vrot.slane %v1255_v58, 2  ;;  %v1208_v38 = vpop.xlane.xlu1 %1207  ;;  %v1211_v30 = vpop.xlane.xlu2 %1210 }
 0x2a3   : > { %v1260_v34 = vadd.f32 %v1211_v30, %v1208_v38  ;;  %v1187_v14 = vpop.xlane.xlu0 %1186 }
 0x2a4   : > { %v1278_v63 = vmul.f32 0.001953125, %v1274_v22  ;;  %v1257_v35 = vadd.f32 %v1256_v0, %v1255_v58  ;;  %v1232_v42 = vadd.f32 %v1187_v14, %v1184_v57 }
 0x2a5   : > { %v1261_v4 = vrot.slane %v1260_v34, 4 }
 0x2a6   : > { %v1258_v47 = vrot.slane %v1257_v35, 1  ;;  %v1233_v41 = vrot.slane %v1232_v42, 4  ;;  %v3195_v33 = vsub.f32 %v3130_v55, %v1278_v63  ;;  %v3198_v8 = vsub.f32 %v3146_v59, %v1278_v63 }
 0x2a7   : > { %v1262_v44 = vadd.f32 %v1261_v4, %v1260_v34  ;;  %v3201_v21 = vsub.f32 %v3134_v20, %v1278_v63  ;;  %v3213_v7 = vsub.f32 %v3142_v46, %v1278_v63 }
 0x2a8   : > { %v1259_v13 = vadd.f32 %v1258_v47, %v1257_v35  ;;  %v1234_v3 = vadd.f32 %v1233_v41, %v1232_v42  ;;  %v1306_v18 = vmul.f32 %v3195_v33, %v3195_v33  ;;  %v1299_v6 = vmul.f32 %v3198_v8, %v3198_v8 }
 0x2a9   : > { %v1263_v32 = vrot.slane %v1262_v44, 2  ;;  %v1298_v55 = vmul.f32 %v3201_v21, %v3201_v21  ;;  %v1307_v51 = vmul.f32 %v3213_v7, %v3213_v7 }
 0x2aa   : > { %v1275_v19 = vadd.f32 %v1259_v13, %v1231_v29  ;;  %v1235_v59 = vrot.slane %v1234_v3, 2  ;;  %v1193_v16 = vpop.xlane.xlu1 %1192  ;;  %v1338_v52 = vsel %vm1141_vm5, %v1306_v18, 0.0  ;;  %v1317_v20 = vsel %vm1141_vm5, %v1299_v6, 0.0  ;;  %v1214_v28 = vpop.xlane.xlu2 %1213 }
 0x2ab   : > { %v1264_v12 = vadd.f32 %v1263_v32, %v1262_v44  ;;  %1339 = vadd.xlane.f32.xlu0 %v1338_v52  ;;  %1318 = vadd.xlane.f32.xlu2 %v1317_v20  ;;  %v1314_v40 = vsel %vm1141_vm5, %v1298_v55, 0.0  ;;  %v1190_v36 = vpop.xlane.xlu0 %1189  ;;  %v1341_v1 = vsel %vm1141_vm5, %v1307_v51, 0.0 }
 0x2ac   : > { %v1279_v53 = vmul.f32 0.001953125, %v1275_v19  ;;  %v1236_v39 = vadd.f32 %v1235_v59, %v1234_v3  ;;  %1315 = vadd.xlane.f32.xlu1 %v1314_v40  ;;  %v1239_v62 = vadd.f32 %v1193_v16, %v1190_v36 }
 0x2ad   : > { %v1265_v24 = vrot.slane %v1264_v12, 1 }
 0x2ae   : > { %v1237_v2 = vrot.slane %v1236_v39, 1  ;;  %v1240_v57 = vrot.slane %v1239_v62, 4  ;;  %v3216_v15 = vsub.f32 %v3144_v50, %v1279_v53  ;;  %v3219_v49 = vsub.f32 %v3132_v37, %v1279_v53 }
 0x2af   : > { %v1266_v56 = vadd.f32 %v1265_v24, %v1264_v12  ;;  %v3228_v48 = vsub.f32 %v3154_v31, %v1279_v53  ;;  %v3234_v22 = vsub.f32 %v3158_v60, %v1279_v53 }
 0x2b0   : > { %v1238_v10 = vadd.f32 %v1237_v2, %v1236_v39  ;;  %v1241_v46 = vadd.f32 %v1240_v57, %v1239_v62  ;;  %v1301_v54 = vmul.f32 %v3216_v15, %v3216_v15  ;;  %v1300_v27 = vmul.f32 %v3219_v49, %v3219_v49  ;;  %v2251_v57 = vld [vmem:[%s4122_s4] ss:$0 sm:$0xff] }
 0x2b1   : > { %v1309_v31 = vmul.f32 %v3228_v48, %v3228_v48  ;;  %v1308_v14 = vmul.f32 %v3234_v22, %v3234_v22 }
 0x2b2   : > { %v1276_v50 = vadd.f32 %v1266_v56, %v1238_v10  ;;  %v1323_v37 = vsel %vm1141_vm5, %v1301_v54, 0.0  ;;  %v1320_v11 = vsel %vm1141_vm5, %v1300_v27, 0.0  ;;  %v1242_v38 = vrot.slane %v1241_v46, 2 }
 0x2b3   : > { %1324 = vadd.xlane.f32.xlu0 %v1323_v37  ;;  %1321 = vadd.xlane.f32.xlu2 %v1320_v11  ;;  %v1217_v58 = vpop.xlane.xlu0 %1216  ;;  %v1347_v42 = vsel %vm1141_vm5, %v1309_v31, 0.0  ;;  %v2408_v56 = vmov 0  }
 0x2b4   : > { %v1280_v0 = vmul.f32 0.001953125, %v1276_v50  ;;  %1342 = vadd.xlane.f32.xlu1 %v1341_v1  ;;  %v1267_v30 = vadd.f32 %v1217_v58, %v1214_v28  ;;  %v1243_v63 = vadd.f32 %v1242_v38, %v1241_v46  ;;  %2248 = vset.pattern.permute.xlu2 %v2408_v56 }
 0x2b5   : > { %2250 = vset.pattern.permute.xlu1 %v2408_v56  ;;  %2249 = vset.pattern.permute.xlu0 %v2408_v56 }
 0x2b6   : > { %v1268_v61 = vrot.slane %v1267_v30, 4  ;;  %v3239_v34 = vsub.f32 %v3156_v23, %v1280_v0  ;;  %v3248_v41 = vsub.f32 %v3166_v43, %v1280_v0  ;;  %v3251_v29 = vsub.f32 %v3168_v17, %v1280_v0 }
 0x2b7   : > { %v1344_v23 = vsel %vm1141_vm5, %v1308_v14, 0.0  ;;  %v3255_v44 = vsub.f32 %v3170_v9, %v1280_v0  ;;  %v1244_v13 = vrot.slane %v1243_v63, 1 }
 0x2b8   : > { %v1269_v35 = vadd.f32 %v1268_v61, %v1267_v30  ;;  %v1302_v60 = vmul.f32 %v3239_v34, %v3239_v34  ;;  %v1310_v6 = vmul.f32 %v3248_v41, %v3248_v41  ;;  %v1311_v43 = vmul.f32 %v3251_v29, %v3251_v29 }
 0x2b9   : > { %v1303_v17 = vmul.f32 %v3255_v44, %v3255_v44  ;;  %v1245_v32 = vadd.f32 %v1244_v13, %v1243_v63 }
 0x2ba   : > { %v1270_v4 = vrot.slane %v1269_v35, 2  ;;  %v1326_v47 = vsel %vm1141_vm5, %v1302_v60, 0.0  ;;  %v1350_v59 = vsel %vm1141_vm5, %v1310_v6, 0.0  ;;  %v1353_v9 = vsel %vm1141_vm5, %v1311_v43, 0.0 }
 0x2bb   : > { %1348 = vadd.xlane.f32.xlu2 %v1347_v42  ;;  %1327 = vadd.xlane.f32.xlu0 %v1326_v47  ;;  %v1329_v16 = vsel %vm1141_vm5, %v1303_v17, 0.0 }
 0x2bc   : > { %v1271_v3 = vadd.f32 %v1270_v4, %v1269_v35  ;;  %1345 = vadd.xlane.f32.xlu1 %v1344_v23 }
 0x2be   : > { %v1272_v18 = vrot.slane %v1271_v3, 1 }
 0x2c0   : > { %v1273_v55 = vadd.f32 %v1272_v18, %v1271_v3 }
 0x2c2   : > { %v1277_v19 = vadd.f32 %v1273_v55, %v1245_v32 }
 0x2c3   : > { %1351 = vadd.xlane.f32.xlu2 %v1350_v59  ;;  %1354 = vadd.xlane.f32.xlu0 %v1353_v9 }
 0x2c4   : > { %v1281_v52 = vmul.f32 0.001953125, %v1277_v19  ;;  %1330 = vadd.xlane.f32.xlu1 %v1329_v16 }
 0x2c6   : > { %v3267_v20 = vsub.f32 %v3180_v26, %v1281_v52  ;;  %v3270_v12 = vsub.f32 %v3178_v25, %v1281_v52  ;;  %v3273_v40 = vsub.f32 %v3182_v5, %v1281_v52  ;;  %v3285_v25 = vsub.f32 %v3190_v45, %v1281_v52 }
 0x2c8   : > { %4118 = vst [vmem:[#allocation21_spill] sm:$0xff] %v3267_v20  ;;  %v1312_v36 = vmul.f32 %v3267_v20, %v3267_v20  ;;  %v1305_v53 = vmul.f32 %v3270_v12, %v3270_v12  ;;  %v1304_v39 = vmul.f32 %v3273_v40, %v3273_v40  ;;  %v1313_v5 = vmul.f32 %v3285_v25, %v3285_v25 }
 0x2c9   : > { %4119 = vst [vmem:[#allocation22_spill] sm:$0xff] %v3270_v12 }
 0x2ca   : > { %4120 = vst [vmem:[#allocation23_spill] sm:$0xff] %v3273_v40  ;;  %v1356_v62 = vsel %vm1141_vm5, %v1312_v36, 0.0  ;;  %v1335_v26 = vsel %vm1141_vm5, %v1305_v53, 0.0  ;;  %v1332_v24 = vsel %vm1141_vm5, %v1304_v39, 0.0  ;;  %v1359_v2 = vsel %vm1141_vm5, %v1313_v5, 0.0 }
 0x2cb   : > { %1357 = vadd.xlane.f32.xlu0 %v1356_v62  ;;  %1336 = vadd.xlane.f32.xlu2 %v1335_v26  ;;  %4121 = vst [vmem:[#allocation24_spill] sm:$0xff] %v3285_v25 }
 0x2cc   : > { %1333 = vadd.xlane.f32.xlu1 %v1332_v24 }
 0x2d4   : > { %1360 = vadd.xlane.f32.xlu1 %v1359_v2 }
 0x2ed   : > { %1535 = vperm.xlu1 %2250, %v2251_v57  }
 0x31e   : > { %v1319_v51 = vpop.xlane.xlu2 %1318  ;;  %v1340_v10 = vpop.xlane.xlu0 %1339 }
 0x31f   : > { %v1316_v45 = vpop.xlane.xlu1 %1315 }
 0x320   : > { %v1362_v46 = vadd.f32 %v1319_v51, %v1316_v45 }
 0x322   : > { %v1363_v54 = vrot.slane %v1362_v46, 4 }
 0x324   : > { %v1364_v27 = vadd.f32 %v1363_v54, %v1362_v46 }
 0x326   : > { %v1322_v28 = vpop.xlane.xlu2 %1321  ;;  %v1325_v50 = vpop.xlane.xlu0 %1324  ;;  %v1365_v1 = vrot.slane %v1364_v27, 2 }
 0x327   : > { %v1343_v37 = vpop.xlane.xlu1 %1342  ;;  %v1369_v11 = vadd.f32 %v1325_v50, %v1322_v28 }
 0x328   : > { %v1390_v58 = vadd.f32 %v1343_v37, %v1340_v10  ;;  %v1366_v30 = vadd.f32 %v1365_v1, %v1364_v27 }
 0x329   : > { %v1370_v0 = vrot.slane %v1369_v11, 4 }
 0x32a   : > { %v1391_v38 = vrot.slane %v1390_v58, 4  ;;  %v1367_v42 = vrot.slane %v1366_v30, 1 }
 0x32b   : > { %v1371_v61 = vadd.f32 %v1370_v0, %v1369_v11 }
 0x32c   : > { %v1392_v31 = vadd.f32 %v1391_v38, %v1390_v58  ;;  %v1368_v18 = vadd.f32 %v1367_v42, %v1366_v30 }
 0x32d   : > { %v1372_v47 = vrot.slane %v1371_v61, 2 }
 0x32e   : > { %v1393_v14 = vrot.slane %v1392_v31, 2  ;;  %v1349_v63 = vpop.xlane.xlu2 %1348  ;;  %v1328_v35 = vpop.xlane.xlu0 %1327 }
 0x32f   : > { %v1346_v60 = vpop.xlane.xlu1 %1345  ;;  %v1373_v43 = vadd.f32 %v1372_v47, %v1371_v61 }
 0x330   : > { %v1394_v4 = vadd.f32 %v1393_v14, %v1392_v31  ;;  %v1397_v23 = vadd.f32 %v1349_v63, %v1346_v60 }
 0x331   : > { %v1374_v36 = vrot.slane %v1373_v43, 1 }
 0x332   : > { %v1395_v13 = vrot.slane %v1394_v4, 1  ;;  %v1398_v3 = vrot.slane %v1397_v23, 4 }
 0x333   : > { %v1375_v56 = vadd.f32 %v1374_v36, %v1373_v43 }
 0x334   : > { %v1396_v6 = vadd.f32 %v1395_v13, %v1394_v4  ;;  %v1399_v17 = vadd.f32 %v1398_v3, %v1397_v23 }
 0x336   : > { %v1418_v32 = vadd.f32 %v1396_v6, %v1368_v18  ;;  %v1400_v55 = vrot.slane %v1399_v17, 2  ;;  %v1352_v19 = vpop.xlane.xlu2 %1351  ;;  %v1355_v59 = vpop.xlane.xlu0 %1354 }
 0x337   : > { %v1331_v9 = vpop.xlane.xlu1 %1330  ;;  %v1404_v16 = vadd.f32 %v1355_v59, %v1352_v19 }
 0x338   : > { %v1422_v52 = vmul.f32 0.001953125, %v1418_v32  ;;  %v1401_v53 = vadd.f32 %v1400_v55, %v1399_v17  ;;  %v1376_v39 = vadd.f32 %v1331_v9, %v1328_v35 }
 0x339   : > { %v1405_v62 = vrot.slane %v1404_v16, 4 }
 0x33a   : > { %v1426_v26 = vmax.f32 %v1422_v52, 0.0  ;;  %v1402_v24 = vrot.slane %v1401_v53, 1  ;;  %v1377_v5 = vrot.slane %v1376_v39, 4  ;;  %v1430_v52 = vld [vmem:[%s4123_s3] sm:$0x1] }
 0x33b   : > { %v1406_v2 = vadd.f32 %v1405_v62, %v1404_v16 }
 0x33c   : > { %v1434_v57 = vadd.f32 1e-05, %v1426_v26  ;;  %v1403_v51 = vadd.f32 %v1402_v24, %v1401_v53  ;;  %v1378_v10 = vadd.f32 %v1377_v5, %v1376_v39 }
 0x33d   : > { %v1407_v45 = vrot.slane %v1406_v2, 2 }
 0x33e   : > { %2255 = vrsqrt.f32 %v1434_v57  ;;  %v1419_v46 = vadd.f32 %v1403_v51, %v1375_v56  ;;  %v1379_v54 = vrot.slane %v1378_v10, 2  ;;  %v1337_v27 = vpop.xlane.xlu2 %1336  ;;  %v1358_v4 = vpop.xlane.xlu0 %1357  ;;  %vm1444_vm7 = vweird.f32 %v1434_v57 }
 0x33f   : > { %v1408_v28 = vadd.f32 %v1407_v45, %v1406_v2  ;;  %v1334_v50 = vpop.xlane.xlu1 %1333 }
 0x340   : > { %v1423_v37 = vmul.f32 0.001953125, %v1419_v46  ;;  %v1380_v11 = vadd.f32 %v1379_v54, %v1378_v10  ;;  %v1383_v1 = vadd.f32 %v1337_v27, %v1334_v50 }
 0x341   : > { %v1409_v58 = vrot.slane %v1408_v28, 1 }
 0x342   : > { %v1427_v0 = vmax.f32 %v1423_v37, 0.0  ;;  %v1381_v38 = vrot.slane %v1380_v11, 1  ;;  %v1384_v30 = vrot.slane %v1383_v1, 4 }
 0x343   : > { %v1410_v31 = vadd.f32 %v1409_v58, %v1408_v28  ;;  %v2252_v58 = vld [vmem:[%s4122_s4 + $0x1] ss:$0 sm:$0xff] }
 0x344   : > { %v2256_v61 = vpop.eup %2255  ;;  %v1435_v14 = vadd.f32 1e-05, %v1427_v0  ;;  %v1382_v63 = vadd.f32 %v1381_v38, %v1380_v11  ;;  %v1385_v35 = vadd.f32 %v1384_v30, %v1383_v1 }
 0x345   : > { %v1439_v60 = vmul.f32 %v2256_v61, %v1434_v57  ;;  %vm1445_vm6 = vweird.f32 %v2256_v61  ;;  %v1431_v57 = vld [vmem:[%s4123_s3 + $0x1] sm:$0x1] }
 0x346   : > { %2257 = vrsqrt.f32 %v1435_v14  ;;  %v1420_v42 = vadd.f32 %v1410_v31, %v1382_v63  ;;  %v1386_v3 = vrot.slane %v1385_v35, 2  ;;  %vm1446_vm8 = vmor %vm1444_vm7, %vm1445_vm6  ;;  %vm1454_vm10 = vweird.f32 %v1435_v14 }
 0x347   : > { %v1361_v47 = vpop.xlane.xlu1 %1360  ;;  %v1440_v23 = vmul.f32 %v2256_v61, %v1439_v60 }
 0x348   : > { %v1424_v13 = vmul.f32 0.001953125, %v1420_v42  ;;  %v1411_v18 = vadd.f32 %v1361_v47, %v1358_v4  ;;  %v1387_v59 = vadd.f32 %v1386_v3, %v1385_v35  ;;  %v2253_v3 = vld [vmem:[%s4122_s4 + $0x2] ss:$0 sm:$0xff] }
 0x349   : > { %v1441_v6 = vmul.f32 0.5, %v1440_v23 }
 0x34a   : > { %v1428_v43 = vmax.f32 %v1424_v13, 0.0  ;;  %v1412_v17 = vrot.slane %v1411_v18, 4  ;;  %v1388_v26 = vrot.slane %v1387_v59, 1 }
 0x34b   : > { %v1442_v32 = vsub.f32 1.5, %v1441_v6 }
 0x34c   : > { %v2258_v55 = vpop.eup %2257  ;;  %v1436_v19 = vadd.f32 1e-05, %v1428_v43  ;;  %v1413_v9 = vadd.f32 %v1412_v17, %v1411_v18  ;;  %v1389_v46 = vadd.f32 %v1388_v26, %v1387_v59  ;;  %v1433_v43 = vld [vmem:[%s4123_s3 + $0x3] sm:$0x1] }
 0x34d   : > { %v1449_v16 = vmul.f32 %v2258_v55, %v1435_v14  ;;  %v1443_v36 = vmul.f32 %v2256_v61, %v1442_v32  ;;  %vm1455_vm9 = vweird.f32 %v2258_v55  ;;  %v1432_v14 = vld [vmem:[%s4123_s3 + $0x2] sm:$0x1]  ;;  %v2254_v59 = vld [vmem:[%s4122_s4 + $0x3] ss:$0 sm:$0xff]  ;;  %s3360_s3 = sld [smem:[#allocation8 + $0x382]] }
 0x34e   : > { %2259 = vrsqrt.f32 %v1436_v19  ;;  %v1414_v53 = vrot.slane %v1413_v9, 2  ;;  %vm1456_vm11 = vmor %vm1454_vm10, %vm1455_vm9  ;;  %vm1464_vm13 = vweird.f32 %v1436_v19  ;;  %s3362_s4 = sld [smem:[#allocation8 + $0x1]] }
 0x34f   : > { %v1447_v39 = vsel %vm1446_vm8, %v2256_v61, %v1443_v36  ;;  %v1450_v62 = vmul.f32 %v2258_v55, %v1449_v16 }
 0x350   : > { %v1415_v24 = vadd.f32 %v1414_v53, %v1413_v9  ;;  %v1478_v5 = vmul.f32 %v1447_v39, %v1430_v52  ;;  %v1567_v39 = vstv %s3318_s27 }
 0x351   : > { %v1451_v2 = vmul.f32 0.5, %v1450_v62  ;;  %v1570_v62 = vstv %s3314_s5  ;;  %s3398_s5 = sld [smem:[#allocation8 + $0x381]] }
 0x352   : > { %v1416_v56 = vrot.slane %v1415_v24, 1  ;;  %v1486_v51 = vperm.slane %v1478_v5, 0  ;;  %v1665_v5 = vstv %s3324_s11 }
 0x353   : > { %v1452_v10 = vsub.f32 1.5, %v1451_v2 }
 0x354   : > { %v2260_v45 = vpop.eup %2259  ;;  %v1417_v54 = vadd.f32 %v1416_v56, %v1415_v24  ;;  %1491 = vperm.xlu2 %2248, %v1486_v51   ;;  %v1617_v24 = vstv %s3316_s6  ;;  %v3395_v56 = vstv %s3330_s17  ;;  %v1761_v51 = vstv %s3332_s10 }
 0x355   : > { %v1459_v27 = vmul.f32 %v2260_v45, %v1436_v19  ;;  %v1453_v28 = vmul.f32 %v2258_v55, %v1452_v10  ;;  %vm1465_vm12 = vweird.f32 %v2260_v45  ;;  %v3401_v10 = vstv %s3334_s18 }
 0x356   : > { %v1421_v50 = vadd.f32 %v1417_v54, %v1389_v46  ;;  %vm1466_vm14 = vmor %vm1464_vm13, %vm1465_vm12 }
 0x357   : > { %v1457_v37 = vsel %vm1456_vm11, %v2258_v55, %v1453_v28  ;;  %v1460_v11 = vmul.f32 %v2260_v45, %v1459_v27  ;;  %v3411_v27 = vstv %s3338_s24 }
 0x358   : > { %v1425_v1 = vmul.f32 0.001953125, %v1421_v50  ;;  %v1479_v0 = vmul.f32 %v1457_v37, %v1431_v57  ;;  %v3414_v57 = vstv %s3340_s15  ;;  %v3421_v37 = vstv %s3342_s22 }
 0x359   : > { %v1461_v38 = vmul.f32 0.5, %v1460_v11  ;;  %v3424_v11 = vstv %s3344_s30 }
 0x35a   : > { %v1429_v30 = vmax.f32 %v1425_v1, 0.0  ;;  %v1487_v31 = vperm.slane %v1479_v0, 0  ;;  %v3427_v1 = vstv %s3346_s8  ;;  %v3433_v0 = vstv %s3350_s20 }
 0x35b   : > { %v1462_v61 = vsub.f32 1.5, %v1461_v38  ;;  %v3436_v38 = vstv %s3352_s13 }
 0x35c   : > { %v1437_v63 = vadd.f32 1e-05, %v1429_v30  ;;  %1539 = vperm.xlu2 %2248, %v2252_v58   ;;  %1495 = vperm.xlu0 %2249, %v1487_v31   ;;  %v3430_v58 = vstv %s3348_s21  ;;  %v3439_v30 = vstv %s3354_s0  ;;  %v3442_v31 = vstv %s3356_s1  ;;  %s3526_s0 = sld [smem:[#allocation8 + $0x3]] }
 0x35d   : > { %v1463_v35 = vmul.f32 %v2260_v45, %v1462_v61  ;;  %s3540_s1 = sld [smem:[#allocation8 + $0x83]] }
 0x35e   : > { %2261 = vrsqrt.f32 %v1437_v63  ;;  %vm1474_vm0 = vweird.f32 %v1437_v63 }
 0x35f   : > { %v1467_v60 = vsel %vm1466_vm14, %v2260_v45, %v1463_v35  ;;  %v1536_v26 = vpop.permute.xlu1 %1535  ;;  %v3404_v45 = vstv %s3336_s23  ;;  %v3450_v35 = vstv %s3360_s3  ;;  %s3566_s3 = sld [smem:[#allocation8 + $0x183]] }
 0x360   : > { %v1480_v42 = vmul.f32 %v1467_v60, %v1432_v14  ;;  %v3447_v14 = vstv %s3358_s2  ;;  %4124 = vst [vmem:[#allocation25_spill] sm:$0xff] %v3450_v35  ;;  %s3552_s2 = sld [smem:[#allocation8 + $0x103]] }
 0x362   : > { %v1488_v4 = vperm.slane %v1480_v42, 0 }
 0x364   : > { %v2262_v47 = vpop.eup %2261  ;;  %1499 = vperm.xlu2 %2248, %v1488_v4  }
 0x365   : > { %v1469_v23 = vmul.f32 %v2262_v47, %v1437_v63  ;;  %vm1475_vm15 = vweird.f32 %v2262_v47 }
 0x366   : > { %vm1476_vm1 = vmor %vm1474_vm0, %vm1475_vm15 }
 0x367   : > { %v1470_v13 = vmul.f32 %v2262_v47, %v1469_v23  ;;  %v3457_v23 = vstv %s3362_s4  ;;  %s3628_s4 = sld [smem:[#allocation8 + $0x203]] }
 0x369   : > { %v1471_v18 = vmul.f32 0.5, %v1470_v13  ;;  %v3460_v13 = vstv %s3364_s9 }
 0x36b   : > { %v1472_v6 = vsub.f32 1.5, %v1471_v18  ;;  %v3466_v18 = vstv %s3368_s25  ;;  %s3658_s25 = sld [smem:[#allocation8 + $0x303]] }
 0x36c   : > { %1543 = vperm.xlu2 %2248, %v2253_v3   ;;  %v3463_v3 = vstv %s3366_s26  ;;  %s3674_s26 = sld [smem:[#allocation8 + $0x383]] }
 0x36d   : > { %v1473_v17 = vmul.f32 %v2262_v47, %v1472_v6  ;;  %v3469_v6 = vstv %s3372_s29 }
 0x36f   : > { %v1477_v32 = vsel %vm1476_vm1, %v2262_v47, %v1473_v17  ;;  %v3475_v17 = vstv %s3388_s28 }
 0x370   : > { %v1481_v55 = vmul.f32 %v1477_v32, %v1433_v43  ;;  %v3472_v43 = vstv %s3378_s7  ;;  %4126 = vst [vmem:[#allocation27_spill] sm:$0xff] %v3475_v17  ;;  %v3478_v32 = vstv %s3398_s5  ;;  %s3642_s7 = sld [smem:[#allocation8 + $0x283]] }
 0x371   : > { %4125 = vst [vmem:[#allocation26_spill] sm:$0xff] %v3472_v43 }
 0x372   : > { %v1489_v19 = vperm.slane %v1481_v55, 0  ;;  %4127 = vst [vmem:[#allocation28_spill] sm:$0xff] %v3478_v32 }
 0x374   : > { %1503 = vperm.xlu1 %2250, %v1489_v19  }
 0x37c   : > { %1547 = vperm.xlu1 %2250, %v2254_v59  }
 0x3ae   : > { %v1492_v9 = vpop.permute.xlu2 %1491 }
 0x3af   : > { %v1506_v16 = vmul.f32 %v1492_v9, %v3201_v21  ;;  %v1507_v52 = vmul.f32 %v1492_v9, %v3198_v8  ;;  %v1514_v36 = vmul.f32 %v1492_v9, %v3195_v33  ;;  %v1515_v53 = vmul.f32 %v1492_v9, %v3213_v7 }
 0x3b0   : > { %v1614_v21 = vstv %s3320_s12  ;;  %v3383_v8 = vstv %s3322_s19  ;;  %v3391_v33 = vstv %s3326_s14  ;;  %v1713_v7 = vstv %s3328_s16 }
 0x3b1   : > { %v3406_v46 = vadd.f32 %v1536_v26, %v1506_v16  ;;  %v3408_v54 = vadd.f32 %v1536_v26, %v1507_v52  ;;  %v3416_v28 = vadd.f32 %v1536_v26, %v1514_v36  ;;  %v3418_v50 = vadd.f32 %v1536_v26, %v1515_v53 }
 0x3b3   : > { %v1571_v61 = vmul.f32 %v1570_v62, %v3406_v46  ;;  %v1572_v63 = vmul.f32 %v1570_v62, %v3408_v54  ;;  %v1573_v60 = vmul.f32 %v1570_v62, %v3416_v28  ;;  %v1574_v42 = vmul.f32 %v1570_v62, %v3418_v50 }
 0x3b4   : > { %v1618_v4 = vmul.f32 %v1617_v24, %v3406_v46  ;;  %v1619_v47 = vmul.f32 %v1617_v24, %v3408_v54  ;;  %v1620_v59 = vmul.f32 %v1617_v24, %v3416_v28  ;;  %v1621_v9 = vmul.f32 %v1617_v24, %v3418_v50 }
 0x3b5   : > { %v3480_v55 = vadd.f32 %v1571_v61, %v1567_v39  ;;  %v3482_v19 = vadd.f32 %v1572_v63, %v1567_v39  ;;  %v3486_v52 = vadd.f32 %v1573_v60, %v1567_v39  ;;  %v3488_v36 = vadd.f32 %v1574_v42, %v1567_v39 }
 0x3b6   : > { %v3386_v2 = vpop.permute.xlu2 %1539  ;;  %v3490_v53 = vadd.f32 %v1618_v4, %v1614_v21  ;;  %v3492_v62 = vadd.f32 %v1619_v47, %v1614_v21  ;;  %v1666_v26 = vmul.f32 %v1665_v5, %v3406_v46  ;;  %v1667_v61 = vmul.f32 %v1665_v5, %v3408_v54 }
 0x3b7   : > { %v1668_v63 = vmul.f32 %v1665_v5, %v3416_v28  ;;  %v1669_v32 = vmul.f32 %v1665_v5, %v3418_v50  ;;  %v1714_v17 = vmul.f32 %v1713_v7, %v3406_v46  ;;  %v1715_v24 = vmul.f32 %v1713_v7, %v3408_v54 }
 0x3b8   : > { %v1716_v60 = vmul.f32 %v1713_v7, %v3416_v28  ;;  %v1717_v39 = vmul.f32 %v1713_v7, %v3418_v50  ;;  %v3502_v42 = vadd.f32 %v1620_v59, %v1614_v21  ;;  %v3504_v4 = vadd.f32 %v1621_v9, %v1614_v21 }
 0x3b9   : > { %v1762_v47 = vmul.f32 %v1761_v51, %v3406_v46  ;;  %v1763_v43 = vmul.f32 %v1761_v51, %v3408_v54  ;;  %v1764_v25 = vmul.f32 %v1761_v51, %v3416_v28  ;;  %v1765_v5 = vmul.f32 %v1761_v51, %v3418_v50 }
 0x3ba   : > { %v1810_v20 = vmul.f32 %v3404_v45, %v3406_v46  ;;  %v1811_v12 = vmul.f32 %v3404_v45, %v3408_v54  ;;  %v3515_v7 = vadd.f32 %v1666_v26, %v3383_v8  ;;  %v3518_v21 = vadd.f32 %v1667_v61, %v3383_v8 }
 0x3bb   : > { %v3521_v59 = vadd.f32 %v1668_v63, %v3383_v8  ;;  %v3524_v9 = vadd.f32 %v1669_v32, %v3383_v8  ;;  %v3529_v51 = vadd.f32 %v1714_v17, %v3391_v33  ;;  %v3532_v40 = vadd.f32 %v1715_v24, %v3391_v33 }
 0x3bc   : > { %v3535_v26 = vadd.f32 %v1716_v60, %v3391_v33  ;;  %v3538_v61 = vadd.f32 %v1717_v39, %v3391_v33  ;;  %v3543_v63 = vadd.f32 %v1762_v47, %v3395_v56  ;;  %v3546_v8 = vadd.f32 %v1763_v43, %v3395_v56 }
 0x3bd   : > { %v1812_v17 = vmul.f32 %v3404_v45, %v3416_v28  ;;  %v1813_v32 = vmul.f32 %v3404_v45, %v3418_v50  ;;  %v3555_v24 = vadd.f32 %v1764_v25, %v3395_v56  ;;  %v3558_v33 = vadd.f32 %v1765_v5, %v3395_v56 }
 0x3be   : > { %v1500_v16 = vpop.permute.xlu2 %1499  ;;  %4128 = vst [vmem:[#allocation29_spill] sm:$0xff] %v3546_v8  ;;  %v3561_v60 = vadd.f32 %v1810_v20, %v3401_v10  ;;  %v3564_v43 = vadd.f32 %v1811_v12, %v3401_v10  ;;  %v1858_v39 = vmul.f32 %v3414_v57, %v3406_v46  ;;  %v1859_v45 = vmul.f32 %v3414_v57, %v3408_v54 }
 0x3bf   : > { %4129 = vst [vmem:[#allocation30_spill] sm:$0xff] %v3555_v24  ;;  %v1860_v25 = vmul.f32 %v3414_v57, %v3416_v28  ;;  %v1861_v56 = vmul.f32 %v3414_v57, %v3418_v50  ;;  %v1906_v20 = vmul.f32 %v3424_v11, %v3406_v46  ;;  %v1907_v12 = vmul.f32 %v3424_v11, %v3408_v54 }
 0x3c0   : > { %4130 = vst [vmem:[#allocation31_spill] sm:$0xff] %v3558_v33  ;;  %v1510_v5 = vmul.f32 %v1500_v16, %v3239_v34  ;;  %v1909_v33 = vmul.f32 %v3424_v11, %v3418_v50  ;;  %v1518_v24 = vmul.f32 %v1500_v16, %v3248_v41  ;;  %v1519_v57 = vmul.f32 %v1500_v16, %v3251_v29 }
 0x3c1   : > { %4131 = vst [vmem:[#allocation32_spill] sm:$0xff] %v3561_v60  ;;  %v1908_v60 = vmul.f32 %v3424_v11, %v3416_v28  ;;  %v3589_v46 = vadd.f32 %v1812_v17, %v3401_v10  ;;  %v3592_v54 = vadd.f32 %v1813_v32, %v3401_v10  ;;  %v3595_v8 = vadd.f32 %v1858_v39, %v3411_v27 }
 0x3c2   : > { %4132 = vst [vmem:[#allocation33_spill] sm:$0xff] %v3564_v43  ;;  %v1511_v43 = vmul.f32 %v1500_v16, %v3255_v44  ;;  %v3598_v28 = vadd.f32 %v1859_v45, %v3411_v27  ;;  %v3605_v50 = vadd.f32 %v1860_v25, %v3411_v27  ;;  %v3608_v10 = vadd.f32 %v1861_v56, %v3411_v27 }
 0x3c3   : > { %4133 = vst [vmem:[#allocation34_spill] sm:$0xff] %v3592_v54  ;;  %v3611_v11 = vadd.f32 %v1906_v20, %v3421_v37  ;;  %v3614_v16 = vadd.f32 %v1907_v12, %v3421_v37  ;;  %v3617_v17 = vadd.f32 %v1908_v60, %v3421_v37  ;;  %v3620_v32 = vadd.f32 %v1909_v33, %v3421_v37 }
 0x3c4   : > { %4134 = vst [vmem:[#allocation35_spill] sm:$0xff] %v3595_v8  ;;  %v3637_v25 = vstv %s3552_s2  ;;  %v3640_v60 = vstv %s3566_s3 }
 0x3c5   : > { %4135 = vst [vmem:[#allocation36_spill] sm:$0xff] %v3598_v28 }
 0x3c6   : > { %v1544_v47 = vpop.permute.xlu2 %1543  ;;  %4138 = vst [vmem:[#allocation39_spill] sm:$0xff] %v3605_v50 }
 0x3c7   : > { %v1554_v34 = vadd.f32 %v1544_v47, %v1510_v5  ;;  %v1555_v44 = vadd.f32 %v1544_v47, %v1511_v43  ;;  %v3600_v41 = vadd.f32 %v1544_v47, %v1518_v24  ;;  %v3602_v29 = vadd.f32 %v1544_v47, %v1519_v57  ;;  %4139 = vst [vmem:[#allocation40_spill] sm:$0xff] %v3608_v10 }
 0x3c8   : > { %4140 = vst [vmem:[#allocation41_spill] sm:$0xff] %v3611_v11  ;;  %v3623_v24 = vstv %s3526_s0  ;;  %v3626_v43 = vstv %s3540_s1 }
 0x3c9   : > { %4136 = vst [vmem:[#allocation37_spill] sm:$0xff] %v3600_v41  ;;  %v3631_v27 = vmul.f32 %v3427_v1, %v1554_v34  ;;  %v3634_v39 = vmul.f32 %v3427_v1, %v1555_v44  ;;  %v3646_v37 = vmul.f32 %v3427_v1, %v3600_v41  ;;  %v3650_v33 = vmul.f32 %v3427_v1, %v3602_v29 }
 0x3ca   : > { %4137 = vst [vmem:[#allocation38_spill] sm:$0xff] %v3602_v29  ;;  %v3653_v56 = vmul.f32 %v3430_v58, %v1554_v34  ;;  %v3656_v47 = vmul.f32 %v3430_v58, %v1555_v44  ;;  %v3662_v20 = vmul.f32 %v3430_v58, %v3600_v41  ;;  %v3666_v12 = vmul.f32 %v3430_v58, %v3602_v29 }
 0x3cb   : > { %4141 = vst [vmem:[#allocation42_spill] sm:$0xff] %v3614_v16  ;;  %v3669_v5 = vmul.f32 %v3433_v0, %v1554_v34  ;;  %v3672_v1 = vmul.f32 %v3433_v0, %v1555_v44  ;;  %v3682_v58 = vmul.f32 %v3433_v0, %v3600_v41  ;;  %v3686_v11 = vmul.f32 %v3433_v0, %v3602_v29 }
 0x3cc   : > { %4142 = vst [vmem:[#allocation43_spill] sm:$0xff] %v3617_v17  ;;  %v3689_v10 = vmul.f32 %v3436_v38, %v1554_v34  ;;  %v3692_v50 = vmul.f32 %v3436_v38, %v1555_v44  ;;  %v3710_v0 = vmul.f32 %v3439_v30, %v3600_v41  ;;  %v3717_v28 = vmul.f32 %v3442_v31, %v1554_v34 }
 0x3cd   : > { %4143 = vst [vmem:[#allocation44_spill] sm:$0xff] %v3620_v32 }
 0x3ce   : > { %v1496_v45 = vpop.permute.xlu0 %1495  ;;  %4144 = vst [vmem:[#allocation45_spill] sm:$0xff] %v3640_v60 }
 0x3cf   : > { %v1508_v57 = vmul.f32 %v1496_v45, %v3219_v49  ;;  %v1509_v32 = vmul.f32 %v1496_v45, %v3216_v15  ;;  %v1516_v17 = vmul.f32 %v1496_v45, %v3234_v22  ;;  %v1517_v16 = vmul.f32 %v1496_v45, %v3228_v48  ;;  %4145 = vst [vmem:[#allocation46_spill] sm:$0xff] %v3686_v11 }
 0x3d0   : > { %4146 = vst [vmem:[#allocation47_spill] sm:$0xff] %v3689_v10  ;;  %v3696_v15 = vmul.f32 %v3436_v38, %v3600_v41  ;;  %v3700_v49 = vmul.f32 %v3436_v38, %v3602_v29  ;;  %v3703_v48 = vmul.f32 %v3439_v30, %v1554_v34  ;;  %v3706_v22 = vmul.f32 %v3439_v30, %v1555_v44 }
 0x3d1   : > { %4147 = vst [vmem:[#allocation48_spill] sm:$0xff] %v3692_v50  ;;  %v3714_v45 = vmul.f32 %v3439_v30, %v3602_v29  ;;  %v3720_v38 = vmul.f32 %v3442_v31, %v1555_v44  ;;  %v3723_v8 = vadd.f32 %v3386_v2, %v1508_v57  ;;  %v3732_v30 = vadd.f32 %v3386_v2, %v1517_v16 }
 0x3d2   : > { %4148 = vst [vmem:[#allocation49_spill] sm:$0xff] %v3696_v15  ;;  %v3743_v57 = vmul.f32 %v3447_v14, %v1554_v34  ;;  %v3757_v16 = vmul.f32 %v3450_v35, %v1554_v34 }
 0x3d3   : > { %4149 = vst [vmem:[#allocation50_spill] sm:$0xff] %v3700_v49 }
 0x3d4   : > { %4150 = vst [vmem:[#allocation51_spill] sm:$0xff] %v3703_v48  ;;  %v1727_v48 = vmul.f32 %v3466_v18, %v3732_v30 }
 0x3d5   : > { %4151 = vst [vmem:[#allocation52_spill] sm:$0xff] %v3706_v22  ;;  %v3726_v22 = vadd.f32 %v3386_v2, %v1509_v32  ;;  %v3746_v32 = vmul.f32 %v3447_v14, %v1555_v44 }
 0x3d6   : > { %4152 = vst [vmem:[#allocation53_spill] sm:$0xff] %v3710_v0  ;;  %v3729_v0 = vadd.f32 %v3386_v2, %v1516_v17  ;;  %v3750_v17 = vmul.f32 %v3447_v14, %v3600_v41  ;;  %v3754_v2 = vmul.f32 %v3447_v14, %v3602_v29 }
 0x3d7   : > { %4153 = vst [vmem:[#allocation54_spill] sm:$0xff] %v3714_v45  ;;  %v1582_v14 = vmul.f32 %v3457_v23, %v3726_v22  ;;  %v1724_v45 = vmul.f32 %v3466_v18, %v3723_v8 }
 0x3d8   : > { %4154 = vst [vmem:[#allocation55_spill] sm:$0xff] %v3717_v28  ;;  %v3736_v28 = vmul.f32 %v3442_v31, %v3600_v41  ;;  %v1581_v41 = vmul.f32 %v3457_v23, %v3723_v8  ;;  %v1583_v34 = vmul.f32 %v3457_v23, %v3729_v0 }
 0x3d9   : > { %4155 = vst [vmem:[#allocation56_spill] sm:$0xff] %v3720_v38  ;;  %v3740_v38 = vmul.f32 %v3442_v31, %v3602_v29  ;;  %v3760_v31 = vmul.f32 %v3450_v35, %v1555_v44  ;;  %v1584_v44 = vmul.f32 %v3457_v23, %v3732_v30  ;;  %v1629_v29 = vmul.f32 %v3460_v13, %v3726_v22 }
 0x3da   : > { %4156 = vst [vmem:[#allocation57_spill] sm:$0xff] %v3736_v28  ;;  %v3769_v28 = vstv %s3658_s25  ;;  %v1631_v35 = vmul.f32 %v3460_v13, %v3732_v30  ;;  %v1678_v23 = vmul.f32 %v3463_v3, %v3729_v0  ;;  %v1585_v49 = vadd.f32 %v1581_v41, %v3480_v55 }
 0x3db   : > { %4157 = vst [vmem:[#allocation58_spill] sm:$0xff] %v3740_v38  ;;  %v3763_v38 = vstv %s3628_s4  ;;  %v1587_v15 = vadd.f32 %v1583_v34, %v3486_v52  ;;  %v1633_v10 = vadd.f32 %v1629_v29, %v3492_v62  ;;  %v3823_v52 = vadd.f32 %v1724_v45, %v3529_v51  ;;  %v4170_v51 = vld [vmem:[#allocation21_spill] sm:$0xff]  ;;  %v4172_v29 = vld [vmem:[#allocation26_spill] sm:$0xff] }
 0x3dc   : > { %4158 = vst [vmem:[#allocation59_spill] sm:$0xff] %v3743_v57  ;;  %v3766_v57 = vstv %s3642_s7  ;;  %v1635_v54 = vadd.f32 %v1631_v35, %v3504_v4  ;;  %v3817_v55 = vadd.f32 %v1678_v23, %v3521_v59  ;;  %v3832_v35 = vadd.f32 %v1727_v48, %v3538_v61  ;;  %v4169_v59 = vld [vmem:[#allocation22_spill] sm:$0xff]  ;;  %v4171_v61 = vld [vmem:[#allocation24_spill] sm:$0xff] }
 0x3dd   : > { %4159 = vst [vmem:[#allocation60_spill] sm:$0xff] %v3746_v32  ;;  %v3772_v32 = vstv %s3674_s26  ;;  %v1772_v62 = vmul.f32 %v3469_v6, %v3723_v8  ;;  %v1774_v4 = vmul.f32 %v3469_v6, %v3729_v0  ;;  %v1820_v48 = vmul.f32 %v4172_v29, %v3723_v8 }
 0x3de   : > { %4160 = vst [vmem:[#allocation61_spill] sm:$0xff] %v3750_v17  ;;  %v1679_v17 = vmul.f32 %v3463_v3, %v3732_v30  ;;  %v1821_v45 = vmul.f32 %v4172_v29, %v3726_v22 }
 0x3df   : > { %4161 = vst [vmem:[#allocation62_spill] sm:$0xff] %v3754_v2  ;;  %v1676_v2 = vmul.f32 %v3463_v3, %v3723_v8 }
 0x3e0   : > { %4162 = vst [vmem:[#allocation63_spill] sm:$0xff] %v3757_v16  ;;  %v1630_v16 = vmul.f32 %v3460_v13, %v3729_v0 }
 0x3e1   : > { %4163 = vst [vmem:[#allocation64_spill] sm:$0xff] %v3760_v31  ;;  %v1628_v31 = vmul.f32 %v3460_v13, %v3723_v8  ;;  %v1726_v13 = vmul.f32 %v3466_v18, %v3729_v0  ;;  %v1680_v60 = vadd.f32 %v1676_v2, %v3515_v7  ;;  %v1775_v7 = vmul.f32 %v3469_v6, %v3732_v30 }
 0x3e2   : > { %4164 = vst [vmem:[#allocation65_spill] sm:$0xff] %v3763_v38  ;;  %v1586_v38 = vadd.f32 %v1582_v14, %v3482_v19  ;;  %v1634_v11 = vadd.f32 %v1630_v16, %v3502_v42  ;;  %v3820_v19 = vadd.f32 %v1679_v17, %v3524_v9  ;;  %v1773_v42 = vmul.f32 %v3469_v6, %v3726_v22 }
 0x3e3   : > { %4165 = vst [vmem:[#allocation66_spill] sm:$0xff] %v3766_v57  ;;  %v1725_v57 = vmul.f32 %v3466_v18, %v3726_v22  ;;  %v1632_v50 = vadd.f32 %v1628_v31, %v3490_v53  ;;  %v3829_v53 = vadd.f32 %v1726_v13, %v3535_v26  ;;  %v1823_v6 = vmul.f32 %v4172_v29, %v3732_v30 }
 0x3e4   : > { %4166 = vst [vmem:[#allocation67_spill] sm:$0xff] %v3769_v28  ;;  %v3863_v31 = vadd.f32 %v1772_v62, %v3543_v63  ;;  %v1595_v14 = vadd.f32 %v3631_v27, %v1585_v49  ;;  %v1596_v34 = vadd.f32 %v3634_v39, %v1586_v38 }
 0x3e5   : > { %4167 = vst [vmem:[#allocation68_spill] sm:$0xff] %v3772_v32  ;;  %v1677_v32 = vmul.f32 %v3463_v3, %v3726_v22  ;;  %v1588_v3 = vadd.f32 %v1584_v44, %v3488_v36  ;;  %v3826_v36 = vadd.f32 %v1725_v57, %v3532_v40  ;;  %v4168_v40 = vld [vmem:[#allocation23_spill] sm:$0xff]  ;;  %v1822_v57 = vmul.f32 %v4172_v29, %v3729_v0 }
 0x3e6   : > { %v1504_v28 = vpop.permute.xlu1 %1503  ;;  %v1597_v44 = vadd.f32 %v3646_v37, %v1587_v15  ;;  %v1642_v27 = vadd.f32 %v3653_v56, %v1632_v50 }
 0x3e7   : > { %v1681_v18 = vadd.f32 %v1677_v32, %v3518_v21  ;;  %v1512_v21 = vmul.f32 %v1504_v28, %v4168_v40  ;;  %v1513_v9 = vmul.f32 %v1504_v28, %v4169_v59  ;;  %v1520_v26 = vmul.f32 %v1504_v28, %v4170_v51  ;;  %v4173_v59 = vld [vmem:[#allocation29_spill] sm:$0xff] }
 0x3e8   : > { %v1521_v41 = vmul.f32 %v1504_v28, %v4171_v61  ;;  %v1598_v63 = vadd.f32 %v3650_v33, %v1588_v3  ;;  %v4174_v33 = vld [vmem:[#allocation30_spill] sm:$0xff]  ;;  %v1644_v3 = vadd.f32 %v3662_v20, %v1634_v11  ;;  %v1690_v20 = vadd.f32 %v3669_v5, %v1680_v60 }
 0x3e9   : > { %v1778_v56 = vadd.f32 %v1774_v4, %v4174_v33  ;;  %v1692_v60 = vadd.f32 %v3682_v58, %v3817_v55  ;;  %v4182_v55 = vld [vmem:[#allocation47_spill] sm:$0xff] }
 0x3ee   : > { %v1548_v32 = vpop.permute.xlu1 %1547 }
 0x3ef   : > { %v3854_v17 = vadd.f32 %v1548_v32, %v1512_v21  ;;  %v3856_v2 = vadd.f32 %v1548_v32, %v1513_v9  ;;  %v3858_v16 = vadd.f32 %v1548_v32, %v1520_v26  ;;  %v3860_v28 = vadd.f32 %v1548_v32, %v1521_v41  ;;  %v4175_v41 = vld [vmem:[#allocation31_spill] sm:$0xff] }
 0x3f0   : > { %v1777_v9 = vadd.f32 %v1773_v42, %v4173_v59  ;;  %v1779_v29 = vadd.f32 %v1775_v7, %v4175_v41  ;;  %v1645_v42 = vadd.f32 %v3666_v12, %v1635_v54  ;;  %v4177_v7 = vld [vmem:[#allocation33_spill] sm:$0xff]  ;;  %v1691_v12 = vadd.f32 %v3672_v1, %v1681_v18  ;;  %v4180_v1 = vld [vmem:[#allocation46_spill] sm:$0xff] }
 0x3f1   : > { %v1601_v23 = vmul.f32 %v3623_v24, %v3854_v17  ;;  %v1602_v13 = vmul.f32 %v3623_v24, %v3856_v2  ;;  %v1603_v40 = vmul.f32 %v3623_v24, %v3858_v16  ;;  %v1604_v21 = vmul.f32 %v3623_v24, %v3860_v28 }
 0x3f2   : > { %v1648_v39 = vmul.f32 %v3626_v43, %v3854_v17  ;;  %v1649_v37 = vmul.f32 %v3626_v43, %v3856_v2  ;;  %v1650_v62 = vmul.f32 %v3626_v43, %v3858_v16  ;;  %v1643_v24 = vadd.f32 %v3656_v47, %v1633_v10  ;;  %v4176_v47 = vld [vmem:[#allocation32_spill] sm:$0xff] }
 0x3f3   : > { %v1605_v15 = vadd.f32 %v1601_v23, %v1595_v14  ;;  %v1606_v49 = vadd.f32 %v1602_v13, %v1596_v34  ;;  %v1607_v38 = vadd.f32 %v1603_v40, %v1597_v44  ;;  %v1608_v51 = vadd.f32 %v1604_v21, %v1598_v63  ;;  %v4178_v44 = vld [vmem:[#allocation45_spill] sm:$0xff]  ;;  %v4179_v23 = vld [vmem:[#allocation34_spill] sm:$0xff] }
 0x3f4   : > { %v1651_v50 = vmul.f32 %v3626_v43, %v3860_v28  ;;  %v1652_v26 = vadd.f32 %v1648_v39, %v1642_v27  ;;  %v1696_v61 = vmul.f32 %v3637_v25, %v3854_v17  ;;  %v1653_v10 = vadd.f32 %v1649_v37, %v1643_v24  ;;  %v4183_v27 = vld [vmem:[#allocation48_spill] sm:$0xff] }
 0x3f5   : > { %1609 = vst.msk [vmem:[#allocation11] sm:$0xff] %vm1141_vm5, %v1605_v15  ;;  %v1697_v43 = vmul.f32 %v3637_v25, %v3856_v2  ;;  %v3899_v4 = vadd.f32 %v1820_v48, %v4176_v47  ;;  %v1654_v11 = vadd.f32 %v1650_v62, %v1644_v3  ;;  %v1698_v32 = vmul.f32 %v3637_v25, %v3858_v16  ;;  %v4185_v62 = vld [vmem:[#allocation65_spill] sm:$0xff]  ;;  %v4187_v3 = vld [vmem:[#allocation28_spill] sm:$0xff] }
 0x3f6   : > { %1610 = vst.msk [vmem:[#allocation11 + $0x8] sm:$0xff] %vm1141_vm5, %v1606_v49  ;;  %v3906_v14 = vadd.f32 %v1821_v45, %v4177_v7  ;;  %v1655_v54 = vadd.f32 %v1651_v50, %v1645_v42  ;;  %v1699_v48 = vmul.f32 %v3637_v25, %v3860_v28  ;;  %v1826_v34 = vadd.f32 %v1822_v57, %v3589_v46  ;;  %v4181_v25 = vld [vmem:[#allocation27_spill] sm:$0xff]  ;;  %v4191_v7 = vld [vmem:[#allocation66_spill] sm:$0xff] }
 0x3f7   : > { %1611 = vst.msk [vmem:[#allocation11 + $0x80] sm:$0xff] %vm1141_vm5, %v1607_v38  ;;  %v1700_v5 = vadd.f32 %v1696_v61, %v1690_v20  ;;  %v1744_v45 = vmul.f32 %v4178_v44, %v3854_v17  ;;  %v1827_v13 = vadd.f32 %v1823_v6, %v4179_v23  ;;  %v1693_v18 = vadd.f32 %v4180_v1, %v3820_v19  ;;  %v4188_v61 = vld [vmem:[#allocation51_spill] sm:$0xff] }
 0x3f8   : > { %1612 = vst.msk [vmem:[#allocation11 + $0x88] sm:$0xff] %vm1141_vm5, %v1608_v51  ;;  %v1701_v40 = vadd.f32 %v1697_v43, %v1691_v12  ;;  %v1745_v46 = vmul.f32 %v4178_v44, %v3856_v2  ;;  %v1868_v57 = vmul.f32 %v4181_v25, %v3723_v8  ;;  %v1702_v58 = vadd.f32 %v1698_v32, %v1692_v60  ;;  %v4189_v43 = vld [vmem:[#allocation52_spill] sm:$0xff] }
 0x3f9   : > { %1657 = vst.msk [vmem:[#allocation11 + $0x10] sm:$0xff] %vm1141_vm5, %v1652_v26  ;;  %v1738_v21 = vadd.f32 %v4182_v55, %v3823_v52  ;;  %v1746_v6 = vmul.f32 %v4178_v44, %v3858_v16  ;;  %v1869_v63 = vmul.f32 %v4181_v25, %v3726_v22  ;;  %v1703_v19 = vadd.f32 %v1699_v48, %v1693_v18  ;;  %v4184_v52 = vld [vmem:[#allocation49_spill] sm:$0xff]  ;;  %v4196_v18 = vld [vmem:[#allocation56_spill] sm:$0xff] }
 0x3fa   : > { %1658 = vst.msk [vmem:[#allocation11 + $0x18] sm:$0xff] %vm1141_vm5, %v1653_v10  ;;  %v1739_v39 = vadd.f32 %v4183_v27, %v3826_v36  ;;  %v1747_v37 = vmul.f32 %v4178_v44, %v3860_v28  ;;  %v1870_v15 = vmul.f32 %v4181_v25, %v3729_v0  ;;  %v1740_v49 = vadd.f32 %v4184_v52, %v3829_v53  ;;  %v4186_v36 = vld [vmem:[#allocation50_spill] sm:$0xff]  ;;  %v4194_v44 = vld [vmem:[#allocation55_spill] sm:$0xff]  ;;  %v4202_v52 = vld [vmem:[#allocation41_spill] sm:$0xff] }
 0x3fb   : > { %1659 = vst.msk [vmem:[#allocation11 + $0x90] sm:$0xff] %vm1141_vm5, %v1654_v11  ;;  %v1748_v38 = vadd.f32 %v1744_v45, %v1738_v21  ;;  %v1792_v59 = vmul.f32 %v4185_v62, %v3854_v17  ;;  %v1871_v51 = vmul.f32 %v4181_v25, %v3732_v30  ;;  %v1741_v24 = vadd.f32 %v4186_v36, %v3832_v35  ;;  %v4197_v25 = vld [vmem:[#allocation39_spill] sm:$0xff]  ;;  %v4201_v27 = vld [vmem:[#allocation58_spill] sm:$0xff] }
 0x3fc   : > { %1660 = vst.msk [vmem:[#allocation11 + $0x98] sm:$0xff] %vm1141_vm5, %v1655_v54  ;;  %v1749_v50 = vadd.f32 %v1745_v46, %v1739_v39  ;;  %v1793_v33 = vmul.f32 %v4185_v62, %v3856_v2  ;;  %v1916_v26 = vmul.f32 %v4187_v3, %v3723_v8  ;;  %v1750_v53 = vadd.f32 %v1746_v6, %v1740_v49  ;;  %v4199_v21 = vld [vmem:[#allocation67_spill] sm:$0xff] }
 0x3fd   : > { %1705 = vst.msk [vmem:[#allocation11 + $0x20] sm:$0xff] %vm1141_vm5, %v1700_v5  ;;  %v1786_v41 = vadd.f32 %v4188_v61, %v3863_v31  ;;  %v1794_v42 = vmul.f32 %v4185_v62, %v3858_v16  ;;  %v1917_v10 = vmul.f32 %v4187_v3, %v3726_v22  ;;  %v1751_v35 = vadd.f32 %v1747_v37, %v1741_v24  ;;  %v4190_v31 = vld [vmem:[#allocation53_spill] sm:$0xff] }
 0x3fe   : > { %1706 = vst.msk [vmem:[#allocation11 + $0x28] sm:$0xff] %vm1141_vm5, %v1701_v40  ;;  %v1787_v47 = vadd.f32 %v4189_v43, %v1777_v9  ;;  %v1795_v8 = vmul.f32 %v4185_v62, %v3860_v28  ;;  %v1918_v11 = vmul.f32 %v4187_v3, %v3729_v0  ;;  %v1788_v20 = vadd.f32 %v4190_v31, %v1778_v56  ;;  %v4192_v9 = vld [vmem:[#allocation54_spill] sm:$0xff]  ;;  %v4193_v0 = vld [vmem:[#allocation35_spill] sm:$0xff] }
 0x3ff   : > { %1707 = vst.msk [vmem:[#allocation11 + $0xa0] sm:$0xff] %vm1141_vm5, %v1702_v58  ;;  %v1796_v32 = vadd.f32 %v1792_v59, %v1786_v41  ;;  %v1840_v54 = vmul.f32 %v4191_v7, %v3854_v17  ;;  %v1919_v22 = vmul.f32 %v4187_v3, %v3732_v30  ;;  %v1789_v12 = vadd.f32 %v4192_v9, %v1779_v29  ;;  %v4195_v30 = vld [vmem:[#allocation36_spill] sm:$0xff]  ;;  %v4198_v58 = vld [vmem:[#allocation57_spill] sm:$0xff]  ;;  %v4204_v59 = vld [vmem:[#allocation42_spill] sm:$0xff] }
 0x400   : > { %1708 = vst.msk [vmem:[#allocation11 + $0xa8] sm:$0xff] %vm1141_vm5, %v1703_v19  ;;  %v1797_v48 = vadd.f32 %v1793_v33, %v1787_v47  ;;  %v1841_v60 = vmul.f32 %v4191_v7, %v3856_v2  ;;  %v1872_v5 = vadd.f32 %v1868_v57, %v4193_v0  ;;  %v1798_v56 = vadd.f32 %v1794_v42, %v1788_v20  ;;  %v4206_v33 = vld [vmem:[#allocation43_spill] sm:$0xff]  ;;  %v4208_v41 = vld [vmem:[#allocation68_spill] sm:$0xff]  ;;  %v4210_v43 = vld [vmem:[#allocation62_spill] sm:$0xff] }
 0x401   : > { %1753 = vst.msk [vmem:[#allocation11 + $0x30] sm:$0xff] %vm1141_vm5, %v1748_v38  ;;  %v1834_v45 = vadd.f32 %v4194_v44, %v3899_v4  ;;  %v1842_v23 = vmul.f32 %v4191_v7, %v3858_v16  ;;  %v1873_v1 = vadd.f32 %v1869_v63, %v4195_v30  ;;  %v1799_v29 = vadd.f32 %v1795_v8, %v1789_v12  ;;  %v4200_v63 = vld [vmem:[#allocation40_spill] sm:$0xff]  ;;  %v4211_v20 = vld [vmem:[#allocation37_spill] sm:$0xff] }
 0x402   : > { %1754 = vst.msk [vmem:[#allocation11 + $0x38] sm:$0xff] %vm1141_vm5, %v1749_v50  ;;  %v1835_v40 = vadd.f32 %v4196_v18, %v3906_v14  ;;  %v1843_v46 = vmul.f32 %v4191_v7, %v3860_v28  ;;  %v1874_v57 = vadd.f32 %v1870_v15, %v4197_v25  ;;  %v1836_v4 = vadd.f32 %v4198_v58, %v1826_v34  ;;  %v4203_v34 = vld [vmem:[#allocation59_spill] sm:$0xff] }
 0x403   : > { %1755 = vst.msk [vmem:[#allocation11 + $0xb0] sm:$0xff] %vm1141_vm5, %v1750_v53  ;;  %v1844_v55 = vadd.f32 %v1840_v54, %v1834_v45  ;;  %v1888_v6 = vmul.f32 %v4199_v21, %v3854_v17  ;;  %v1875_v19 = vadd.f32 %v1871_v51, %v4200_v63  ;;  %v1837_v39 = vadd.f32 %v4201_v27, %v1827_v13  ;;  %v4205_v13 = vld [vmem:[#allocation60_spill] sm:$0xff]  ;;  %v4213_v54 = vld [vmem:[#allocation63_spill] sm:$0xff] }
 0x404   : > { %1756 = vst.msk [vmem:[#allocation11 + $0xb8] sm:$0xff] %vm1141_vm5, %v1751_v35  ;;  %v1845_v14 = vadd.f32 %v1841_v60, %v1835_v40  ;;  %v1889_v37 = vmul.f32 %v4199_v21, %v3856_v2  ;;  %v1920_v15 = vadd.f32 %v1916_v26, %v4202_v52  ;;  %v1846_v49 = vadd.f32 %v1842_v23, %v1836_v4  ;;  %v4207_v26 = vld [vmem:[#allocation61_spill] sm:$0xff]  ;;  %v4209_v35 = vld [vmem:[#allocation44_spill] sm:$0xff] }
 0x405   : > { %1801 = vst.msk [vmem:[#allocation11 + $0x40] sm:$0xff] %vm1141_vm5, %v1796_v32  ;;  %v1882_v38 = vadd.f32 %v4203_v34, %v1872_v5  ;;  %v1890_v62 = vmul.f32 %v4199_v21, %v3858_v16  ;;  %v1921_v51 = vadd.f32 %v1917_v10, %v4204_v59  ;;  %v1847_v36 = vadd.f32 %v1843_v46, %v1837_v39  ;;  %v4215_v60 = vld [vmem:[#allocation64_spill] sm:$0xff] }
 0x406   : > { %1802 = vst.msk [vmem:[#allocation11 + $0x48] sm:$0xff] %vm1141_vm5, %v1797_v48  ;;  %v1883_v24 = vadd.f32 %v4205_v13, %v1873_v1  ;;  %v1891_v50 = vmul.f32 %v4199_v21, %v3860_v28  ;;  %v1922_v3 = vadd.f32 %v1918_v11, %v4206_v33  ;;  %v1884_v53 = vadd.f32 %v4207_v26, %v1874_v57  ;;  %v4212_v11 = vld [vmem:[#allocation25_spill] sm:$0xff] }
 0x407   : > { %1803 = vst.msk [vmem:[#allocation11 + $0xc0] sm:$0xff] %vm1141_vm5, %v1798_v56  ;;  %v1892_v61 = vadd.f32 %v1888_v6, %v1882_v38  ;;  %v1936_v42 = vmul.f32 %v4208_v41, %v3854_v17  ;;  %v1923_v10 = vadd.f32 %v1919_v22, %v4209_v35  ;;  %v1885_v47 = vadd.f32 %v4210_v43, %v1875_v19  ;;  %v4214_v22 = vld [vmem:[#allocation38_spill] sm:$0xff] }
 0x408   : > { %1804 = vst.msk [vmem:[#allocation11 + $0xc8] sm:$0xff] %vm1141_vm5, %v1799_v29  ;;  %v1893_v8 = vadd.f32 %v1889_v37, %v1883_v24  ;;  %v1937_v31 = vmul.f32 %v4208_v41, %v3856_v2  ;;  %v1928_v32 = vmul.f32 %v4212_v11, %v4211_v20  ;;  %v1894_v7 = vadd.f32 %v1890_v62, %v1884_v53 }
 0x409   : > { %1849 = vst.msk [vmem:[#allocation11 + $0x50] sm:$0xff] %vm1141_vm5, %v1844_v55  ;;  %v1930_v9 = vadd.f32 %v4213_v54, %v1920_v15  ;;  %v1938_v17 = vmul.f32 %v4208_v41, %v3858_v16  ;;  %v1929_v12 = vmul.f32 %v4212_v11, %v4214_v22  ;;  %v1895_v48 = vadd.f32 %v1891_v50, %v1885_v47 }
 0x40a   : > { %1850 = vst.msk [vmem:[#allocation11 + $0x58] sm:$0xff] %vm1141_vm5, %v1845_v14  ;;  %v1931_v0 = vadd.f32 %v4215_v60, %v1921_v51  ;;  %v1939_v2 = vmul.f32 %v4208_v41, %v3860_v28  ;;  %v1932_v5 = vadd.f32 %v1928_v32, %v1922_v3 }
 0x40b   : > { %1851 = vst.msk [vmem:[#allocation11 + $0xd0] sm:$0xff] %vm1141_vm5, %v1846_v49  ;;  %v1940_v56 = vadd.f32 %v1936_v42, %v1930_v9  ;;  %v1933_v44 = vadd.f32 %v1929_v12, %v1923_v10 }
 0x40c   : > { %1852 = vst.msk [vmem:[#allocation11 + $0xd8] sm:$0xff] %vm1141_vm5, %v1847_v36  ;;  %v1941_v45 = vadd.f32 %v1937_v31, %v1931_v0  ;;  %v1942_v16 = vadd.f32 %v1938_v17, %v1932_v5 }
 0x40d   : > { %1897 = vst.msk [vmem:[#allocation11 + $0x60] sm:$0xff] %vm1141_vm5, %v1892_v61  ;;  %v1943_v23 = vadd.f32 %v1939_v2, %v1933_v44 }
 0x40e   : > { %1898 = vst.msk [vmem:[#allocation11 + $0x68] sm:$0xff] %vm1141_vm5, %v1893_v8 }
 0x40f   : > { %1899 = vst.msk [vmem:[#allocation11 + $0xe0] sm:$0xff] %vm1141_vm5, %v1894_v7 }
 0x410   : > { %1900 = vst.msk [vmem:[#allocation11 + $0xe8] sm:$0xff] %vm1141_vm5, %v1895_v48 }
 0x411   : > { %1945 = vst.msk [vmem:[#allocation11 + $0x70] sm:$0xff] %vm1141_vm5, %v1940_v56 }
 0x412   : > { %1946 = vst.msk [vmem:[#allocation11 + $0x78] sm:$0xff] %vm1141_vm5, %v1941_v45 }
 0x413   : > { %1947 = vst.msk [vmem:[#allocation11 + $0xf0] sm:$0xff] %vm1141_vm5, %v1942_v16 }
 0x414   : > { %1948 = vst.msk [vmem:[#allocation11 + $0xf8] sm:$0xff] %vm1141_vm5, %v1943_v23 }
 0x415 PF: > { %s4216_s28 = sld [smem:[#allocation18_spill]]  ;;  %s2409_s29 = smov [#allocation11]  }
 0x416   : > { %s1954_s9 = sshll.u32 %s2409_s29, 4  ;;  %s4217_s12 = sld [smem:[#allocation76_spill]]  ;;  %s1955_s9 = int_to_ptr.vmem [resolvable:$true] %s1954_s9 }
 0x417   : > { %s2410_s11 = smov 128   ;;  %s2411_s14 = smov 8  }
 0x41b   : > { %p2194_p8 = scmp.eq.s32.totalorder %s4216_s28, 1 }
 0x41c   : > { %s1956_s19 = sshll.u32 %s4217_s12, 4  ;;  %s1957_s19 = int_to_ptr.hbm [resolvable:$true] %s1956_s19 }
 0x41d   : > { %2175 = dma.vmem_to_hbm [thread:$0]  (%p2194_p8), %s1955_s9, 4096, %s1957_s19, [#allocation6], %s2410_s11, %s2410_s11, %s2411_s14  }
 0x41e   : > { %2380 = dma.done.wait (%p2194_p8), [#allocation6], 4096  }
 0x41f   : > { %2382 = vsyncadd (%p2194_p8), [#allocation6], 4294963200 }
 0x420 PF: > { %s4218_s27 = sld [smem:[#allocation19_spill]] }
 0x421   : > { %s4219_s24 = sld [smem:[#allocation16_spill]] }
 0x422   : > { %s4220_s25 = sld [smem:[#allocation17_spill]] }
 0x423   : > { %s4221_s26 = sld [smem:[#allocation20_spill]] }
 0x426   : > { %p20_p9 = scmp.ge.s32.totalorder %s4218_s27, 4  }
 0x428   :  { %22 = sbr.rel (!%p20_p9) target bundleno = 15 (0xf), region = 110 }
 0x42d   :  { %1973 = vsyncpa [#allocation5], 1 }
 0x42e   :  { %1975 = vsyncpa [#allocation5 + $0x1], 1 }
 0x42f   :  { %1976 = vsyncpa [#allocation6], 1 }
 0x430   :  { %1978 = vsyncpa [#allocation6 + $0x1], 1 }
 0x431   :  { %1979 = vsyncpa [#allocation7], 1 }
 0x432   :  { %1981 = vsyncpa [#allocation7 + $0x1], 1 }
 0x433   :  { %1982 = vsyncpa [#allocation10], 1 }

</bundles_post_ra>
